<compile_context>
chip_gen: v7x
topology: tpu7x:2x2x1
jax: 0.10.0
libtpu: 0.0.40
codegen_flags: <defaults>
</compile_context>

<pallas_src>
import math

import jax
import jax.numpy as jnp
from jax.experimental import pallas as pl
from jax.experimental.pallas import tpu as pltpu

_LANE = 128  # TPU lane width; per-head channel groups are padded to this.


# ----------------------------------------------------------------------------
# small math helpers (used inside the kernel)
# ----------------------------------------------------------------------------
def _layernorm(x, w, b, eps=1e-5):
    mu = jnp.mean(x, axis=-1, keepdims=True)
    var = jnp.mean((x - mu) ** 2, axis=-1, keepdims=True)
    return (x - mu) * jax.lax.rsqrt(var + eps) * w + b


def _gelu_tanh(x):
    # tanh-approximation GELU: the transcendental lands on the EUP slot.
    # Max deviation from torch's exact erf GELU is ~1e-3 per activation.
    # TODO(synk): switch to the exact erf form if lax.erf gains a Mosaic lowering.
    c = 0.7978845608028654  # sqrt(2/pi)
    return 0.5 * x * (1.0 + jnp.tanh(c * (x + 0.044715 * x * x * x)))


# ----------------------------------------------------------------------------
# kernel body
# ----------------------------------------------------------------------------
def _cross_block_kernel(x_ref,
                        ln1w_ref, ln1b_ref,
                        wq_ref, wk_ref, wv_ref,
                        wproj_ref, bproj_ref,
                        ln2w_ref, ln2b_ref,
                        wfc1_ref, bfc1_ref, wfc2_ref, bfc2_ref,
                        out_ref):
    x = x_ref[...]                                   # (2, bb, N, C) f32, streams stacked
    _, bb, N, C = x.shape
    H, hd_p, _ = wproj_ref.shape                     # heads, padded head dim (mult. of 128)
    half = bb * N
    R = 2 * half                                     # all rows: both streams x batch block
    G = 2 * bb

    xr = x.reshape(R, C)

    # ---- norm1 on both streams in one row-stacked operand -------------------
    nb = _layernorm(xr, ln1w_ref[...], ln1b_ref[...]).astype(jnp.bfloat16)
    # Stream swap done once, on bf16, BEFORE the matmuls: k/v are computed from
    # the *other* stream's rows so group s pairs q(stream s) with k/v(stream 1-s)
    # and the projection output is already in original stream order (no un-swap).
    nb_sw = jnp.concatenate([nb[half:], nb[:half]], axis=0)

    # ---- q/k/v projections: lane-aligned padded weights (scale baked into Wq);
    #      bf16 operands, f32 MXU accumulation, immediate bf16 cast ------------
    q = jnp.dot(nb, wq_ref[...], preferred_element_type=jnp.float32).astype(jnp.bfloat16)
    k = jnp.dot(nb_sw, wk_ref[...], preferred_element_type=jnp.float32).astype(jnp.bfloat16)
    v = jnp.dot(nb_sw, wv_ref[...], preferred_element_type=jnp.float32).astype(jnp.bfloat16)

    q3 = q.reshape(G, N, H * hd_p)
    k3 = k.reshape(G, N, H * hd_p)
    v3 = v.reshape(G, N, H * hd_p)

    # ---- attention + output projection, one head at a time ------------------
    # Head slices are lane-tile aligned (hd_p % 128 == 0) -> no relayout, no
    # concat; the per-head loop also keeps the live score block at (G, N, N).
    proj = jnp.zeros((R, C), jnp.float32)
    for h in range(H):
        sl = slice(h * hd_p, (h + 1) * hd_p)
        s = jnp.einsum('gqd,gkd->gqk', q3[:, :, sl], k3[:, :, sl],
                       preferred_element_type=jnp.float32)
        s = s - jnp.max(s, axis=-1, keepdims=True)
        p = jnp.exp(s)
        p = p * pl.reciprocal(jnp.sum(p, axis=-1, keepdims=True), approx=True)
        o = jnp.einsum('gqk,gkd->gqd', p.astype(jnp.bfloat16), v3[:, :, sl],
                       preferred_element_type=jnp.float32)
        # head-merge + output projection fused: accumulate o_h @ Wproj[h]
        proj = proj + jnp.dot(o.reshape(R, hd_p).astype(jnp.bfloat16), wproj_ref[h],
                              preferred_element_type=jnp.float32)
    proj = proj + bproj_ref[...]

    feat = xr + proj                                 # residual; rows in original stream order

    # ---- MLP (norm2 -> fc1 -> gelu -> fc2); NO residual after, per PyTorch ---
    h1 = _layernorm(feat, ln2w_ref[...], ln2b_ref[...]).astype(jnp.bfloat16)
    h1 = jnp.dot(h1, wfc1_ref[...], preferred_element_type=jnp.float32) + bfc1_ref[...]
    h1 = _gelu_tanh(h1).astype(jnp.bfloat16)
    out = jnp.dot(h1, wfc2_ref[...], preferred_element_type=jnp.float32) + bfc2_ref[...]

    out_ref[...] = out.reshape(2, bb, N, C)


# ----------------------------------------------------------------------------
# generation-aware sizing
# ----------------------------------------------------------------------------
def _tpu_vmem_and_cores():
    """Physical VMEM bytes and TensorCore count (best-effort, with safe defaults)."""
    vmem = 128 * 1024 * 1024
    cores = 1
    try:
        info = pltpu.get_tpu_info()
        vmem = int(getattr(info, "vmem_capacity_bytes", vmem) or vmem)
        for name in ("num_cores", "num_tensorcores", "tensorcore_count", "core_count"):
            val = getattr(info, name, None)
            if val:
                cores = int(val)
                break
    except Exception:
        pass
    return vmem, cores


def _step_vmem_bytes(bb, N, C, H, hd_p, hidden):
    """Rough per-grid-step VMEM working set (bytes)."""
    R = 2 * bb * N
    Cp = H * hd_p
    io = 2 * (R * C * 4) * 2                                   # stacked in+out blocks, 2x buffered
    w = (3 * C * Cp + Cp * C + C * hidden + hidden * C) * 2    # bf16 weights
    w += (6 * C + 2 * hidden) * 4                              # LN params + biases (f32)
    act = 3 * R * C * 4 + 2 * R * C * 2 + 3 * R * Cp * 2 + R * C * 4
    attn = 2 * bb * N * N * (4 + 2) + 2 * bb * N * hd_p * 4    # per-head scores/probs/out
    mlp = R * hidden * (4 + 2)
    return io + w + act + attn + mlp


def _pick_batch_block(B, N, C, H, hd_p, hidden, budget, cores):
    """Largest batch divisor whose working set fits; soft preference for
    MXU-aligned row counts and (on multi-core chips) >= cores grid steps."""
    divisors = [d for d in range(1, B + 1) if B % d == 0]
    fits = [d for d in divisors if _step_vmem_bytes(d, N, C, H, hd_p, hidden) <= budget]
    if not fits:
        fits = [1]

    def score(d):
        steps = B // d
        feeds_cores = cores <= 1 or steps >= cores
        mxu_aligned = (2 * d * N) % 256 == 0
        return (feeds_cores, mxu_aligned, d)

    return max(fits, key=score)


# ----------------------------------------------------------------------------
# wrapper
# ----------------------------------------------------------------------------
def cross_block_forward(feat1, feat2, params, num_heads, batch_block=None):
    """feat1, feat2: (B, N, C), N a perfect square. Returns two NCHW tensors."""
    B, N, C = feat1.shape
    H = num_heads
    assert C % H == 0
    hd = C // H
    hd_p = -(-hd // _LANE) * _LANE                 # per-head width padded to the lane tile
    Cp = H * hd_p
    hidden = params["fc1_w"].shape[1]
    scale = hd ** -0.5
    Hs = int(math.isqrt(N))
    assert Hs * Hs == N, "N must be a perfect square"

    vmem_cap, cores = _tpu_vmem_and_cores()
    vmem_limit = min((vmem_cap * 3) // 4, 100 * 1024 * 1024)   # ~48 MiB v7x, ~96 MiB v5e/v6e
    budget = (vmem_limit * 7) // 10                            # headroom for compiler scratch
    bb = batch_block if batch_block is not None else _pick_batch_block(
        B, N, C, H, hd_p, hidden, budget, cores)
    assert B % bb == 0
    grid = (B // bb,)

    bf16 = jnp.bfloat16

    # ---- wrapper-side weight prep (all layout work stays out of the kernel) --
    qkv_w = params["qkv_w"]                        # (C, 3C), qkv_bias=False
    wq = qkv_w[:, :C] * scale                      # attention scale baked into Wq
    wk = qkv_w[:, C:2 * C]
    wv = qkv_w[:, 2 * C:]

    def pad_head_cols(w):                          # (C, C) -> (C, H*hd_p), zero-padded heads
        w3 = w.reshape(C, H, hd)
        w3 = jnp.pad(w3, ((0, 0), (0, 0), (0, hd_p - hd)))
        return w3.reshape(C, Cp)

    wq_p = pad_head_cols(wq).astype(bf16)
    wk_p = pad_head_cols(wk).astype(bf16)
    wv_p = pad_head_cols(wv).astype(bf16)
    wproj_p = jnp.pad(params["proj_w"].reshape(H, hd, C),
                      ((0, 0), (0, hd_p - hd), (0, 0))).astype(bf16)   # (H, hd_p, C)
    wfc1 = params["fc1_w"].astype(bf16)
    wfc2 = params["fc2_w"].astype(bf16)

    # ---- stack the two streams once in the wrapper ---------------------------
    x = jnp.stack([feat1, feat2], axis=0)          # (2, B, N, C)

    feat_spec = pl.BlockSpec((2, bb, N, C), lambda i: (0, i, 0, 0))

    def const(shape):                              # grid-constant (VMEM-resident) block
        zeros = (0,) * len(shape)
        return pl.BlockSpec(shape, lambda i, _z=zeros: _z)

    out = pl.pallas_call(
        _cross_block_kernel,
        out_shape=jax.ShapeDtypeStruct((2, B, N, C), jnp.float32),
        grid_spec=pltpu.PrefetchScalarGridSpec(
            num_scalar_prefetch=0,
            grid=grid,
            in_specs=[
                feat_spec,                                     # stacked feat1/feat2
                const((1, C)), const((1, C)),                  # norm1 w, b
                const((C, Cp)), const((C, Cp)), const((C, Cp)),  # Wq*scale, Wk, Wv (bf16, padded)
                const((H, hd_p, C)), const((1, C)),            # Wproj per head (bf16), bias
                const((1, C)), const((1, C)),                  # norm2 w, b
                const((C, hidden)), const((1, hidden)),        # fc1 w (bf16), bias
                const((hidden, C)), const((1, C)),             # fc2 w (bf16), bias
            ],
            out_specs=feat_spec,
            # TODO(synk): for N >= 128 emit (2, bb, C, N) blocks (fold the NCHW
            # permute into the kernel) so the output stores stay lane-dense.
        ),
        compiler_params=pltpu.CompilerParams(
            dimension_semantics=("parallel",),
            vmem_limit_bytes=int(vmem_limit),
        ),
    )(x,
      params["ln1_w"], params["ln1_b"],
      wq_p, wk_p, wv_p,
      wproj_p, params["proj_b"],
      params["ln2_w"], params["ln2_b"],
      wfc1, params["fc1_b"],
      wfc2, params["fc2_b"])

    # glue: permute(0, 2, 1) + reshape to (B, C, sqrt(N), sqrt(N))  (NCHW)
    r1 = jnp.transpose(out[0], (0, 2, 1)).reshape(B, C, Hs, Hs)
    r2 = jnp.transpose(out[1], (0, 2, 1)).reshape(B, C, Hs, Hs)
    return r1, r2


# ----------------------------------------------------------------------------
# pure-JAX f32 reference (faithful to the PyTorch module, exact erf GELU)
# ----------------------------------------------------------------------------
def _reference(feat1, feat2, params, num_heads):
    B, N, C = feat1.shape
    hd = C // num_heads
    scale = hd ** -0.5

    def ln(x, w, b):
        mu = jnp.mean(x, -1, keepdims=True)
        var = jnp.mean((x - mu) ** 2, -1, keepdims=True)
        return (x - mu) * jax.lax.rsqrt(var + 1e-5) * w + b

    def heads(t):
        return jnp.transpose(t.reshape(B, N, num_heads, hd), (0, 2, 1, 3))

    def qkv(xn):
        y = xn @ params["qkv_w"]
        return heads(y[..., :C]), heads(y[..., C:2 * C]), heads(y[..., 2 * C:])

    def attn(q, k, v):
        s = jnp.einsum('bhqd,bhkd->bhqk', q, k) * scale
        p = jax.nn.softmax(s, axis=-1)
        o = jnp.einsum('bhqk,bhkd->bhqd', p, v)
        return jnp.transpose(o, (0, 2, 1, 3)).reshape(B, N, C)

    n1 = ln(feat1, params["ln1_w"], params["ln1_b"])
    n2 = ln(feat2, params["ln1_w"], params["ln1_b"])
    q1, k1, v1 = qkv(n1)
    q2, k2, v2 = qkv(n2)

    proj = lambda t: t @ params["proj_w"] + params["proj_b"]
    x_to_feat2 = proj(attn(q2, k1, v1))   # CrossAttention returns this 2nd -> added to feat2
    x_to_feat1 = proj(attn(q1, k2, v2))   # returned 1st -> added to feat1

    f1 = feat1 + x_to_feat1
    f2 = feat2 + x_to_feat2

    def mlp(t):
        h = ln(t, params["ln2_w"], params["ln2_b"]) @ params["fc1_w"] + params["fc1_b"]
        h = 0.5 * h * (1.0 + jax.lax.erf(h * 0.7071067811865476))   # exact erf GELU
        return h @ params["fc2_w"] + params["fc2_b"]

    r1 = mlp(f1)
    r2 = mlp(f2)
    Hs = int(math.isqrt(N))
    return (jnp.transpose(r1, (0, 2, 1)).reshape(B, C, Hs, Hs),
            jnp.transpose(r2, (0, 2, 1)).reshape(B, C, Hs, Hs))


def init_params(key, dim, num_heads, mlp_ratio=4.0):
    hidden = int(dim * mlp_ratio)
    ks = jax.random.split(key, 10)
    s = 0.1
    return {
        "ln1_w": 1.0 + 0.1 * jax.random.normal(ks[0], (1, dim), jnp.float32),
        "ln1_b": 0.1 * jax.random.normal(ks[1], (1, dim), jnp.float32),
        "ln2_w": 1.0 + 0.1 * jax.random.normal(ks[2], (1, dim), jnp.float32),
        "ln2_b": 0.1 * jax.random.normal(ks[3], (1, dim), jnp.float32),
        # Linear weights stored already transposed: (in, out); qkv_bias=False
        "qkv_w": s * jax.random.normal(ks[4], (dim, 3 * dim), jnp.float32),
        "proj_w": s * jax.random.normal(ks[5], (dim, dim), jnp.float32),
        "proj_b": s * jax.random.normal(ks[6], (1, dim), jnp.float32),
        "fc1_w": s * jax.random.normal(ks[7], (dim, hidden), jnp.float32),
        "fc1_b": s * jax.random.normal(ks[8], (1, hidden), jnp.float32),
        "fc2_w": s * jax.random.normal(ks[9], (hidden, dim), jnp.float32),
        "fc2_b": jnp.zeros((1, dim), jnp.float32),
    }


if __name__ == "__main__":
    B, N, C = 2, 16, 32            # N must be a perfect square (H = W = 4)
    num_heads = 4
    mlp_ratio = 4.0

    key = jax.random.PRNGKey(0)
    kf1, kf2, kp = jax.random.split(key, 3)
    feat1 = jax.random.normal(kf1, (B, N, C), jnp.float32)
    feat2 = jax.random.normal(kf2, (B, N, C), jnp.float32)
    params = init_params(kp, C, num_heads, mlp_ratio)

    res1, res2 = cross_block_forward(feat1, feat2, params, num_heads)
    jax.block_until_ready((res1, res2))
    assert res1.shape == (B, C, 4, 4) and res2.shape == (B, C, 4, 4)

    # Numerical check vs a pure-JAX f32 reference (kernel uses bf16 MXU inputs,
    # approximate reciprocal and tanh-GELU, so a generous tolerance is expected).
    ref1, ref2 = _reference(feat1, feat2, params, num_heads)
    err = max(float(jnp.max(jnp.abs(res1 - ref1))),
              float(jnp.max(jnp.abs(res2 - ref2))))
    assert err < 5e-2, f"kernel/reference mismatch: max abs err = {err}"

    print("KERNEL_OK")
</pallas_src>

<mosaic_0001>
module attributes {stable_mosaic.version = 11 : i64} {
  func.func @_cross_block_kernel(%arg0: i32, %arg1: memref<2x2x16x32xf32, #tpu.memory_space<vmem>>, %arg2: memref<1x32xf32, #tpu.memory_space<vmem>>, %arg3: memref<1x32xf32, #tpu.memory_space<vmem>>, %arg4: memref<32x512xbf16, #tpu.memory_space<vmem>>, %arg5: memref<32x512xbf16, #tpu.memory_space<vmem>>, %arg6: memref<32x512xbf16, #tpu.memory_space<vmem>>, %arg7: memref<4x128x32xbf16, #tpu.memory_space<vmem>>, %arg8: memref<1x32xf32, #tpu.memory_space<vmem>>, %arg9: memref<1x32xf32, #tpu.memory_space<vmem>>, %arg10: memref<1x32xf32, #tpu.memory_space<vmem>>, %arg11: memref<32x128xbf16, #tpu.memory_space<vmem>>, %arg12: memref<1x128xf32, #tpu.memory_space<vmem>>, %arg13: memref<128x32xbf16, #tpu.memory_space<vmem>>, %arg14: memref<1x32xf32, #tpu.memory_space<vmem>>, %arg15: memref<2x2x16x32xf32, #tpu.memory_space<vmem>>) attributes {dimension_semantics = [#tpu.dimension_semantics<parallel>], iteration_bounds = array<i64: 1>, scalar_prefetch = 0 : i64, scratch_operands = 0 : i64, tpu.core_type = #tpu.core_type<tc>, window_params = [{transform_indices = @transform_0, window_bounds = array<i64: 2, 2, 16, 32>}, {pipeline_mode = #tpu.pipeline_mode<synchronous>, transform_indices = @transform_1, window_bounds = array<i64: 1, 32>}, {pipeline_mode = #tpu.pipeline_mode<synchronous>, transform_indices = @transform_2, window_bounds = array<i64: 1, 32>}, {pipeline_mode = #tpu.pipeline_mode<synchronous>, transform_indices = @transform_3, window_bounds = array<i64: 32, 512>}, {pipeline_mode = #tpu.pipeline_mode<synchronous>, transform_indices = @transform_4, window_bounds = array<i64: 32, 512>}, {pipeline_mode = #tpu.pipeline_mode<synchronous>, transform_indices = @transform_5, window_bounds = array<i64: 32, 512>}, {pipeline_mode = #tpu.pipeline_mode<synchronous>, transform_indices = @transform_6, window_bounds = array<i64: 4, 128, 32>}, {pipeline_mode = #tpu.pipeline_mode<synchronous>, transform_indices = @transform_7, window_bounds = array<i64: 1, 32>}, {pipeline_mode = #tpu.pipeline_mode<synchronous>, transform_indices = @transform_8, window_bounds = array<i64: 1, 32>}, {pipeline_mode = #tpu.pipeline_mode<synchronous>, transform_indices = @transform_9, window_bounds = array<i64: 1, 32>}, {pipeline_mode = #tpu.pipeline_mode<synchronous>, transform_indices = @transform_10, window_bounds = array<i64: 32, 128>}, {pipeline_mode = #tpu.pipeline_mode<synchronous>, transform_indices = @transform_11, window_bounds = array<i64: 1, 128>}, {pipeline_mode = #tpu.pipeline_mode<synchronous>, transform_indices = @transform_12, window_bounds = array<i64: 128, 32>}, {pipeline_mode = #tpu.pipeline_mode<synchronous>, transform_indices = @transform_13, window_bounds = array<i64: 1, 32>}, {transform_indices = @transform_14, window_bounds = array<i64: 2, 2, 16, 32>}]} {
    %c0 = arith.constant 0 : index
    %c0_0 = arith.constant 0 : index
    %c0_1 = arith.constant 0 : index
    %c0_2 = arith.constant 0 : index
    %0 = vector.load %arg1[%c0, %c0_0, %c0_1, %c0_2] : memref<2x2x16x32xf32, #tpu.memory_space<vmem>>, vector<2x2x16x32xf32>
    %1 = vector.shape_cast %0 : vector<2x2x16x32xf32> to vector<64x32xf32>
    %c0_3 = arith.constant 0 : index
    %c0_4 = arith.constant 0 : index
    %2 = vector.load %arg2[%c0_3, %c0_4] : memref<1x32xf32, #tpu.memory_space<vmem>>, vector<1x32xf32>
    %c0_5 = arith.constant 0 : index
    %c0_6 = arith.constant 0 : index
    %3 = vector.load %arg3[%c0_5, %c0_6] : memref<1x32xf32, #tpu.memory_space<vmem>>, vector<1x32xf32>
    %cst = arith.constant dense<0.000000e+00> : vector<64xf32>
    %4 = vector.multi_reduction <add>, %1, %cst [1] : vector<64x32xf32> to vector<64xf32>
    %5 = vector.shape_cast %4 : vector<64xf32> to vector<64x1xf32>
    %cst_7 = arith.constant 3.200000e+01 : f32
    %6 = vector.broadcast %cst_7 : f32 to vector<64x1xf32>
    %7 = arith.divf %5, %6 : vector<64x1xf32>
    %8 = vector.broadcast %7 : vector<64x1xf32> to vector<64x32xf32>
    %9 = arith.subf %1, %8 : vector<64x32xf32>
    %10 = arith.mulf %9, %9 : vector<64x32xf32>
    %cst_8 = arith.constant dense<0.000000e+00> : vector<64xf32>
    %11 = vector.multi_reduction <add>, %10, %cst_8 [1] : vector<64x32xf32> to vector<64xf32>
    %12 = vector.shape_cast %11 : vector<64xf32> to vector<64x1xf32>
    %cst_9 = arith.constant 3.200000e+01 : f32
    %13 = vector.broadcast %cst_9 : f32 to vector<64x1xf32>
    %14 = arith.divf %12, %13 : vector<64x1xf32>
    %15 = vector.broadcast %7 : vector<64x1xf32> to vector<64x32xf32>
    %16 = arith.subf %1, %15 : vector<64x32xf32>
    %cst_10 = arith.constant 9.99999974E-6 : f32
    %17 = vector.broadcast %cst_10 : f32 to vector<64x1xf32>
    %18 = arith.addf %14, %17 : vector<64x1xf32>
    %19 = math.rsqrt %18 : vector<64x1xf32>
    %20 = vector.broadcast %19 : vector<64x1xf32> to vector<64x32xf32>
    %21 = arith.mulf %16, %20 : vector<64x32xf32>
    %22 = vector.broadcast %2 : vector<1x32xf32> to vector<64x32xf32>
    %23 = arith.mulf %21, %22 : vector<64x32xf32>
    %24 = vector.broadcast %3 : vector<1x32xf32> to vector<64x32xf32>
    %25 = arith.addf %23, %24 : vector<64x32xf32>
    %26 = arith.truncf %25 : vector<64x32xf32> to vector<64x32xbf16>
    %27 = vector.extract_strided_slice %26 {offsets = [32, 0], sizes = [32, 32], strides = [1, 1]} : vector<64x32xbf16> to vector<32x32xbf16>
    %28 = vector.extract_strided_slice %26 {offsets = [0, 0], sizes = [32, 32], strides = [1, 1]} : vector<64x32xbf16> to vector<32x32xbf16>
    %29 = tpu.concatenate %27, %28 in 0 : vector<32x32xbf16>, vector<32x32xbf16> -> vector<64x32xbf16>
    %c0_11 = arith.constant 0 : index
    %c0_12 = arith.constant 0 : index
    %30 = vector.load %arg4[%c0_11, %c0_12] : memref<32x512xbf16, #tpu.memory_space<vmem>>, vector<32x512xbf16>
    %cst_13 = arith.constant dense<0.000000e+00> : vector<64x512xf32>
    %31 = tpu.matmul %26, %30, %cst_13 {dimension_numbers = #tpu.dot_dimension_numbers<[1], [0], [0], [1], [0, 0, 1, 1], [], []>} : vector<64x32xbf16>, vector<32x512xbf16>, vector<64x512xf32> -> vector<64x512xf32>
    %32 = arith.truncf %31 : vector<64x512xf32> to vector<64x512xbf16>
    %c0_14 = arith.constant 0 : index
    %c0_15 = arith.constant 0 : index
    %33 = vector.load %arg5[%c0_14, %c0_15] : memref<32x512xbf16, #tpu.memory_space<vmem>>, vector<32x512xbf16>
    %cst_16 = arith.constant dense<0.000000e+00> : vector<64x512xf32>
    %34 = tpu.matmul %29, %33, %cst_16 {dimension_numbers = #tpu.dot_dimension_numbers<[1], [0], [0], [1], [0, 0, 1, 1], [], []>} : vector<64x32xbf16>, vector<32x512xbf16>, vector<64x512xf32> -> vector<64x512xf32>
    %35 = arith.truncf %34 : vector<64x512xf32> to vector<64x512xbf16>
    %c0_17 = arith.constant 0 : index
    %c0_18 = arith.constant 0 : index
    %36 = vector.load %arg6[%c0_17, %c0_18] : memref<32x512xbf16, #tpu.memory_space<vmem>>, vector<32x512xbf16>
    %cst_19 = arith.constant dense<0.000000e+00> : vector<64x512xf32>
    %37 = tpu.matmul %29, %36, %cst_19 {dimension_numbers = #tpu.dot_dimension_numbers<[1], [0], [0], [1], [0, 0, 1, 1], [], []>} : vector<64x32xbf16>, vector<32x512xbf16>, vector<64x512xf32> -> vector<64x512xf32>
    %38 = arith.truncf %37 : vector<64x512xf32> to vector<64x512xbf16>
    %39 = vector.shape_cast %32 : vector<64x512xbf16> to vector<4x16x512xbf16>
    %40 = vector.shape_cast %35 : vector<64x512xbf16> to vector<4x16x512xbf16>
    %41 = vector.shape_cast %38 : vector<64x512xbf16> to vector<4x16x512xbf16>
    %cst_20 = arith.constant 0.000000e+00 : f32
    %42 = vector.broadcast %cst_20 : f32 to vector<64x32xf32>
    %43 = vector.extract_strided_slice %39 {offsets = [0, 0, 0], sizes = [4, 16, 128], strides = [1, 1, 1]} : vector<4x16x512xbf16> to vector<4x16x128xbf16>
    %44 = vector.extract_strided_slice %40 {offsets = [0, 0, 0], sizes = [4, 16, 128], strides = [1, 1, 1]} : vector<4x16x512xbf16> to vector<4x16x128xbf16>
    "tpu.trace_start"() <{level = 10 : i32, message = "gqd,gkd->gqk"}> : () -> ()
    %cst_21 = arith.constant dense<0.000000e+00> : vector<4x16x16xf32>
    %45 = tpu.matmul %43, %44, %cst_21 {dimension_numbers = #tpu.dot_dimension_numbers<[2], [2], [1], [1], [0, 0, 0, 1, 1, 1], [0], [0]>} : vector<4x16x128xbf16>, vector<4x16x128xbf16>, vector<4x16x16xf32> -> vector<4x16x16xf32>
    "tpu.trace_stop"() : () -> ()
    %cst_22 = arith.constant dense<0xFF800000> : vector<4x16xf32>
    %46 = vector.multi_reduction <maximumf>, %45, %cst_22 [2] : vector<4x16x16xf32> to vector<4x16xf32>
    %47 = vector.shape_cast %46 : vector<4x16xf32> to vector<4x16x1xf32>
    %48 = vector.broadcast %47 : vector<4x16x1xf32> to vector<4x16x16xf32>
    %49 = arith.subf %45, %48 : vector<4x16x16xf32>
    %50 = math.exp %49 : vector<4x16x16xf32>
    %cst_23 = arith.constant dense<0.000000e+00> : vector<4x16xf32>
    %51 = vector.multi_reduction <add>, %50, %cst_23 [2] : vector<4x16x16xf32> to vector<4x16xf32>
    %52 = vector.shape_cast %51 : vector<4x16xf32> to vector<4x16x1xf32>
    %53 = tpu.reciprocal %52 {approx = true} : vector<4x16x1xf32> -> vector<4x16x1xf32>
    %54 = vector.broadcast %53 : vector<4x16x1xf32> to vector<4x16x16xf32>
    %55 = arith.mulf %50, %54 : vector<4x16x16xf32>
    %56 = arith.truncf %55 : vector<4x16x16xf32> to vector<4x16x16xbf16>
    %57 = vector.extract_strided_slice %41 {offsets = [0, 0, 0], sizes = [4, 16, 128], strides = [1, 1, 1]} : vector<4x16x512xbf16> to vector<4x16x128xbf16>
    "tpu.trace_start"() <{level = 10 : i32, message = "gqk,gkd->gqd"}> : () -> ()
    %cst_24 = arith.constant dense<0.000000e+00> : vector<4x16x128xf32>
    %58 = tpu.matmul %56, %57, %cst_24 {dimension_numbers = #tpu.dot_dimension_numbers<[2], [1], [1], [2], [0, 0, 0, 1, 1, 2], [0], [0]>} : vector<4x16x16xbf16>, vector<4x16x128xbf16>, vector<4x16x128xf32> -> vector<4x16x128xf32>
    "tpu.trace_stop"() : () -> ()
    %59 = vector.shape_cast %58 : vector<4x16x128xf32> to vector<64x128xf32>
    %60 = arith.truncf %59 : vector<64x128xf32> to vector<64x128xbf16>
    %c0_25 = arith.constant 0 : index
    %c0_26 = arith.constant 0 : index
    %c0_27 = arith.constant 0 : index
    %61 = vector.load %arg7[%c0_25, %c0_26, %c0_27] : memref<4x128x32xbf16, #tpu.memory_space<vmem>>, vector<1x128x32xbf16>
    %62 = vector.shape_cast %61 : vector<1x128x32xbf16> to vector<128x32xbf16>
    %cst_28 = arith.constant dense<0.000000e+00> : vector<64x32xf32>
    %63 = tpu.matmul %60, %62, %cst_28 {dimension_numbers = #tpu.dot_dimension_numbers<[1], [0], [0], [1], [0, 0, 1, 1], [], []>} : vector<64x128xbf16>, vector<128x32xbf16>, vector<64x32xf32> -> vector<64x32xf32>
    %64 = arith.addf %42, %63 : vector<64x32xf32>
    %65 = vector.extract_strided_slice %39 {offsets = [0, 0, 128], sizes = [4, 16, 128], strides = [1, 1, 1]} : vector<4x16x512xbf16> to vector<4x16x128xbf16>
    %66 = vector.extract_strided_slice %40 {offsets = [0, 0, 128], sizes = [4, 16, 128], strides = [1, 1, 1]} : vector<4x16x512xbf16> to vector<4x16x128xbf16>
    "tpu.trace_start"() <{level = 10 : i32, message = "gqd,gkd->gqk"}> : () -> ()
    %cst_29 = arith.constant dense<0.000000e+00> : vector<4x16x16xf32>
    %67 = tpu.matmul %65, %66, %cst_29 {dimension_numbers = #tpu.dot_dimension_numbers<[2], [2], [1], [1], [0, 0, 0, 1, 1, 1], [0], [0]>} : vector<4x16x128xbf16>, vector<4x16x128xbf16>, vector<4x16x16xf32> -> vector<4x16x16xf32>
    "tpu.trace_stop"() : () -> ()
    %cst_30 = arith.constant dense<0xFF800000> : vector<4x16xf32>
    %68 = vector.multi_reduction <maximumf>, %67, %cst_30 [2] : vector<4x16x16xf32> to vector<4x16xf32>
    %69 = vector.shape_cast %68 : vector<4x16xf32> to vector<4x16x1xf32>
    %70 = vector.broadcast %69 : vector<4x16x1xf32> to vector<4x16x16xf32>
    %71 = arith.subf %67, %70 : vector<4x16x16xf32>
    %72 = math.exp %71 : vector<4x16x16xf32>
    %cst_31 = arith.constant dense<0.000000e+00> : vector<4x16xf32>
    %73 = vector.multi_reduction <add>, %72, %cst_31 [2] : vector<4x16x16xf32> to vector<4x16xf32>
    %74 = vector.shape_cast %73 : vector<4x16xf32> to vector<4x16x1xf32>
    %75 = tpu.reciprocal %74 {approx = true} : vector<4x16x1xf32> -> vector<4x16x1xf32>
    %76 = vector.broadcast %75 : vector<4x16x1xf32> to vector<4x16x16xf32>
    %77 = arith.mulf %72, %76 : vector<4x16x16xf32>
    %78 = arith.truncf %77 : vector<4x16x16xf32> to vector<4x16x16xbf16>
    %79 = vector.extract_strided_slice %41 {offsets = [0, 0, 128], sizes = [4, 16, 128], strides = [1, 1, 1]} : vector<4x16x512xbf16> to vector<4x16x128xbf16>
    "tpu.trace_start"() <{level = 10 : i32, message = "gqk,gkd->gqd"}> : () -> ()
    %cst_32 = arith.constant dense<0.000000e+00> : vector<4x16x128xf32>
    %80 = tpu.matmul %78, %79, %cst_32 {dimension_numbers = #tpu.dot_dimension_numbers<[2], [1], [1], [2], [0, 0, 0, 1, 1, 2], [0], [0]>} : vector<4x16x16xbf16>, vector<4x16x128xbf16>, vector<4x16x128xf32> -> vector<4x16x128xf32>
    "tpu.trace_stop"() : () -> ()
    %81 = vector.shape_cast %80 : vector<4x16x128xf32> to vector<64x128xf32>
    %82 = arith.truncf %81 : vector<64x128xf32> to vector<64x128xbf16>
    %c1 = arith.constant 1 : index
    %c0_33 = arith.constant 0 : index
    %c0_34 = arith.constant 0 : index
    %83 = vector.load %arg7[%c1, %c0_33, %c0_34] : memref<4x128x32xbf16, #tpu.memory_space<vmem>>, vector<1x128x32xbf16>
    %84 = vector.shape_cast %83 : vector<1x128x32xbf16> to vector<128x32xbf16>
    %cst_35 = arith.constant dense<0.000000e+00> : vector<64x32xf32>
    %85 = tpu.matmul %82, %84, %cst_35 {dimension_numbers = #tpu.dot_dimension_numbers<[1], [0], [0], [1], [0, 0, 1, 1], [], []>} : vector<64x128xbf16>, vector<128x32xbf16>, vector<64x32xf32> -> vector<64x32xf32>
    %86 = arith.addf %64, %85 : vector<64x32xf32>
    %87 = vector.extract_strided_slice %39 {offsets = [0, 0, 256], sizes = [4, 16, 128], strides = [1, 1, 1]} : vector<4x16x512xbf16> to vector<4x16x128xbf16>
    %88 = vector.extract_strided_slice %40 {offsets = [0, 0, 256], sizes = [4, 16, 128], strides = [1, 1, 1]} : vector<4x16x512xbf16> to vector<4x16x128xbf16>
    "tpu.trace_start"() <{level = 10 : i32, message = "gqd,gkd->gqk"}> : () -> ()
    %cst_36 = arith.constant dense<0.000000e+00> : vector<4x16x16xf32>
    %89 = tpu.matmul %87, %88, %cst_36 {dimension_numbers = #tpu.dot_dimension_numbers<[2], [2], [1], [1], [0, 0, 0, 1, 1, 1], [0], [0]>} : vector<4x16x128xbf16>, vector<4x16x128xbf16>, vector<4x16x16xf32> -> vector<4x16x16xf32>
    "tpu.trace_stop"() : () -> ()
    %cst_37 = arith.constant dense<0xFF800000> : vector<4x16xf32>
    %90 = vector.multi_reduction <maximumf>, %89, %cst_37 [2] : vector<4x16x16xf32> to vector<4x16xf32>
    %91 = vector.shape_cast %90 : vector<4x16xf32> to vector<4x16x1xf32>
    %92 = vector.broadcast %91 : vector<4x16x1xf32> to vector<4x16x16xf32>
    %93 = arith.subf %89, %92 : vector<4x16x16xf32>
    %94 = math.exp %93 : vector<4x16x16xf32>
    %cst_38 = arith.constant dense<0.000000e+00> : vector<4x16xf32>
    %95 = vector.multi_reduction <add>, %94, %cst_38 [2] : vector<4x16x16xf32> to vector<4x16xf32>
    %96 = vector.shape_cast %95 : vector<4x16xf32> to vector<4x16x1xf32>
    %97 = tpu.reciprocal %96 {approx = true} : vector<4x16x1xf32> -> vector<4x16x1xf32>
    %98 = vector.broadcast %97 : vector<4x16x1xf32> to vector<4x16x16xf32>
    %99 = arith.mulf %94, %98 : vector<4x16x16xf32>
    %100 = arith.truncf %99 : vector<4x16x16xf32> to vector<4x16x16xbf16>
    %101 = vector.extract_strided_slice %41 {offsets = [0, 0, 256], sizes = [4, 16, 128], strides = [1, 1, 1]} : vector<4x16x512xbf16> to vector<4x16x128xbf16>
    "tpu.trace_start"() <{level = 10 : i32, message = "gqk,gkd->gqd"}> : () -> ()
    %cst_39 = arith.constant dense<0.000000e+00> : vector<4x16x128xf32>
    %102 = tpu.matmul %100, %101, %cst_39 {dimension_numbers = #tpu.dot_dimension_numbers<[2], [1], [1], [2], [0, 0, 0, 1, 1, 2], [0], [0]>} : vector<4x16x16xbf16>, vector<4x16x128xbf16>, vector<4x16x128xf32> -> vector<4x16x128xf32>
    "tpu.trace_stop"() : () -> ()
    %103 = vector.shape_cast %102 : vector<4x16x128xf32> to vector<64x128xf32>
    %104 = arith.truncf %103 : vector<64x128xf32> to vector<64x128xbf16>
    %c2 = arith.constant 2 : index
    %c0_40 = arith.constant 0 : index
    %c0_41 = arith.constant 0 : index
    %105 = vector.load %arg7[%c2, %c0_40, %c0_41] : memref<4x128x32xbf16, #tpu.memory_space<vmem>>, vector<1x128x32xbf16>
    %106 = vector.shape_cast %105 : vector<1x128x32xbf16> to vector<128x32xbf16>
    %cst_42 = arith.constant dense<0.000000e+00> : vector<64x32xf32>
    %107 = tpu.matmul %104, %106, %cst_42 {dimension_numbers = #tpu.dot_dimension_numbers<[1], [0], [0], [1], [0, 0, 1, 1], [], []>} : vector<64x128xbf16>, vector<128x32xbf16>, vector<64x32xf32> -> vector<64x32xf32>
    %108 = arith.addf %86, %107 : vector<64x32xf32>
    %109 = vector.extract_strided_slice %39 {offsets = [0, 0, 384], sizes = [4, 16, 128], strides = [1, 1, 1]} : vector<4x16x512xbf16> to vector<4x16x128xbf16>
    %110 = vector.extract_strided_slice %40 {offsets = [0, 0, 384], sizes = [4, 16, 128], strides = [1, 1, 1]} : vector<4x16x512xbf16> to vector<4x16x128xbf16>
    "tpu.trace_start"() <{level = 10 : i32, message = "gqd,gkd->gqk"}> : () -> ()
    %cst_43 = arith.constant dense<0.000000e+00> : vector<4x16x16xf32>
    %111 = tpu.matmul %109, %110, %cst_43 {dimension_numbers = #tpu.dot_dimension_numbers<[2], [2], [1], [1], [0, 0, 0, 1, 1, 1], [0], [0]>} : vector<4x16x128xbf16>, vector<4x16x128xbf16>, vector<4x16x16xf32> -> vector<4x16x16xf32>
    "tpu.trace_stop"() : () -> ()
    %cst_44 = arith.constant dense<0xFF800000> : vector<4x16xf32>
    %112 = vector.multi_reduction <maximumf>, %111, %cst_44 [2] : vector<4x16x16xf32> to vector<4x16xf32>
    %113 = vector.shape_cast %112 : vector<4x16xf32> to vector<4x16x1xf32>
    %114 = vector.broadcast %113 : vector<4x16x1xf32> to vector<4x16x16xf32>
    %115 = arith.subf %111, %114 : vector<4x16x16xf32>
    %116 = math.exp %115 : vector<4x16x16xf32>
    %cst_45 = arith.constant dense<0.000000e+00> : vector<4x16xf32>
    %117 = vector.multi_reduction <add>, %116, %cst_45 [2] : vector<4x16x16xf32> to vector<4x16xf32>
    %118 = vector.shape_cast %117 : vector<4x16xf32> to vector<4x16x1xf32>
    %119 = tpu.reciprocal %118 {approx = true} : vector<4x16x1xf32> -> vector<4x16x1xf32>
    %120 = vector.broadcast %119 : vector<4x16x1xf32> to vector<4x16x16xf32>
    %121 = arith.mulf %116, %120 : vector<4x16x16xf32>
    %122 = arith.truncf %121 : vector<4x16x16xf32> to vector<4x16x16xbf16>
    %123 = vector.extract_strided_slice %41 {offsets = [0, 0, 384], sizes = [4, 16, 128], strides = [1, 1, 1]} : vector<4x16x512xbf16> to vector<4x16x128xbf16>
    "tpu.trace_start"() <{level = 10 : i32, message = "gqk,gkd->gqd"}> : () -> ()
    %cst_46 = arith.constant dense<0.000000e+00> : vector<4x16x128xf32>
    %124 = tpu.matmul %122, %123, %cst_46 {dimension_numbers = #tpu.dot_dimension_numbers<[2], [1], [1], [2], [0, 0, 0, 1, 1, 2], [0], [0]>} : vector<4x16x16xbf16>, vector<4x16x128xbf16>, vector<4x16x128xf32> -> vector<4x16x128xf32>
    "tpu.trace_stop"() : () -> ()
    %125 = vector.shape_cast %124 : vector<4x16x128xf32> to vector<64x128xf32>
    %126 = arith.truncf %125 : vector<64x128xf32> to vector<64x128xbf16>
    %c3 = arith.constant 3 : index
    %c0_47 = arith.constant 0 : index
    %c0_48 = arith.constant 0 : index
    %127 = vector.load %arg7[%c3, %c0_47, %c0_48] : memref<4x128x32xbf16, #tpu.memory_space<vmem>>, vector<1x128x32xbf16>
    %128 = vector.shape_cast %127 : vector<1x128x32xbf16> to vector<128x32xbf16>
    %cst_49 = arith.constant dense<0.000000e+00> : vector<64x32xf32>
    %129 = tpu.matmul %126, %128, %cst_49 {dimension_numbers = #tpu.dot_dimension_numbers<[1], [0], [0], [1], [0, 0, 1, 1], [], []>} : vector<64x128xbf16>, vector<128x32xbf16>, vector<64x32xf32> -> vector<64x32xf32>
    %130 = arith.addf %108, %129 : vector<64x32xf32>
    %c0_50 = arith.constant 0 : index
    %c0_51 = arith.constant 0 : index
    %131 = vector.load %arg8[%c0_50, %c0_51] : memref<1x32xf32, #tpu.memory_space<vmem>>, vector<1x32xf32>
    %132 = vector.broadcast %131 : vector<1x32xf32> to vector<64x32xf32>
    %133 = arith.addf %130, %132 : vector<64x32xf32>
    %134 = arith.addf %1, %133 : vector<64x32xf32>
    %c0_52 = arith.constant 0 : index
    %c0_53 = arith.constant 0 : index
    %135 = vector.load %arg9[%c0_52, %c0_53] : memref<1x32xf32, #tpu.memory_space<vmem>>, vector<1x32xf32>
    %c0_54 = arith.constant 0 : index
    %c0_55 = arith.constant 0 : index
    %136 = vector.load %arg10[%c0_54, %c0_55] : memref<1x32xf32, #tpu.memory_space<vmem>>, vector<1x32xf32>
    %cst_56 = arith.constant dense<0.000000e+00> : vector<64xf32>
    %137 = vector.multi_reduction <add>, %134, %cst_56 [1] : vector<64x32xf32> to vector<64xf32>
    %138 = vector.shape_cast %137 : vector<64xf32> to vector<64x1xf32>
    %cst_57 = arith.constant 3.200000e+01 : f32
    %139 = vector.broadcast %cst_57 : f32 to vector<64x1xf32>
    %140 = arith.divf %138, %139 : vector<64x1xf32>
    %141 = vector.broadcast %140 : vector<64x1xf32> to vector<64x32xf32>
    %142 = arith.subf %134, %141 : vector<64x32xf32>
    %143 = arith.mulf %142, %142 : vector<64x32xf32>
    %cst_58 = arith.constant dense<0.000000e+00> : vector<64xf32>
    %144 = vector.multi_reduction <add>, %143, %cst_58 [1] : vector<64x32xf32> to vector<64xf32>
    %145 = vector.shape_cast %144 : vector<64xf32> to vector<64x1xf32>
    %cst_59 = arith.constant 3.200000e+01 : f32
    %146 = vector.broadcast %cst_59 : f32 to vector<64x1xf32>
    %147 = arith.divf %145, %146 : vector<64x1xf32>
    %148 = vector.broadcast %140 : vector<64x1xf32> to vector<64x32xf32>
    %149 = arith.subf %134, %148 : vector<64x32xf32>
    %cst_60 = arith.constant 9.99999974E-6 : f32
    %150 = vector.broadcast %cst_60 : f32 to vector<64x1xf32>
    %151 = arith.addf %147, %150 : vector<64x1xf32>
    %152 = math.rsqrt %151 : vector<64x1xf32>
    %153 = vector.broadcast %152 : vector<64x1xf32> to vector<64x32xf32>
    %154 = arith.mulf %149, %153 : vector<64x32xf32>
    %155 = vector.broadcast %135 : vector<1x32xf32> to vector<64x32xf32>
    %156 = arith.mulf %154, %155 : vector<64x32xf32>
    %157 = vector.broadcast %136 : vector<1x32xf32> to vector<64x32xf32>
    %158 = arith.addf %156, %157 : vector<64x32xf32>
    %159 = arith.truncf %158 : vector<64x32xf32> to vector<64x32xbf16>
    %c0_61 = arith.constant 0 : index
    %c0_62 = arith.constant 0 : index
    %160 = vector.load %arg11[%c0_61, %c0_62] : memref<32x128xbf16, #tpu.memory_space<vmem>>, vector<32x128xbf16>
    %cst_63 = arith.constant dense<0.000000e+00> : vector<64x128xf32>
    %161 = tpu.matmul %159, %160, %cst_63 {dimension_numbers = #tpu.dot_dimension_numbers<[1], [0], [0], [1], [0, 0, 1, 1], [], []>} : vector<64x32xbf16>, vector<32x128xbf16>, vector<64x128xf32> -> vector<64x128xf32>
    %c0_64 = arith.constant 0 : index
    %c0_65 = arith.constant 0 : index
    %162 = vector.load %arg12[%c0_64, %c0_65] : memref<1x128xf32, #tpu.memory_space<vmem>>, vector<1x128xf32>
    %163 = vector.broadcast %162 : vector<1x128xf32> to vector<64x128xf32>
    %164 = arith.addf %161, %163 : vector<64x128xf32>
    %cst_66 = arith.constant 5.000000e-01 : f32
    %165 = vector.broadcast %cst_66 : f32 to vector<64x128xf32>
    %166 = arith.mulf %165, %164 : vector<64x128xf32>
    %cst_67 = arith.constant 4.471500e-02 : f32
    %167 = vector.broadcast %cst_67 : f32 to vector<64x128xf32>
    %168 = arith.mulf %167, %164 : vector<64x128xf32>
    %169 = arith.mulf %168, %164 : vector<64x128xf32>
    %170 = arith.mulf %169, %164 : vector<64x128xf32>
    %171 = arith.addf %164, %170 : vector<64x128xf32>
    %cst_68 = arith.constant 0.797884583 : f32
    %172 = vector.broadcast %cst_68 : f32 to vector<64x128xf32>
    %173 = arith.mulf %172, %171 : vector<64x128xf32>
    %174 = math.tanh %173 : vector<64x128xf32>
    %cst_69 = arith.constant 1.000000e+00 : f32
    %175 = vector.broadcast %cst_69 : f32 to vector<64x128xf32>
    %176 = arith.addf %175, %174 : vector<64x128xf32>
    %177 = arith.mulf %166, %176 : vector<64x128xf32>
    %178 = arith.truncf %177 : vector<64x128xf32> to vector<64x128xbf16>
    %c0_70 = arith.constant 0 : index
    %c0_71 = arith.constant 0 : index
    %179 = vector.load %arg13[%c0_70, %c0_71] : memref<128x32xbf16, #tpu.memory_space<vmem>>, vector<128x32xbf16>
    %cst_72 = arith.constant dense<0.000000e+00> : vector<64x32xf32>
    %180 = tpu.matmul %178, %179, %cst_72 {dimension_numbers = #tpu.dot_dimension_numbers<[1], [0], [0], [1], [0, 0, 1, 1], [], []>} : vector<64x128xbf16>, vector<128x32xbf16>, vector<64x32xf32> -> vector<64x32xf32>
    %c0_73 = arith.constant 0 : index
    %c0_74 = arith.constant 0 : index
    %181 = vector.load %arg14[%c0_73, %c0_74] : memref<1x32xf32, #tpu.memory_space<vmem>>, vector<1x32xf32>
    %182 = vector.broadcast %181 : vector<1x32xf32> to vector<64x32xf32>
    %183 = arith.addf %180, %182 : vector<64x32xf32>
    %184 = vector.shape_cast %183 : vector<64x32xf32> to vector<2x2x16x32xf32>
    %c0_75 = arith.constant 0 : index
    %c0_76 = arith.constant 0 : index
    %c0_77 = arith.constant 0 : index
    %c0_78 = arith.constant 0 : index
    %185 = vector.load %arg15[%c0_75, %c0_76, %c0_77, %c0_78] : memref<2x2x16x32xf32, #tpu.memory_space<vmem>>, vector<2x2x16x32xf32>
    tpu.vector_store %arg15[%c0_75, %c0_76, %c0_77, %c0_78], %184 {strides = array<i32>} : memref<2x2x16x32xf32, #tpu.memory_space<vmem>>, vector<2x2x16x32xf32>,
    return
  }
  func.func @transform_0(%arg0: i32) -> (i32, i32, i32, i32) {
    %c0_i32 = arith.constant 0 : i32
    %c0_i32_0 = arith.constant 0 : i32
    %c0_i32_1 = arith.constant 0 : i32
    %c0_i32_2 = arith.constant 0 : i32
    return %c0_i32, %arg0, %c0_i32_0, %c0_i32_1 : i32, i32, i32, i32
  }
  func.func @transform_1(%arg0: i32) -> (i32, i32) {
    %c0_i32 = arith.constant 0 : i32
    %c0_i32_0 = arith.constant 0 : i32
    %c0_i32_1 = arith.constant 0 : i32
    return %c0_i32, %c0_i32_0 : i32, i32
  }
  func.func @transform_2(%arg0: i32) -> (i32, i32) {
    %c0_i32 = arith.constant 0 : i32
    %c0_i32_0 = arith.constant 0 : i32
    %c0_i32_1 = arith.constant 0 : i32
    return %c0_i32, %c0_i32_0 : i32, i32
  }
  func.func @transform_3(%arg0: i32) -> (i32, i32) {
    %c0_i32 = arith.constant 0 : i32
    %c0_i32_0 = arith.constant 0 : i32
    %c0_i32_1 = arith.constant 0 : i32
    return %c0_i32, %c0_i32_0 : i32, i32
  }
  func.func @transform_4(%arg0: i32) -> (i32, i32) {
    %c0_i32 = arith.constant 0 : i32
    %c0_i32_0 = arith.constant 0 : i32
    %c0_i32_1 = arith.constant 0 : i32
    return %c0_i32, %c0_i32_0 : i32, i32
  }
  func.func @transform_5(%arg0: i32) -> (i32, i32) {
    %c0_i32 = arith.constant 0 : i32
    %c0_i32_0 = arith.constant 0 : i32
    %c0_i32_1 = arith.constant 0 : i32
    return %c0_i32, %c0_i32_0 : i32, i32
  }
  func.func @transform_6(%arg0: i32) -> (i32, i32, i32) {
    %c0_i32 = arith.constant 0 : i32
    %c0_i32_0 = arith.constant 0 : i32
    %c0_i32_1 = arith.constant 0 : i32
    %c0_i32_2 = arith.constant 0 : i32
    return %c0_i32, %c0_i32_0, %c0_i32_1 : i32, i32, i32
  }
  func.func @transform_7(%arg0: i32) -> (i32, i32) {
    %c0_i32 = arith.constant 0 : i32
    %c0_i32_0 = arith.constant 0 : i32
    %c0_i32_1 = arith.constant 0 : i32
    return %c0_i32, %c0_i32_0 : i32, i32
  }
  func.func @transform_8(%arg0: i32) -> (i32, i32) {
    %c0_i32 = arith.constant 0 : i32
    %c0_i32_0 = arith.constant 0 : i32
    %c0_i32_1 = arith.constant 0 : i32
    return %c0_i32, %c0_i32_0 : i32, i32
  }
  func.func @transform_9(%arg0: i32) -> (i32, i32) {
    %c0_i32 = arith.constant 0 : i32
    %c0_i32_0 = arith.constant 0 : i32
    %c0_i32_1 = arith.constant 0 : i32
    return %c0_i32, %c0_i32_0 : i32, i32
  }
  func.func @transform_10(%arg0: i32) -> (i32, i32) {
    %c0_i32 = arith.constant 0 : i32
    %c0_i32_0 = arith.constant 0 : i32
    %c0_i32_1 = arith.constant 0 : i32
    return %c0_i32, %c0_i32_0 : i32, i32
  }
  func.func @transform_11(%arg0: i32) -> (i32, i32) {
    %c0_i32 = arith.constant 0 : i32
    %c0_i32_0 = arith.constant 0 : i32
    %c0_i32_1 = arith.constant 0 : i32
    return %c0_i32, %c0_i32_0 : i32, i32
  }
  func.func @transform_12(%arg0: i32) -> (i32, i32) {
    %c0_i32 = arith.constant 0 : i32
    %c0_i32_0 = arith.constant 0 : i32
    %c0_i32_1 = arith.constant 0 : i32
    return %c0_i32, %c0_i32_0 : i32, i32
  }
  func.func @transform_13(%arg0: i32) -> (i32, i32) {
    %c0_i32 = arith.constant 0 : i32
    %c0_i32_0 = arith.constant 0 : i32
    %c0_i32_1 = arith.constant 0 : i32
    return %c0_i32, %c0_i32_0 : i32, i32
  }
  func.func @transform_14(%arg0: i32) -> (i32, i32, i32, i32) {
    %c0_i32 = arith.constant 0 : i32
    %c0_i32_0 = arith.constant 0 : i32
    %c0_i32_1 = arith.constant 0 : i32
    %c0_i32_2 = arith.constant 0 : i32
    return %c0_i32, %arg0, %c0_i32_0, %c0_i32_1 : i32, i32, i32, i32
  }
}

</mosaic_0001>

<bundles_post_ra>
// kernel: tpu_custom_call.1
= control target key start
LH: loop header
LB: loop body
LE: loop exit
PB: predicated region body
PF: predicated region fallthrough
CT: control target
= control target key end

     0   :  { %19 = vsyncpa [#allocation3], 0  ;;  %s6296_s0 = inlined_call_operand.hbm [shape: f32[2,2,16,32], index: 0, kind: input, shape index: {}]   ;;  %s6297_s1 = inlined_call_operand.hbm [shape: f32[1,32], index: 1, kind: input, shape index: {}]   ;;  %s6298_s2 = inlined_call_operand.hbm [shape: f32[1,32], index: 2, kind: input, shape index: {}]   ;;  %s6299_s3 = inlined_call_operand.hbm [shape: bf16[32,512], index: 3, kind: input, shape index: {}]   ;;  %s6300_s4 = inlined_call_operand.hbm [shape: bf16[32,512], index: 4, kind: input, shape index: {}]   ;;  %s6301_s5 = inlined_call_operand.hbm [shape: bf16[32,512], index: 5, kind: input, shape index: {}]   ;;  %s6302_s6 = inlined_call_operand.hbm [shape: bf16[4,128,32], index: 6, kind: input, shape index: {}]   ;;  %s6303_s7 = inlined_call_operand.hbm [shape: f32[1,32], index: 7, kind: input, shape index: {}]   ;;  %s6304_s8 = inlined_call_operand.hbm [shape: f32[1,32], index: 8, kind: input, shape index: {}]   ;;  %s6305_s9 = inlined_call_operand.hbm [shape: f32[1,32], index: 9, kind: input, shape index: {}]   ;;  %s6306_s10 = inlined_call_operand.hbm [shape: bf16[32,128], index: 10, kind: input, shape index: {}]   ;;  %s6307_s11 = inlined_call_operand.hbm [shape: f32[1,128], index: 11, kind: input, shape index: {}]   ;;  %s6308_s12 = inlined_call_operand.hbm [shape: bf16[128,32], index: 12, kind: input, shape index: {}]   ;;  %s6309_s13 = inlined_call_operand.hbm [shape: f32[1,32], index: 13, kind: input, shape index: {}]   ;;  %s6310_s14 = inlined_call_operand.hbm [shape: f32[2,2,16,32], index: 14, kind: output, shape index: {}]  }
   0x1   :  { %20 = vsyncpa [#allocation6], 0 }
   0x2   :  { %21 = vsyncpa [#allocation9], 0 }
   0x3   :  { %22 = vsyncpa [#allocation12], 0 }
   0x4   :  { %23 = vsyncpa [#allocation15], 0 }
   0x5   :  { %24 = vsyncpa [#allocation18], 0 }
   0x6   :  { %25 = vsyncpa [#allocation21], 0 }
   0x7   :  { %26 = vsyncpa [#allocation24], 0 }
   0x8   :  { %27 = vsyncpa [#allocation4], 0  ;;  %s5029_s29 = smov [#allocation5]   ;;  %s5030_s15 = smov [#allocation8]  }
   0x9   :  { %s46_s30 = sshll.u32 %s5029_s29, 4  ;;  %s65_s16 = sshll.u32 %s5030_s15, 4  ;;  %s47_s30 = int_to_ptr.vmem [resolvable:$true] %s46_s30  ;;  %s5128_s16 = int_to_ptr.vmem [resolvable:$true] %s65_s16 }
   0xa   :  { %s4681_s19 = scalar_lea.hbm %s6297_s1, 16 }
   0xb   :  { %p4682_p0 = scmp.ne.s32.totalorder %s6297_s1, %s4681_s19  ;;  %p4685_p1 = scmp.lt.u32.totalorder %s4681_s19, %s6297_s1 }
   0xd   :  { %p4687_p2 = pnand %p4685_p1, %p4682_p0 }
   0xf   :  { %4690 = shalt.err (!%p4687_p2)
}
  0x10   :  { %s4691_s24 = scalar_lea.vmem %s47_s30, 16  ;;  %s4695_s25 = scalar_lea.vmem %s47_s30, 32 }
  0x11   :  { %p4692_p3 = scmp.ne.s32.totalorder %s47_s30, %s4691_s24  ;;  %p4696_p4 = scmp.lt.s32.totalorder %s47_s30, %s47_s30 }
  0x12   :  { %p4697_p5 = scmp.lt.s32.totalorder %s4695_s25, %s4691_s24 }
  0x14   :  { %p4698_p6 = por %p4697_p5, %p4696_p4 }
  0x16   :  { %p4699_p7 = pnand %p4698_p6, %p4692_p3 }
  0x18   :  { %4702 = shalt.err (!%p4699_p7)
}
  0x19   :  { %49 = dma.hbm_to_vmem [thread:$0]  %s6297_s1, 16, %s47_s30, [#allocation6]  }
  0x1a   :  { %s4703_s15 = scalar_lea.hbm %s6299_s3, 1024 }
  0x1b   :  { %p4704_p8 = scmp.ne.s32.totalorder %s6299_s3, %s4703_s15  ;;  %p4707_p9 = scmp.lt.u32.totalorder %s4703_s15, %s6299_s3 }
  0x1d   :  { %p4709_p10 = pnand %p4707_p9, %p4704_p8 }
  0x1f   :  { %4712 = shalt.err (!%p4709_p10)
}
  0x20   :  { %s4713_s21 = scalar_lea.vmem %s5128_s16, 1024  ;;  %p4718_p12 = scmp.lt.s32.totalorder %s5128_s16, %s5128_s16 }
  0x21   :  { %p4714_p11 = scmp.ne.s32.totalorder %s5128_s16, %s4713_s21  ;;  %p4719_p13 = scmp.lt.s32.totalorder %s4713_s21, %s4713_s21 }
  0x23   :  { %p4720_p0 = por %p4719_p13, %p4718_p12 }
  0x25   :  { %p4721_p1 = pnand %p4720_p0, %p4714_p11 }
  0x27   :  { %4724 = shalt.err (!%p4721_p1)
}
  0x28   :  { %s5031_s1 = smov 256   ;;  %s5032_s30 = smov 16  }
  0x29   :  { %71 = dma.hbm_to_vmem [thread:$0]  %s6299_s3, 1024, %s5128_s16, [#allocation9], %s5031_s1, %s5031_s1, %s5032_s30  }
  0x2a   :  { %s5033_s24 = smov [#allocation11]   ;;  %s5034_s26 = smov [#allocation14]  }
  0x2b   :  { %s89_s25 = sshll.u32 %s5033_s24, 4  ;;  %s114_s27 = sshll.u32 %s5034_s26, 4  ;;  %s90_s25 = int_to_ptr.vmem [resolvable:$true] %s89_s25  ;;  %s115_s27 = int_to_ptr.vmem [resolvable:$true] %s114_s27 }
  0x2c   :  { %s4725_s15 = scalar_lea.hbm %s6301_s5, 1024 }
  0x2d   :  { %p4726_p2 = scmp.ne.s32.totalorder %s6301_s5, %s4725_s15  ;;  %p4729_p3 = scmp.lt.u32.totalorder %s4725_s15, %s6301_s5 }
  0x2f   :  { %p4731_p4 = pnand %p4729_p3, %p4726_p2 }
  0x31   :  { %4734 = shalt.err (!%p4731_p4)
}
  0x32   :  { %s4735_s3 = scalar_lea.vmem %s90_s25, 1024  ;;  %p4740_p6 = scmp.lt.s32.totalorder %s90_s25, %s90_s25 }
  0x33   :  { %p4736_p5 = scmp.ne.s32.totalorder %s90_s25, %s4735_s3  ;;  %p4741_p7 = scmp.lt.s32.totalorder %s4735_s3, %s4735_s3 }
  0x35   :  { %p4742_p8 = por %p4741_p7, %p4740_p6 }
  0x37   :  { %p4743_p9 = pnand %p4742_p8, %p4736_p5 }
  0x39   :  { %4746 = shalt.err (!%p4743_p9)
}
  0x3a   :  { %95 = dma.hbm_to_vmem [thread:$0]  %s6301_s5, 1024, %s90_s25, [#allocation12], %s5031_s1, %s5031_s1, %s5032_s30  }
  0x3b   :  { %s4747_s24 = scalar_lea.hbm %s6303_s7, 16 }
  0x3c   :  { %p4748_p10 = scmp.ne.s32.totalorder %s6303_s7, %s4747_s24  ;;  %p4751_p11 = scmp.lt.u32.totalorder %s4747_s24, %s6303_s7 }
  0x3e   :  { %p4753_p12 = pnand %p4751_p11, %p4748_p10 }
  0x40   :  { %4756 = shalt.err (!%p4753_p12)
}
  0x41   :  { %s4757_s17 = scalar_lea.vmem %s115_s27, 16  ;;  %s4761_s18 = scalar_lea.vmem %s115_s27, 32 }
  0x42   :  { %p4758_p13 = scmp.ne.s32.totalorder %s115_s27, %s4757_s17  ;;  %p4762_p0 = scmp.lt.s32.totalorder %s115_s27, %s115_s27 }
  0x43   :  { %p4763_p1 = scmp.lt.s32.totalorder %s4761_s18, %s4757_s17 }
  0x45   :  { %p4764_p2 = por %p4763_p1, %p4762_p0 }
  0x47   :  { %p4765_p3 = pnand %p4764_p2, %p4758_p13 }
  0x49   :  { %4768 = shalt.err (!%p4765_p3)
}
  0x4a   :  { %117 = dma.hbm_to_vmem [thread:$0]  %s6303_s7, 16, %s115_s27, [#allocation15]  }
  0x4b   :  { %s5035_s19 = smov [#allocation17]   ;;  %s5036_s3 = smov [#allocation20]  }
  0x4c   :  { %s134_s20 = sshll.u32 %s5035_s19, 4  ;;  %s156_s16 = sshll.u32 %s5036_s3, 4  ;;  %s135_s20 = int_to_ptr.vmem [resolvable:$true] %s134_s20  ;;  %s157_s16 = int_to_ptr.vmem [resolvable:$true] %s156_s16 }
  0x4d   :  { %s4769_s23 = scalar_lea.hbm %s6305_s9, 16 }
  0x4e   :  { %p4770_p4 = scmp.ne.s32.totalorder %s6305_s9, %s4769_s23  ;;  %p4773_p5 = scmp.lt.u32.totalorder %s4769_s23, %s6305_s9 }
  0x50   :  { %p4775_p6 = pnand %p4773_p5, %p4770_p4 }
  0x52   :  { %4778 = shalt.err (!%p4775_p6)
}
  0x53   :  { %s4779_s7 = scalar_lea.vmem %s135_s20, 16  ;;  %s4783_s27 = scalar_lea.vmem %s135_s20, 32 }
  0x54   :  { %p4780_p7 = scmp.ne.s32.totalorder %s135_s20, %s4779_s7  ;;  %p4784_p8 = scmp.lt.s32.totalorder %s135_s20, %s135_s20 }
  0x55   :  { %p4785_p9 = scmp.lt.s32.totalorder %s4783_s27, %s4779_s7 }
  0x57   :  { %p4786_p10 = por %p4785_p9, %p4784_p8 }
  0x59   :  { %p4787_p11 = pnand %p4786_p10, %p4780_p7 }
  0x5b   :  { %4790 = shalt.err (!%p4787_p11)
}
  0x5c   :  { %137 = dma.hbm_to_vmem [thread:$0]  %s6305_s9, 16, %s135_s20, [#allocation18]  }
  0x5d   :  { %s4791_s25 = scalar_lea.hbm %s6307_s11, 16 }
  0x5e   :  { %p4792_p12 = scmp.ne.s32.totalorder %s6307_s11, %s4791_s25  ;;  %p4795_p13 = scmp.lt.u32.totalorder %s4791_s25, %s6307_s11 }
  0x60   :  { %p4797_p0 = pnand %p4795_p13, %p4792_p12 }
  0x62   :  { %4800 = shalt.err (!%p4797_p0)
}
  0x63   :  { %s4801_s23 = scalar_lea.vmem %s157_s16, 16  ;;  %s4805_s24 = scalar_lea.vmem %s157_s16, 32 }
  0x64   :  { %p4802_p1 = scmp.ne.s32.totalorder %s157_s16, %s4801_s23  ;;  %p4806_p2 = scmp.lt.s32.totalorder %s157_s16, %s157_s16 }
  0x65   :  { %p4807_p3 = scmp.lt.s32.totalorder %s4805_s24, %s4801_s23 }
  0x67   :  { %p4808_p4 = por %p4807_p3, %p4806_p2 }
  0x69   :  { %p4809_p5 = pnand %p4808_p4, %p4802_p1 }
  0x6b   :  { %4812 = shalt.err (!%p4809_p5)
}
  0x6c   :  { %159 = dma.hbm_to_vmem [thread:$0]  %s6307_s11, 16, %s157_s16, [#allocation21]  }
  0x6d   :  { %s5037_s26 = smov [#allocation2]   ;;  %s4813_s27 = scalar_lea.hbm %s6296_s0, 1024 }
  0x6e   :  { %s33_s28 = sshll.u32 %s5037_s26, 4  ;;  %p4814_p6 = scmp.ne.s32.totalorder %s6296_s0, %s4813_s27  ;;  %s34_s28 = int_to_ptr.vmem [resolvable:$true] %s33_s28 }
  0x6f   :  { %p4817_p7 = scmp.lt.u32.totalorder %s4813_s27, %s6296_s0 }
  0x71   :  { %p4819_p8 = pnand %p4817_p7, %p4814_p6 }
  0x73   :  { %4822 = shalt.err (!%p4819_p8)
}
  0x74   :  { %s4823_s25 = scalar_lea.vmem %s34_s28, 1024  ;;  %p4828_p10 = scmp.lt.s32.totalorder %s34_s28, %s34_s28 }
  0x75   :  { %p4824_p9 = scmp.ne.s32.totalorder %s34_s28, %s4823_s25  ;;  %p4829_p11 = scmp.lt.s32.totalorder %s4823_s25, %s4823_s25 }
  0x77   :  { %p4830_p12 = por %p4829_p11, %p4828_p10 }
  0x79   :  { %p4831_p13 = pnand %p4830_p12, %p4824_p9 }
  0x7b   :  { %4834 = shalt.err (!%p4831_p13)
}
  0x7c   :  { %s5038_s11 = smov 128   ;;  %s5039_s16 = smov 8  }
  0x7d   :  { %39 = dma.hbm_to_vmem [thread:$0]  %s6296_s0, 1024, %s34_s28, [#allocation3], %s5038_s11, %s5038_s11, %s5039_s16  }
  0x7e   :  { %s5040_s21 = smov [#allocation7]   ;;  %s5041_s23 = smov [#allocation10]  }
  0x7f   :  { %s56_s22 = sshll.u32 %s5040_s21, 4  ;;  %s77_s24 = sshll.u32 %s5041_s23, 4  ;;  %s57_s22 = int_to_ptr.vmem [resolvable:$true] %s56_s22  ;;  %s78_s24 = int_to_ptr.vmem [resolvable:$true] %s77_s24 }
  0x80   :  { %s4835_s26 = scalar_lea.hbm %s6298_s2, 16 }
  0x81   :  { %p4836_p0 = scmp.ne.s32.totalorder %s6298_s2, %s4835_s26  ;;  %p4839_p1 = scmp.lt.u32.totalorder %s4835_s26, %s6298_s2 }
  0x83   :  { %p4841_p2 = pnand %p4839_p1, %p4836_p0 }
  0x85   :  { %4844 = shalt.err (!%p4841_p2)
}
  0x86   :  { %s4845_s0 = scalar_lea.vmem %s57_s22, 16  ;;  %s4849_s28 = scalar_lea.vmem %s57_s22, 32 }
  0x87   :  { %p4846_p3 = scmp.ne.s32.totalorder %s57_s22, %s4845_s0  ;;  %p4850_p4 = scmp.lt.s32.totalorder %s57_s22, %s57_s22 }
  0x88   :  { %p4851_p5 = scmp.lt.s32.totalorder %s4849_s28, %s4845_s0 }
  0x8a   :  { %p4852_p6 = por %p4851_p5, %p4850_p4 }
  0x8c   :  { %p4853_p7 = pnand %p4852_p6, %p4846_p3 }
  0x8e   :  { %4856 = shalt.err (!%p4853_p7)
}
  0x8f   :  { %59 = dma.hbm_to_vmem [thread:$0]  %s6298_s2, 16, %s57_s22, [#allocation6]  }
  0x90   :  { %s4857_s19 = scalar_lea.hbm %s6300_s4, 1024 }
  0x91   :  { %p4858_p8 = scmp.ne.s32.totalorder %s6300_s4, %s4857_s19  ;;  %p4861_p9 = scmp.lt.u32.totalorder %s4857_s19, %s6300_s4 }
  0x93   :  { %p4863_p10 = pnand %p4861_p9, %p4858_p8 }
  0x95   :  { %4866 = shalt.err (!%p4863_p10)
}
  0x96   :  { %s4867_s20 = scalar_lea.vmem %s78_s24, 1024  ;;  %p4872_p12 = scmp.lt.s32.totalorder %s78_s24, %s78_s24 }
  0x97   :  { %p4868_p11 = scmp.ne.s32.totalorder %s78_s24, %s4867_s20  ;;  %p4873_p13 = scmp.lt.s32.totalorder %s4867_s20, %s4867_s20 }
  0x99   :  { %p4874_p0 = por %p4873_p13, %p4872_p12 }
  0x9b   :  { %p4875_p1 = pnand %p4874_p0, %p4868_p11 }
  0x9d   :  { %4878 = shalt.err (!%p4875_p1)
}
  0x9e   :  { %83 = dma.hbm_to_vmem [thread:$0]  %s6300_s4, 1024, %s78_s24, [#allocation9], %s5031_s1, %s5031_s1, %s5032_s30  }
  0x9f   :  { %s5042_s26 = smov [#allocation13]   ;;  %s4879_s15 = scalar_lea.hbm %s6302_s6, 4096 }
  0xa0   :  { %s101_s29 = sshll.u32 %s5042_s26, 4  ;;  %p4880_p2 = scmp.ne.s32.totalorder %s6302_s6, %s4879_s15  ;;  %s102_s29 = int_to_ptr.vmem [resolvable:$true] %s101_s29 }
  0xa1   :  { %p4883_p3 = scmp.lt.u32.totalorder %s4879_s15, %s6302_s6 }
  0xa3   :  { %p4885_p4 = pnand %p4883_p3, %p4880_p2 }
  0xa5   :  { %4888 = shalt.err (!%p4885_p4)
}
  0xa6   :  { %s4889_s5 = scalar_lea.vmem %s102_s29, 4096  ;;  %p4894_p6 = scmp.lt.s32.totalorder %s102_s29, %s102_s29 }
  0xa7   :  { %p4890_p5 = scmp.ne.s32.totalorder %s102_s29, %s4889_s5  ;;  %p4895_p7 = scmp.lt.s32.totalorder %s4889_s5, %s4889_s5 }
  0xa9   :  { %p4896_p8 = por %p4895_p7, %p4894_p6 }
  0xab   :  { %p4897_p9 = pnand %p4896_p8, %p4890_p5 }
  0xad   :  { %4900 = shalt.err (!%p4897_p9)
}
  0xae   :  { %s5043_s4 = smov 64   ;;  %s5044_s1 = smov 4  }
  0xaf   :  { %107 = dma.hbm_to_vmem [thread:$0]  %s6302_s6, 4096, %s102_s29, [#allocation12], %s5043_s4, %s5043_s4, %s5044_s1  }
  0xb0   :  { %s5045_s25 = smov [#allocation16]   ;;  %s5046_s3 = smov [#allocation19]  }
  0xb1   :  { %s124_s19 = sshll.u32 %s5045_s25, 4  ;;  %s143_s21 = sshll.u32 %s5046_s3, 4  ;;  %s125_s19 = int_to_ptr.vmem [resolvable:$true] %s124_s19  ;;  %s5270_s21 = int_to_ptr.vmem [resolvable:$true] %s143_s21 }
  0xb2   :  { %s4901_s20 = scalar_lea.hbm %s6304_s8, 16 }
  0xb3   :  { %p4902_p10 = scmp.ne.s32.totalorder %s6304_s8, %s4901_s20  ;;  %p4905_p11 = scmp.lt.u32.totalorder %s4901_s20, %s6304_s8 }
  0xb5   :  { %p4907_p12 = pnand %p4905_p11, %p4902_p10 }
  0xb7   :  { %4910 = shalt.err (!%p4907_p12)
}
  0xb8   :  { %s4911_s6 = scalar_lea.vmem %s125_s19, 16  ;;  %s4915_s29 = scalar_lea.vmem %s125_s19, 32 }
  0xb9   :  { %p4912_p13 = scmp.ne.s32.totalorder %s125_s19, %s4911_s6  ;;  %p4916_p0 = scmp.lt.s32.totalorder %s125_s19, %s125_s19 }
  0xba   :  { %p4917_p1 = scmp.lt.s32.totalorder %s4915_s29, %s4911_s6 }
  0xbc   :  { %p4918_p2 = por %p4917_p1, %p4916_p0 }
  0xbe   :  { %p4919_p3 = pnand %p4918_p2, %p4912_p13 }
  0xc0   :  { %4922 = shalt.err (!%p4919_p3)
}
  0xc1   :  { %127 = dma.hbm_to_vmem [thread:$0]  %s6304_s8, 16, %s125_s19, [#allocation15]  }
  0xc2   :  { %s4923_s17 = scalar_lea.hbm %s6306_s10, 256 }
  0xc3   :  { %p4924_p4 = scmp.ne.s32.totalorder %s6306_s10, %s4923_s17  ;;  %p4927_p5 = scmp.lt.u32.totalorder %s4923_s17, %s6306_s10 }
  0xc5   :  { %p4929_p6 = pnand %p4927_p5, %p4924_p4 }
  0xc7   :  { %4932 = shalt.err (!%p4929_p6)
}
  0xc8   :  { %s4933_s25 = scalar_lea.vmem %s5270_s21, 256  ;;  %p4938_p8 = scmp.lt.s32.totalorder %s5270_s21, %s5270_s21 }
  0xc9   :  { %p4934_p7 = scmp.ne.s32.totalorder %s5270_s21, %s4933_s25  ;;  %p4939_p9 = scmp.lt.s32.totalorder %s4933_s25, %s4933_s25 }
  0xcb   :  { %p4940_p10 = por %p4939_p9, %p4938_p8 }
  0xcd   :  { %p4941_p11 = pnand %p4940_p10, %p4934_p7 }
  0xcf   :  { %4944 = shalt.err (!%p4941_p11)
}
  0xd0   :  { %149 = dma.hbm_to_vmem [thread:$0]  %s6306_s10, 256, %s5270_s21, [#allocation18], %s5043_s4, %s5043_s4, %s5044_s1  }
  0xd1   :  { %s5047_s3 = smov [#allocation22]   ;;  %s5048_s9 = smov [#allocation23]  }
  0xd2   :  { %s165_s23 = sshll.u32 %s5047_s3, 4  ;;  %s178_s20 = sshll.u32 %s5048_s9, 4  ;;  %s166_s23 = int_to_ptr.vmem [resolvable:$true] %s165_s23  ;;  %s179_s20 = int_to_ptr.vmem [resolvable:$true] %s178_s20 }
  0xd3   :  { %s4945_s26 = scalar_lea.hbm %s6308_s12, 1024 }
  0xd4   :  { %p4946_p12 = scmp.ne.s32.totalorder %s6308_s12, %s4945_s26  ;;  %p4949_p13 = scmp.lt.u32.totalorder %s4945_s26, %s6308_s12 }
  0xd6   :  { %p4951_p0 = pnand %p4949_p13, %p4946_p12 }
  0xd8   :  { %4954 = shalt.err (!%p4951_p0)
}
  0xd9   :  { %s4955_s10 = scalar_lea.vmem %s166_s23, 1024  ;;  %p4960_p2 = scmp.lt.s32.totalorder %s166_s23, %s166_s23 }
  0xda   :  { %p4956_p1 = scmp.ne.s32.totalorder %s166_s23, %s4955_s10  ;;  %p4961_p3 = scmp.lt.s32.totalorder %s4955_s10, %s4955_s10 }
  0xdc   :  { %p4962_p4 = por %p4961_p3, %p4960_p2 }
  0xde   :  { %p4963_p5 = pnand %p4962_p4, %p4956_p1 }
  0xe0   :  { %4966 = shalt.err (!%p4963_p5)
}
  0xe1   :  { %171 = dma.hbm_to_vmem [thread:$0]  %s6308_s12, 1024, %s166_s23, [#allocation21], %s5043_s4, %s5043_s4, %s5044_s1  }
  0xe2   :  { %s4967_s17 = scalar_lea.hbm %s6309_s13, 16 }
  0xe3   :  { %p4968_p6 = scmp.ne.s32.totalorder %s6309_s13, %s4967_s17  ;;  %p4971_p7 = scmp.lt.u32.totalorder %s4967_s17, %s6309_s13 }
  0xe5   :  { %p4973_p8 = pnand %p4971_p7, %p4968_p6 }
  0xe7   :  { %4976 = shalt.err (!%p4973_p8)
}
  0xe8   :  { %s4977_s25 = scalar_lea.vmem %s179_s20, 16  ;;  %s4981_s8 = scalar_lea.vmem %s179_s20, 32 }
  0xe9   :  { %p4978_p9 = scmp.ne.s32.totalorder %s179_s20, %s4977_s25  ;;  %p4982_p10 = scmp.lt.s32.totalorder %s179_s20, %s179_s20 }
  0xea   :  { %p4983_p11 = scmp.lt.s32.totalorder %s4981_s8, %s4977_s25 }
  0xec   :  { %p4984_p12 = por %p4983_p11, %p4982_p10 }
  0xee   :  { %p4985_p13 = pnand %p4984_p12, %p4978_p9 }
  0xf0   :  { %4988 = shalt.err (!%p4985_p13)
}
  0xf1   :  { %181 = dma.hbm_to_vmem [thread:$0]  %s6309_s13, 16, %s179_s20, [#allocation24]  }
  0xf2   :  { %5011 = dma.done.wait [#allocation3], 1024  }
  0xf3   :  { %5012 = vsyncadd [#allocation3], 4294966272 }
  0xf4   :  { %5013 = dma.done.wait [#allocation6], 32  }
  0xf5   :  { %5014 = vsyncadd [#allocation6], 4294967264 }
  0xf6   :  { %5015 = dma.done.wait [#allocation9], 2048  }
  0xf7   :  { %5016 = vsyncadd [#allocation9], 4294965248 }
  0xf8   :  { %5017 = dma.done.wait [#allocation12], 5120  }
  0xf9   :  { %5018 = vsyncadd [#allocation12], 4294962176 }
  0xfa   :  { %5019 = dma.done.wait [#allocation15], 32  }
  0xfb   :  { %5020 = vsyncadd [#allocation15], 4294967264 }
  0xfc   :  { %5021 = dma.done.wait [#allocation18], 272  }
  0xfd   :  { %5022 = vsyncadd [#allocation18], 4294967024 }
  0xfe   :  { %5023 = dma.done.wait [#allocation21], 1040  }
  0xff   :  { %5024 = vsyncadd [#allocation21], 4294966256 }
 0x100   :  { %5025 = dma.done.wait [#allocation24], 16  }
 0x101   :  { %5026 = vsyncadd [#allocation24], 4294967280  ;;  %vm235_vm0 = vcmask 261120   ;;  %v225_v0 = vld [vmem:[#allocation2] sm:$0xff]  ;;  %v227_v1 = vld [vmem:[#allocation2 + $0x10] sm:$0xff]  ;;  %vm5051_vm1 = vmmov 0  }
 0x102   :  { %v226_v2 = vld [vmem:[#allocation2 + $0x8] sm:$0xff]  ;;  %v236_v3 = vsel %vm235_vm0, %v225_v0, 0.0  ;;  %v242_v4 = vsel %vm235_vm0, %v227_v1, 0.0  ;;  %v228_v5 = vld [vmem:[#allocation2 + $0x18] sm:$0xff]  ;;  %v229_v6 = vld [vmem:[#allocation2 + $0x20] sm:$0xff]  ;;  %vm1179_vm2 = vcmask 130048  }
 0x103   :  { %237 = vadd.xlane.f32.xlu0 %v236_v3  ;;  %243 = vadd.xlane.f32.xlu1 %v242_v4  ;;  %v230_v7 = vld [vmem:[#allocation2 + $0x28] sm:$0xff]  ;;  %v239_v8 = vsel %vm235_vm0, %v226_v2, 0.0  ;;  %v245_v9 = vsel %vm235_vm0, %v228_v5, 0.0  ;;  %v231_v10 = vld [vmem:[#allocation2 + $0x30] sm:$0xff]  ;;  %v232_v11 = vld [vmem:[#allocation2 + $0x38] sm:$0xff]  ;;  %v248_v12 = vsel %vm235_vm0, %v229_v6, 0.0 }
 0x104   :  { %v251_v13 = vsel %vm235_vm0, %v230_v7, 0.0  ;;  %v254_v14 = vsel %vm235_vm0, %v231_v10, 0.0  ;;  %v257_v15 = vsel %vm235_vm0, %v232_v11, 0.0  ;;  %v4419_v56 = vld [vmem:[#allocation8 + $0x4] ss:$16 sps:$4 sm:$0xff]   ;;  %s5052_s13 = smov [#allocation25]  }
 0x105   :  { %v4421_v57 = vld [vmem:[#allocation8 + $0xc] ss:$16 sps:$4 sm:$0xff]   ;;  %v4423_v58 = vld [vmem:[#allocation8] ss:$16 sps:$4 sm:$0xff]   ;;  %v4424_v59 = vld [vmem:[#allocation8 + $0x8] ss:$16 sps:$4 sm:$0xff]   ;;  %433 = vmatprep.subr.bf16.mxu0 %v4419_v56 }
 0x106   :  { %506 = vmatprep.subr.bf16.mxu1 %v4421_v57  ;;  %434 = vmatpush1.bf16.msra.mxu0 %v4423_v58  ;;  %v4425_v60 = vld [vmem:[#allocation8 + $0x24] ss:$16 sps:$4 sm:$0xff]   ;;  %v4427_v61 = vld [vmem:[#allocation8 + $0x2c] ss:$16 sps:$4 sm:$0xff]   ;;  %v4429_v62 = vld [vmem:[#allocation8 + $0x20] ss:$16 sps:$4 sm:$0xff]  }
 0x107   :  { %240 = vadd.xlane.f32.xlu0 %v239_v8  ;;  %246 = vadd.xlane.f32.xlu1 %v245_v9  ;;  %v4430_v63 = vld [vmem:[#allocation8 + $0x28] ss:$16 sps:$4 sm:$0xff]   ;;  %v4437_v56 = vld [vmem:[#allocation10 + $0x20] ss:$16 sps:$4 sm:$0xff]   ;;  %v4445_v58 = vld [vmem:[#allocation11 + $0x4] ss:$16 sps:$4 sm:$0xff]  }
 0x108   :  { %507 = vmatpush1.bf16.msra.mxu1 %v4424_v59  ;;  %435 = vmatprep.subr.bf16.mxu0 %v4425_v60  ;;  %v4440_v57 = vld [vmem:[#allocation10 + $0x28] ss:$16 sps:$4 sm:$0xff]   ;;  %v4448_v59 = vld [vmem:[#allocation11 + $0xc] ss:$16 sps:$4 sm:$0xff]   ;;  %s3781_s1 = sshll.u32 %s5052_s13, 4  ;;  %s3782_s1 = int_to_ptr.vmem [resolvable:$true] %s3781_s1 }
 0x109   :  { %508 = vmatprep.subr.bf16.mxu1 %v4427_v61  ;;  %s4989_s19 = scalar_lea.vmem %s3782_s1, 1024  ;;  %p4994_p1 = scmp.lt.s32.totalorder %s3782_s1, %s3782_s1 }
 0x10a   :  { %436 = vmatpush1.bf16.msra.mxu0 %v4429_v62  ;;  %p4990_p0 = scmp.ne.s32.totalorder %s3782_s1, %s4989_s19  ;;  %p4995_p2 = scmp.lt.s32.totalorder %s4989_s19, %s4989_s19 }
 0x10b   :  { %249 = vadd.xlane.f32.xlu0 %v248_v12  ;;  %252 = vadd.xlane.f32.xlu1 %v251_v13 }
 0x10c   :  { %509 = vmatpush1.bf16.msra.mxu1 %v4430_v63  ;;  %p4996_p3 = por %p4995_p2, %p4994_p1 }
 0x10e   :  { %p4997_p4 = pnand %p4996_p3, %p4990_p0 }
 0x10f   :  { %255 = vadd.xlane.f32.xlu0 %v254_v14  ;;  %258 = vadd.xlane.f32.xlu1 %v257_v15 }
 0x190   :  { %v238_v16 = vpop.xlane.xlu0 %237  ;;  %v244_v17 = vpop.xlane.xlu1 %243 }
 0x191   :  { %v261_v18 = vmul.f32 0.03125, %v238_v16  ;;  %v263_v19 = vmul.f32 0.03125, %v244_v17 }
 0x193   :  { %v5339_v20 = vsub.f32 %v225_v0, %v261_v18  ;;  %v5341_v21 = vsub.f32 %v227_v1, %v263_v19  ;;  %v5049_v0 = vmov 0   ;;  %v4433_v1 = vld [vmem:[#allocation10 + $0x4] ss:$16 sps:$4 sm:$0xff]  }
 0x194   :  { %v241_v22 = vpop.xlane.xlu0 %240  ;;  %v247_v23 = vpop.xlane.xlu1 %246  ;;  %465 = vmatprep.mubr.bf16.mxu0 %v5049_v0  ;;  %538 = vmatprep.mubr.bf16.mxu1 %v5049_v0 }
 0x195   :  { %v262_v24 = vmul.f32 0.03125, %v241_v22  ;;  %v264_v25 = vmul.f32 0.03125, %v247_v23  ;;  %v277_v26 = vmul.f32 %v5339_v20, %v5339_v20  ;;  %v279_v27 = vmul.f32 %v5341_v21, %v5341_v21  ;;  %643 = vmatprep.subr.bf16.mxu0 %v4433_v1 }
 0x197   :  { %v5347_v28 = vsub.f32 %v226_v2, %v262_v24  ;;  %v5349_v29 = vsub.f32 %v228_v5, %v264_v25  ;;  %v285_v30 = vsel %vm235_vm0, %v277_v26, 0.0  ;;  %v291_v33 = vsel %vm235_vm0, %v279_v27, 0.0  ;;  %v4436_v2 = vld [vmem:[#allocation10 + $0xc] ss:$16 sps:$4 sm:$0xff]  }
 0x198   :  { %286 = vadd.xlane.f32.xlu0 %v285_v30  ;;  %v250_v31 = vpop.xlane.xlu0 %249  ;;  %v253_v32 = vpop.xlane.xlu1 %252  ;;  %716 = vmatprep.subr.bf16.mxu1 %v4436_v2  ;;  %v5382_v27 = vld [vmem:[#allocation5] ss:$0 sm:$0xff] }
 0x199   :  { %v265_v34 = vmul.f32 0.03125, %v250_v31  ;;  %v266_v35 = vmul.f32 0.03125, %v253_v32  ;;  %v278_v36 = vmul.f32 %v5347_v28, %v5347_v28  ;;  %v280_v37 = vmul.f32 %v5349_v29, %v5349_v29 }
 0x19b   :  { %v5357_v38 = vsub.f32 %v229_v6, %v265_v34  ;;  %v5359_v39 = vsub.f32 %v230_v7, %v266_v35  ;;  %v288_v40 = vsel %vm235_vm0, %v278_v36, 0.0  ;;  %v294_v43 = vsel %vm235_vm0, %v280_v37, 0.0  ;;  %v3801_v36 = vld [vmem:[#allocation7] ss:$0 sm:$0xff] }
 0x19c   :  { %292 = vadd.xlane.f32.xlu0 %v291_v33  ;;  %289 = vadd.xlane.f32.xlu1 %v288_v40  ;;  %v256_v41 = vpop.xlane.xlu0 %255  ;;  %v259_v42 = vpop.xlane.xlu1 %258 }
 0x19d   :  { %v267_v44 = vmul.f32 0.03125, %v256_v41  ;;  %v268_v45 = vmul.f32 0.03125, %v259_v42  ;;  %v281_v46 = vmul.f32 %v5357_v38, %v5357_v38  ;;  %v282_v47 = vmul.f32 %v5359_v39, %v5359_v39 }
 0x19f   :  { %v5367_v48 = vsub.f32 %v231_v10, %v267_v44  ;;  %v5369_v49 = vsub.f32 %v232_v11, %v268_v45  ;;  %v297_v50 = vsel %vm235_vm0, %v281_v46, 0.0  ;;  %v300_v51 = vsel %vm235_vm0, %v282_v47, 0.0 }
 0x1a0   :  { %295 = vadd.xlane.f32.xlu1 %v294_v43  ;;  %298 = vadd.xlane.f32.xlu0 %v297_v50  ;;  %v4431_v50 = vld [vmem:[#allocation10] ss:$16 sps:$4 sm:$0xff]  }
 0x1a1   :  { %v283_v52 = vmul.f32 %v5367_v48, %v5367_v48  ;;  %v284_v53 = vmul.f32 %v5369_v49, %v5369_v49 }
 0x1a3   :  { %v303_v54 = vsel %vm235_vm0, %v283_v52, 0.0  ;;  %v306_v55 = vsel %vm235_vm0, %v284_v53, 0.0  ;;  %v4439_v52 = vld [vmem:[#allocation10 + $0x24] ss:$16 sps:$4 sm:$0xff]   ;;  %v4442_v53 = vld [vmem:[#allocation10 + $0x2c] ss:$16 sps:$4 sm:$0xff]  }
 0x1a4   :  { %301 = vadd.xlane.f32.xlu1 %v300_v51  ;;  %304 = vadd.xlane.f32.xlu0 %v303_v54 }
 0x1a8   :  { %307 = vadd.xlane.f32.xlu1 %v306_v55 }
 0x225   :  { %v287_v3 = vpop.xlane.xlu0 %286 }
 0x226   :  { %v309_v4 = vmul.f32 0.03125, %v287_v3 }
 0x228   :  { %v317_v5 = vadd.f32 1e-05, %v309_v4 }
 0x229   :  { %v290_v6 = vpop.xlane.xlu1 %289  ;;  %v293_v7 = vpop.xlane.xlu0 %292 }
 0x22a   :  { %4497 = vrsqrt.f32 %v317_v5  ;;  %v310_v8 = vmul.f32 0.03125, %v290_v6  ;;  %v311_v9 = vmul.f32 0.03125, %v293_v7 }
 0x22c   :  { %v318_v10 = vadd.f32 1e-05, %v310_v8  ;;  %v319_v11 = vadd.f32 1e-05, %v311_v9 }
 0x22d   :  { %v296_v12 = vpop.xlane.xlu1 %295  ;;  %v299_v13 = vpop.xlane.xlu0 %298 }
 0x22e   :  { %4499 = vrsqrt.f32 %v318_v10  ;;  %v312_v14 = vmul.f32 0.03125, %v296_v12  ;;  %v313_v16 = vmul.f32 0.03125, %v299_v13  ;;  %v4451_v12 = vld [vmem:[#allocation11 + $0x24] ss:$16 sps:$4 sm:$0xff]   ;;  %v4454_v13 = vld [vmem:[#allocation11 + $0x2c] ss:$16 sps:$4 sm:$0xff]  }
 0x22f   :  { %4501 = vrsqrt.f32 %v319_v11 }
 0x230   :  { %v320_v15 = vadd.f32 1e-05, %v312_v14  ;;  %v321_v22 = vadd.f32 1e-05, %v313_v16  ;;  %v4449_v14 = vld [vmem:[#allocation11 + $0x20] ss:$16 sps:$4 sm:$0xff]  }
 0x231   :  { %v302_v17 = vpop.xlane.xlu1 %301  ;;  %v305_v25 = vpop.xlane.xlu0 %304  ;;  %v6313_v16 = vmov 0.0  }
 0x232   :  { %4503 = vrsqrt.f32 %v320_v15  ;;  %v314_v18 = vmul.f32 0.03125, %v302_v17  ;;  %v315_v32 = vmul.f32 0.03125, %v305_v25  ;;  %v4452_v15 = vld [vmem:[#allocation11 + $0x28] ss:$16 sps:$4 sm:$0xff]  }
 0x234   :  { %v4498_v19 = vpop.eup %4497  ;;  %v322_v23 = vadd.f32 1e-05, %v314_v18 }
 0x235   :  { %v333_v24 = vmul.f32 %v4498_v19, %v5339_v20  ;;  %v308_v26 = vpop.xlane.xlu1 %307  ;;  %v323_v20 = vadd.f32 1e-05, %v315_v32 }
 0x236   :  { %4505 = vrsqrt.f32 %v322_v23  ;;  %v316_v30 = vmul.f32 0.03125, %v308_v26 }
 0x237   :  { %4507 = vrsqrt.f32 %v321_v22  ;;  %v347_v33 = vmul.f32 %v5382_v27, %v333_v24 }
 0x238   :  { %v4500_v31 = vpop.eup %4499  ;;  %v324_v37 = vadd.f32 1e-05, %v316_v30 }
 0x239   :  { %v334_v34 = vmul.f32 %v4500_v31, %v5347_v28  ;;  %v4502_v35 = vpop.eup %4501  ;;  %v361_v42 = vadd.f32 %v3801_v36, %v347_v33  ;;  %v4434_v28 = vld [vmem:[#allocation10 + $0x8] ss:$16 sps:$4 sm:$0xff]  }
 0x23a   :  { %v335_v44 = vmul.f32 %v4502_v35, %v5341_v21  ;;  %4509 = vrsqrt.f32 %v324_v37 }
 0x23b   :  { %v348_v40 = vmul.f32 %v5382_v27, %v334_v34  ;;  %4511 = vrsqrt.f32 %v323_v20 }
 0x23c   :  { %v4504_v41 = vpop.eup %4503  ;;  %v349_v54 = vmul.f32 %v5382_v27, %v335_v44 }
 0x23d   :  { %v362_v43 = vadd.f32 %v3801_v36, %v348_v40  ;;  %v336_v45 = vmul.f32 %v4504_v41, %v5349_v29 }
 0x23e   :  { %v363_v60 = vadd.f32 %v3801_v36, %v349_v54 }
 0x23f   :  { %v350_v46 = vmul.f32 %v5382_v27, %v336_v45  ;;  %v5390_v47 = vpack.c.bf16 %v362_v43, %v361_v42 }
 0x240   :  { %v4506_v51 = vpop.eup %4505 }
 0x241   :  { %3810 = vmatmul.mubr.msk.bf16.vlgmr.msra.gmra.mrb[0].mxu0 %vm235_vm0, %v5390_v47  ;;  %3814 = vmatmul.mubr.msk.bf16.vlgmr.msra.gmra.mrb[0].mxu1 %vm235_vm0, %v5390_v47  ;;  %v4508_v21 = vpop.eup %4507  ;;  %v364_v29 = vadd.f32 %v3801_v36, %v350_v46  ;;  %v338_v55 = vmul.f32 %v4506_v51, %v5359_v39 }
 0x242   :  { %475 = vmatprep.mubr.bf16.mxu0 %v5049_v0  ;;  %548 = vmatprep.mubr.bf16.mxu1 %v5049_v0  ;;  %v337_v61 = vmul.f32 %v4508_v21, %v5357_v38 }
 0x243   :  { %644 = vmatpush1.bf16.msra.mxu0 %v4431_v50  ;;  %717 = vmatpush1.bf16.msra.mxu1 %v4434_v28  ;;  %v352_v62 = vmul.f32 %v5382_v27, %v338_v55  ;;  %v5402_v63 = vpack.c.bf16 %v364_v29, %v363_v60 }
 0x244   :  { %645 = vmatprep.subr.bf16.mxu0 %v4439_v52  ;;  %718 = vmatprep.subr.bf16.mxu1 %v4442_v53  ;;  %v4510_v1 = vpop.eup %4509  ;;  %v351_v39 = vmul.f32 %v5382_v27, %v337_v61 }
 0x245   :  { %v4512_v2 = vpop.eup %4511  ;;  %v366_v38 = vadd.f32 %v3801_v36, %v352_v62  ;;  %v340_v3 = vmul.f32 %v4510_v1, %v5369_v49  ;;  %v4446_v49 = vld [vmem:[#allocation11 + $0x8] ss:$16 sps:$4 sm:$0xff]  }
 0x246   :  { %v365_v4 = vadd.f32 %v3801_v36, %v351_v39  ;;  %v339_v5 = vmul.f32 %v4512_v2, %v5367_v48  ;;  %v4443_v48 = vld [vmem:[#allocation11] ss:$16 sps:$4 sm:$0xff]  }
 0x247   :  { %646 = vmatpush1.bf16.msra.mxu0 %v4437_v56  ;;  %719 = vmatpush1.bf16.msra.mxu1 %v4440_v57  ;;  %v354_v6 = vmul.f32 %v5382_v27, %v340_v3 }
 0x248   :  { %853 = vmatprep.subr.bf16.mxu0 %v4445_v58  ;;  %926 = vmatprep.subr.bf16.mxu1 %v4448_v59  ;;  %v371_v7 = vpack.c.bf16 %v366_v38, %v365_v4  ;;  %v353_v8 = vmul.f32 %v5382_v27, %v339_v5 }
 0x249   :  { %3811 = vmatmul.mubr.msk.bf16.gmra.mrb[4].mxu0 %vm235_vm0, %v5402_v63  ;;  %3815 = vmatmul.mubr.msk.bf16.gmra.mrb[4].mxu1 %vm235_vm0, %v5402_v63  ;;  %v368_v9 = vadd.f32 %v3801_v36, %v354_v6 }
 0x24a   :  { %485 = vmatprep.mubr.bf16.mxu0 %v5049_v0  ;;  %558 = vmatprep.mubr.bf16.mxu1 %v5049_v0  ;;  %v367_v10 = vadd.f32 %v3801_v36, %v353_v8 }
 0x24c   :  { %v372_v11 = vpack.c.bf16 %v368_v9, %v367_v10 }
 0x251   :  { %3812 = vmatmul.mubr.msk.bf16.gmra.mrb[8].mxu0 %vm235_vm0, %v371_v7  ;;  %3816 = vmatmul.mubr.msk.bf16.gmra.mrb[8].mxu1 %vm235_vm0, %v371_v7 }
 0x252   :  { %495 = vmatprep.mubr.bf16.mxu0 %v5049_v0  ;;  %568 = vmatprep.mubr.bf16.mxu1 %v5049_v0 }
 0x259   :  { %3813 = vmatmul.mubr.msk.bf16.gmra.mrb[12].mxu0 %vm235_vm0, %v372_v11  ;;  %3817 = vmatmul.mubr.msk.bf16.gmra.mrb[12].mxu1 %vm235_vm0, %v372_v11 }
 0x25a   :  { %675 = vmatprep.mubr.bf16.mxu0 %v5049_v0  ;;  %748 = vmatprep.mubr.bf16.mxu1 %v5049_v0 }
 0x261   :  { %3826 = vmatmul.mubr.msk.bf16.vlgmr.msra.gmra.mrb[16].mxu0 %vm235_vm0, %v371_v7  ;;  %3830 = vmatmul.mubr.msk.bf16.vlgmr.msra.gmra.mrb[16].mxu1 %vm235_vm0, %v371_v7 }
 0x262   :  { %685 = vmatprep.mubr.bf16.mxu0 %v5049_v0  ;;  %758 = vmatprep.mubr.bf16.mxu1 %v5049_v0 }
 0x263   :  { %854 = vmatpush1.bf16.msra.mxu0 %v4443_v48  ;;  %927 = vmatpush1.bf16.msra.mxu1 %v4446_v49 }
 0x264   :  { %855 = vmatprep.subr.bf16.mxu0 %v4451_v12  ;;  %928 = vmatprep.subr.bf16.mxu1 %v4454_v13 }
 0x267   :  { %856 = vmatpush1.bf16.msra.mxu0 %v4449_v14  ;;  %929 = vmatpush1.bf16.msra.mxu1 %v4452_v15 }
 0x268   :  { %4047 = vmatprep.subr.bf16.mxu0 %v6313_v16  ;;  %4053 = vmatprep.subr.bf16.mxu1 %v6313_v16 }
 0x269   :  { %3827 = vmatmul.mubr.msk.bf16.gmra.mrb[20].mxu0 %vm235_vm0, %v372_v11  ;;  %3831 = vmatmul.mubr.msk.bf16.gmra.mrb[20].mxu1 %vm235_vm0, %v372_v11 }
 0x26a   :  { %695 = vmatprep.mubr.bf16.mxu0 %v5049_v0  ;;  %768 = vmatprep.mubr.bf16.mxu1 %v5049_v0 }
 0x271   :  { %3828 = vmatmul.mubr.msk.bf16.gmra.mrb[24].mxu0 %vm235_vm0, %v5390_v47  ;;  %3832 = vmatmul.mubr.msk.bf16.gmra.mrb[24].mxu1 %vm235_vm0, %v5390_v47 }
 0x272   :  { %705 = vmatprep.mubr.bf16.mxu0 %v5049_v0  ;;  %778 = vmatprep.mubr.bf16.mxu1 %v5049_v0 }
 0x279   :  { %3829 = vmatmul.mubr.msk.bf16.gmra.mrb[28].mxu0 %vm235_vm0, %v5402_v63  ;;  %3833 = vmatmul.mubr.msk.bf16.gmra.mrb[28].mxu1 %vm235_vm0, %v5402_v63 }
 0x27a   :  { %885 = vmatprep.mubr.bf16.mxu0 %v5049_v0  ;;  %958 = vmatprep.mubr.bf16.mxu1 %v5049_v0 }
 0x281   :  { %3842 = vmatmul.mubr.msk.bf16.vlgmr.msra.gmra.mrb[32].mxu0 %vm235_vm0, %v371_v7  ;;  %3846 = vmatmul.mubr.msk.bf16.vlgmr.msra.gmra.mrb[32].mxu1 %vm235_vm0, %v371_v7 }
 0x282   :  { %895 = vmatprep.mubr.bf16.mxu0 %v5049_v0  ;;  %968 = vmatprep.mubr.bf16.mxu1 %v5049_v0 }
 0x289   :  { %3843 = vmatmul.mubr.msk.bf16.gmra.mrb[36].mxu0 %vm235_vm0, %v372_v11  ;;  %3847 = vmatmul.mubr.msk.bf16.gmra.mrb[36].mxu1 %vm235_vm0, %v372_v11 }
 0x28a   :  { %905 = vmatprep.mubr.bf16.mxu0 %v5049_v0  ;;  %978 = vmatprep.mubr.bf16.mxu1 %v5049_v0 }
 0x291   :  { %3844 = vmatmul.mubr.msk.bf16.gmra.mrb[40].mxu0 %vm235_vm0, %v5390_v47  ;;  %3848 = vmatmul.mubr.msk.bf16.gmra.mrb[40].mxu1 %vm235_vm0, %v5390_v47 }
 0x292   :  { %915 = vmatprep.mubr.bf16.mxu0 %v5049_v0  ;;  %988 = vmatprep.mubr.bf16.mxu1 %v5049_v0 }
 0x299   :  { %3845 = vmatmul.mubr.msk.bf16.gmra.mrb[44].mxu0 %vm235_vm0, %v5402_v63  ;;  %3849 = vmatmul.mubr.msk.bf16.gmra.mrb[44].mxu1 %vm235_vm0, %v5402_v63 }
 0x29a   :  { %4049 = vmatprep.mubr.msk.bf16.mxu0 %vm5051_vm1, %v6313_v16  ;;  %4055 = vmatprep.mubr.msk.bf16.mxu1 %vm5051_vm1, %v6313_v16 }
 0x314   :  { %v5467_v17 = vpop.f32.mrb[0].mxu0  ;;  %v5469_v0 = vpop.f32.mrb[0].mxu1 }
 0x315   :  { %v5471_v18 = vpop.f32.mrb[1].mxu0  ;;  %v5473_v19 = vpop.f32.mrb[1].mxu1 }
 0x316   :  { %6349 = vst [vmem:[#allocation35_spill] sm:$0xff] %v5473_v19  ;;  %v5475_v22 = vpop.f32.mrb[2].mxu0  ;;  %v5477_v23 = vpop.f32.mrb[2].mxu1 }
 0x317   :  { %v579_v24 = vpack.c.bf16 %v5475_v22, %v5467_v17  ;;  %v5483_v26 = vpop.f32.mrb[3].mxu0  ;;  %v5485_v27 = vpop.f32.mrb[3].mxu1 }
 0x318   :  { %6350 = vst [vmem:[#allocation36_spill] sm:$0xff] %v5485_v27 }
 0x31c   :  { %v5491_v32 = vpop.f32.mrb[4].mxu0  ;;  %v5493_v33 = vpop.f32.mrb[4].mxu1 }
 0x31d   :  { %v5495_v34 = vpop.f32.mrb[5].mxu0  ;;  %v5497_v35 = vpop.f32.mrb[5].mxu1 }
 0x31e   :  { %6351 = vst [vmem:[#allocation37_spill] sm:$0xff] %v5497_v35  ;;  %v5499_v36 = vpop.f32.mrb[6].mxu0  ;;  %v5501_v37 = vpop.f32.mrb[6].mxu1 }
 0x31f   :  { %v583_v40 = vpack.c.bf16 %v5499_v36, %v5491_v32  ;;  %v5507_v20 = vpop.f32.mrb[7].mxu0  ;;  %v5509_v42 = vpop.f32.mrb[7].mxu1 }
 0x320   :  { %6352 = vst [vmem:[#allocation38_spill] sm:$0xff] %v5509_v42 }
 0x324   :  { %v5515_v45 = vpop.f32.mrb[8].mxu0  ;;  %v5517_v46 = vpop.f32.mrb[8].mxu1 }
 0x325   :  { %v5519_v47 = vpop.f32.mrb[9].mxu0  ;;  %v5521_v50 = vpop.f32.mrb[9].mxu1 }
 0x326   :  { %6353 = vst [vmem:[#allocation39_spill] sm:$0xff] %v5519_v47  ;;  %6354 = vst [vmem:[#allocation40_spill] sm:$0xff] %v5521_v50  ;;  %v5523_v28 = vpop.f32.mrb[10].mxu0  ;;  %v5525_v51 = vpop.f32.mrb[10].mxu1 }
 0x327   :  { %v587_v52 = vpack.c.bf16 %v5523_v28, %v5515_v45  ;;  %v5531_v54 = vpop.f32.mrb[11].mxu0  ;;  %v5533_v21 = vpop.f32.mrb[11].mxu1 }
 0x328   :  { %6355 = vst [vmem:[#allocation41_spill] sm:$0xff] %v5531_v54  ;;  %6356 = vst [vmem:[#allocation42_spill] sm:$0xff] %v5533_v21 }
 0x32c   :  { %v5539_v56 = vpop.f32.mrb[12].mxu0  ;;  %v5541_v57 = vpop.f32.mrb[12].mxu1 }
 0x32d   :  { %v5543_v58 = vpop.f32.mrb[13].mxu0  ;;  %v5545_v59 = vpop.f32.mrb[13].mxu1 }
 0x32e   :  { %6357 = vst [vmem:[#allocation43_spill] sm:$0xff] %v5545_v59  ;;  %v5547_v60 = vpop.f32.mrb[14].mxu0  ;;  %v5549_v61 = vpop.f32.mrb[14].mxu1 }
 0x32f   :  { %v591_v62 = vpack.c.bf16 %v5547_v60, %v5539_v56  ;;  %v5555_v1 = vpop.f32.mrb[15].mxu0  ;;  %v5557_v39 = vpop.f32.mrb[15].mxu1 }
 0x330   :  { %6358 = vst [vmem:[#allocation44_spill] sm:$0xff] %v5557_v39 }
 0x334   :  { %v677_v3 = vpop.f32.mrb[16].mxu0  ;;  %v5563_v4 = vpop.f32.mrb[16].mxu1 }
 0x335   :  { %v5565_v5 = vpop.f32.mrb[17].mxu0  ;;  %v5567_v6 = vpop.f32.mrb[17].mxu1 }
 0x336   :  { %6359 = vst [vmem:[#allocation45_spill] sm:$0xff] %v5567_v6  ;;  %v681_v7 = vpop.f32.mrb[18].mxu0  ;;  %v5569_v8 = vpop.f32.mrb[18].mxu1 }
 0x337   :  { %v789_v9 = vpack.c.bf16 %v681_v7, %v677_v3  ;;  %v5573_v11 = vpop.f32.mrb[19].mxu0  ;;  %v5575_v48 = vpop.f32.mrb[19].mxu1 }
 0x338   :  { %6360 = vst [vmem:[#allocation46_spill] sm:$0xff] %v5575_v48 }
 0x339   :  { %4048 = vmatpush3.bf16.xpose.msra.mxu0 %v789_v9 }
 0x33a   :  { %4059 = vmatprep.subr.bf16.mxu0 %v6313_v16 }
 0x33c   :  { %v687_v13 = vpop.f32.mrb[20].mxu0  ;;  %v5582_v14 = vpop.f32.mrb[20].mxu1 }
 0x33d   :  { %v5584_v15 = vpop.f32.mrb[21].mxu0  ;;  %v5586_v3 = vpop.f32.mrb[21].mxu1 }
 0x33e   :  { %6361 = vst [vmem:[#allocation47_spill] sm:$0xff] %v5586_v3  ;;  %v691_v7 = vpop.f32.mrb[22].mxu0  ;;  %v5588_v38 = vpop.f32.mrb[22].mxu1 }
 0x33f   :  { %v793_v55 = vpack.c.bf16 %v691_v7, %v687_v13  ;;  %v5592_v31 = vpop.f32.mrb[23].mxu0  ;;  %v5594_v12 = vpop.f32.mrb[23].mxu1 }
 0x340   :  { %6362 = vst [vmem:[#allocation48_spill] sm:$0xff] %v5594_v12  ;;  %4050 = vmatmul.mubr.bf16.vlgmr.msra.gmra.mrb[48].mxu0 %v579_v24 }
 0x341   :  { %4054 = vmatpush3.bf16.xpose.msra.mxu1 %v793_v55  ;;  %4061 = vmatprep.mubr.msk.bf16.mxu0 %vm5051_vm1, %v6313_v16 }
 0x342   :  { %4065 = vmatprep.subr.bf16.mxu1 %v6313_v16 }
 0x344   :  { %v697_v13 = vpop.f32.mrb[24].mxu0  ;;  %v5606_v7 = vpop.f32.mrb[24].mxu1 }
 0x345   :  { %v5608_v30 = vpop.f32.mrb[25].mxu0  ;;  %v5610_v49 = vpop.f32.mrb[25].mxu1 }
 0x346   :  { %6363 = vst [vmem:[#allocation49_spill] sm:$0xff] %v5610_v49  ;;  %v701_v63 = vpop.f32.mrb[26].mxu0  ;;  %v5612_v53 = vpop.f32.mrb[26].mxu1 }
 0x347   :  { %v797_v29 = vpack.c.bf16 %v701_v63, %v697_v13  ;;  %v5616_v22 = vpop.f32.mrb[27].mxu0  ;;  %v5618_v24 = vpop.f32.mrb[27].mxu1 }
 0x348   :  { %6364 = vst [vmem:[#allocation50_spill] sm:$0xff] %v5618_v24  ;;  %4056 = vmatmul.mubr.bf16.vlgmr.msra.gmra.mrb[48].mxu1 %v583_v40 }
 0x349   :  { %4060 = vmatpush3.bf16.xpose.msra.mxu0 %v797_v29  ;;  %4067 = vmatprep.mubr.msk.bf16.mxu1 %vm5051_vm1, %v6313_v16 }
 0x34a   :  { %4071 = vmatprep.subr.bf16.mxu0 %v6313_v16 }
 0x34c   :  { %v707_v63 = vpop.f32.mrb[28].mxu0  ;;  %v5630_v13 = vpop.f32.mrb[28].mxu1 }
 0x34d   :  { %v5632_v17 = vpop.f32.mrb[29].mxu0  ;;  %v5634_v44 = vpop.f32.mrb[29].mxu1 }
 0x34e   :  { %6365 = vst [vmem:[#allocation51_spill] sm:$0xff] %v5634_v44  ;;  %v711_v55 = vpop.f32.mrb[30].mxu0  ;;  %v5636_v25 = vpop.f32.mrb[30].mxu1 }
 0x34f   :  { %v801_v41 = vpack.c.bf16 %v711_v55, %v707_v63  ;;  %v5640_v36 = vpop.f32.mrb[31].mxu0  ;;  %v5642_v40 = vpop.f32.mrb[31].mxu1 }
 0x350   :  { %6366 = vst [vmem:[#allocation52_spill] sm:$0xff] %v5642_v40  ;;  %4062 = vmatmul.mubr.bf16.vlgmr.msra.gmra.mrb[52].mxu0 %v587_v52 }
 0x351   :  { %4066 = vmatpush3.bf16.xpose.msra.mxu1 %v801_v41  ;;  %4073 = vmatprep.mubr.msk.bf16.mxu0 %vm5051_vm1, %v6313_v16 }
 0x352   :  { %4077 = vmatprep.subr.bf16.mxu1 %v6313_v16 }
 0x354   :  { %v887_v55 = vpop.f32.mrb[32].mxu0  ;;  %v5654_v63 = vpop.f32.mrb[32].mxu1 }
 0x355   :  { %v5656_v32 = vpop.f32.mrb[33].mxu0  ;;  %v5658_v2 = vpop.f32.mrb[33].mxu1 }
 0x356   :  { %6367 = vst [vmem:[#allocation53_spill] sm:$0xff] %v5656_v32  ;;  %6368 = vst [vmem:[#allocation54_spill] sm:$0xff] %v5658_v2  ;;  %v891_v29 = vpop.f32.mrb[34].mxu0  ;;  %v5660_v43 = vpop.f32.mrb[34].mxu1  ;;  %v6375_v2 = vmov 0.0  }
 0x357   :  { %v999_v10 = vpack.c.bf16 %v891_v29, %v887_v55  ;;  %v5664_v41 = vpop.f32.mrb[35].mxu0  ;;  %v5666_v28 = vpop.f32.mrb[35].mxu1 }
 0x358   :  { %6369 = vst [vmem:[#allocation55_spill] sm:$0xff] %v5664_v41  ;;  %6370 = vst [vmem:[#allocation56_spill] sm:$0xff] %v5666_v28  ;;  %4068 = vmatmul.mubr.bf16.vlgmr.msra.gmra.mrb[52].mxu1 %v591_v62 }
 0x359   :  { %4072 = vmatpush3.bf16.msra.mxu0 %v999_v10  ;;  %4079 = vmatprep.mubr.msk.bf16.mxu1 %vm5051_vm1, %v6313_v16 }
 0x35a   :  { %4083 = vmatprep.subr.bf16.mxu0 %v6313_v16 }
 0x35c   :  { %v897_v29 = vpop.f32.mrb[36].mxu0  ;;  %v5678_v55 = vpop.f32.mrb[36].mxu1 }
 0x35d   :  { %6371 = vst [vmem:[#allocation57_spill] sm:$0xff] %v5678_v55  ;;  %v5680_v45 = vpop.f32.mrb[37].mxu0  ;;  %v5682_v59 = vpop.f32.mrb[37].mxu1 }
 0x35e   :  { %6372 = vst [vmem:[#allocation58_spill] sm:$0xff] %v5682_v59  ;;  %v901_v52 = vpop.f32.mrb[38].mxu0  ;;  %v5684_v39 = vpop.f32.mrb[38].mxu1 }
 0x35f   :  { %6373 = vst [vmem:[#allocation59_spill] sm:$0xff] %v5684_v39  ;;  %v1003_v9 = vpack.c.bf16 %v901_v52, %v897_v29  ;;  %v5688_v60 = vpop.f32.mrb[39].mxu0  ;;  %v5690_v62 = vpop.f32.mrb[39].mxu1 }
 0x360   :  { %6374 = vst [vmem:[#allocation60_spill] sm:$0xff] %v5690_v62 }
 0x361   :  { %4078 = vmatpush3.bf16.msra.mxu1 %v1003_v9 }
 0x362   :  { %4089 = vmatprep.subr.bf16.mxu1 %v6375_v2 }
 0x364   :  { %v5697_v28 = vpop.f32.mrb[40].mxu0  ;;  %v5699_v44 = vpop.f32.mrb[40].mxu1 }
 0x365   :  { %6376 = vst [vmem:[#allocation61_spill] sm:$0xff] %v5699_v44  ;;  %v5701_v52 = vpop.f32.mrb[41].mxu0  ;;  %v5703_v29 = vpop.f32.mrb[41].mxu1 }
 0x366   :  { %6377 = vst [vmem:[#allocation62_spill] sm:$0xff] %v5701_v52  ;;  %6378 = vst [vmem:[#allocation63_spill] sm:$0xff] %v5703_v29  ;;  %v5705_v56 = vpop.f32.mrb[42].mxu0  ;;  %v5707_v40 = vpop.f32.mrb[42].mxu1 }
 0x367   :  { %6379 = vst [vmem:[#allocation64_spill] sm:$0xff] %v5707_v40  ;;  %v5713_v16 = vpop.f32.mrb[43].mxu0  ;;  %v5715_v59 = vpop.f32.mrb[43].mxu1 }
 0x368   :  { %6380 = vst [vmem:[#allocation65_spill] sm:$0xff] %v5713_v16  ;;  %6381 = vst [vmem:[#allocation66_spill] sm:$0xff] %v5715_v59 }
 0x36c   :  { %v5721_v21 = vpop.f32.mrb[44].mxu0  ;;  %v5723_v49 = vpop.f32.mrb[44].mxu1 }
 0x36d   :  { %6382 = vst [vmem:[#allocation67_spill] sm:$0xff] %v5723_v49  ;;  %v5725_v24 = vpop.f32.mrb[45].mxu0  ;;  %v5727_v10 = vpop.f32.mrb[45].mxu1 }
 0x36e   :  { %6383 = vst [vmem:[#allocation68_spill] sm:$0xff] %v5727_v10  ;;  %v5729_v35 = vpop.f32.mrb[46].mxu0  ;;  %v5731_v9 = vpop.f32.mrb[46].mxu1 }
 0x36f   :  { %6384 = vst [vmem:[#allocation69_spill] sm:$0xff] %v5731_v9  ;;  %v5737_v52 = vpop.f32.mrb[47].mxu0  ;;  %v5739_v50 = vpop.f32.mrb[47].mxu1 }
 0x370   :  { %6385 = vst [vmem:[#allocation70_spill] sm:$0xff] %v5739_v50 }
 0x413   :  { %v5745_v16 = vpop.f32.mrb[48].mxu0 }
 0x414   :  { %v4051_v3 = vpop.f32.mrb[49].mxu0 }
 0x415   :  { %v5747_v12 = vpop.f32.mrb[50].mxu0 }
 0x416   :  { %v4052_v19 = vpop.f32.mrb[51].mxu0 }
 0x41b   :  { %v1090_v42 = vpop.f32.mrb[48].mxu1 }
 0x41c   :  { %v4057_v27 = vpop.f32.mrb[49].mxu1  ;;  %v1186_v62 = vsel %vm1179_vm2, %v1090_v42, -inf }
 0x41d   :  { %1187 = vmax.xlane.f32.xlu0 %v1186_v62  ;;  %v1093_v6 = vpop.f32.mrb[50].mxu1 }
 0x41e   :  { %v4058_v48 = vpop.f32.mrb[51].mxu1  ;;  %v1189_v49 = vsel %vm1179_vm2, %v1093_v6, -inf }
 0x41f   :  { %1190 = vmax.xlane.f32.xlu1 %v1189_v49 }
 0x423   :  { %v5751_v29 = vpop.f32.mrb[52].mxu0 }
 0x424   :  { %v4063_v59 = vpop.f32.mrb[53].mxu0 }
 0x425   :  { %v5753_v10 = vpop.f32.mrb[54].mxu0 }
 0x426   :  { %v4064_v3 = vpop.f32.mrb[55].mxu0 }
 0x42b   :  { %v1172_v50 = vpop.f32.mrb[52].mxu1 }
 0x42c   :  { %v4069_v9 = vpop.f32.mrb[53].mxu1  ;;  %v1198_v19 = vsel %vm1179_vm2, %v1172_v50, -inf }
 0x42d   :  { %1199 = vmax.xlane.f32.xlu0 %v1198_v19  ;;  %v1175_v27 = vpop.f32.mrb[54].mxu1 }
 0x42e   :  { %v4070_v44 = vpop.f32.mrb[55].mxu1  ;;  %v1201_v62 = vsel %vm1179_vm2, %v1175_v27, -inf }
 0x42f   :  { %1202 = vmax.xlane.f32.xlu1 %v1201_v62 }
 0x4aa   :  { %v1188_v48 = vpop.xlane.xlu0 %1187 }
 0x4ab   :  { %v1206_v40 = vsub.f32 %v1090_v42, %v1188_v48 }
 0x4ac   :  { %v1191_v55 = vpop.xlane.xlu1 %1190 }
 0x4ad   :  { %v1216_v49 = vmul.f32 1.442695, %v1206_v40  ;;  %v1207_v39 = vsub.f32 %v1093_v6, %v1191_v55 }
 0x4af   :  { %4513 = vpow2.f32 %v1216_v49  ;;  %v1218_v59 = vmul.f32 1.442695, %v1207_v39 }
 0x4b1   :  { %4515 = vpow2.f32 %v1218_v59 }
 0x4b9   :  { %v4514_v32 = vpop.eup %4513 }
 0x4ba   :  { %v1200_v3 = vpop.xlane.xlu0 %1199  ;;  %v1234_v9 = vsel %vm1179_vm2, %v4514_v32, 0.0 }
 0x4bb   :  { %v4516_v41 = vpop.eup %4515  ;;  %v1210_v47 = vsub.f32 %v1172_v50, %v1200_v3  ;;  %1235 = vadd.xlane.f32.xlu0 %v1234_v9 }
 0x4bc   :  { %v1203_v19 = vpop.xlane.xlu1 %1202  ;;  %v1237_v44 = vsel %vm1179_vm2, %v4516_v41, 0.0 }
 0x4bd   :  { %v1224_v54 = vmul.f32 1.442695, %v1210_v47  ;;  %v1211_v62 = vsub.f32 %v1175_v27, %v1203_v19  ;;  %1238 = vadd.xlane.f32.xlu1 %v1237_v44  ;;  %v6386_v19 = vpack.c.bf16 %v5729_v35, %v5721_v21  ;;  %v6388_v35 = vpack.c.bf16 %v5507_v20, %v5495_v34 }
 0x4be   :  { %v6389_v21 = vpack.c.bf16 %v5640_v36, %v5632_v17 }
 0x4bf   :  { %4517 = vpow2.f32 %v1224_v54  ;;  %v1226_v42 = vmul.f32 1.442695, %v1211_v62 }
 0x4c1   :  { %4519 = vpow2.f32 %v1226_v42 }
 0x4c9   :  { %v4518_v6 = vpop.eup %4517 }
 0x4ca   :  { %v1246_v39 = vsel %vm1179_vm2, %v4518_v6, 0.0 }
 0x4cb   :  { %v4520_v40 = vpop.eup %4519  ;;  %1247 = vadd.xlane.f32.xlu0 %v1246_v39  ;;  %v6387_v39 = vpack.c.bf16 %v5592_v31, %v5584_v15  ;;  %v6390_v31 = vpack.c.bf16 %v5555_v1, %v5543_v58  ;;  %v6391_v15 = vpack.c.bf16 %v5688_v60, %v5680_v45 }
 0x4cc   :  { %v1249_v55 = vsel %vm1179_vm2, %v4520_v40, 0.0 }
 0x4cd   :  { %1250 = vadd.xlane.f32.xlu1 %v1249_v55 }
 0x548   :  { %v1236_v48 = vpop.xlane.xlu0 %1235 }
 0x549   :  { %4521 = vrcp.f32 %v1236_v48 }
 0x54a   :  { %v1239_v50 = vpop.xlane.xlu1 %1238 }
 0x54b   :  { %4523 = vrcp.f32 %v1239_v50 }
 0x553   :  { %v4522_v49 = vpop.eup %4521 }
 0x554   :  { %v1262_v47 = vmul.f32 %v4522_v49, %v4514_v32 }
 0x555   :  { %v4524_v59 = vpop.eup %4523 }
 0x556   :  { %v1263_v27 = vmul.f32 %v4524_v59, %v4516_v41 }
 0x558   :  { %v1248_v3 = vpop.xlane.xlu0 %1247  ;;  %v1269_v54 = vpack.c.bf16 %v1263_v27, %v1262_v47 }
 0x559   :  { %4525 = vrcp.f32 %v1248_v3 }
 0x55a   :  { %v1251_v9 = vpop.xlane.xlu1 %1250  ;;  %4080 = vmatmul.mubr.msk.bf16.vlgmr.msra.gmra.mrb[56].mxu1 %vm1179_vm2, %v1269_v54 }
 0x55b   :  { %4527 = vrcp.f32 %v1251_v9  ;;  %4090 = vmatpush3.bf16.msra.mxu1 %v6386_v19  ;;  %4091 = vmatprep.mubr.msk.bf16.mxu1 %vm5051_vm1, %v6375_v2 }
 0x55c   :  { %4101 = vmatprep.subr.bf16.mxu1 %v6375_v2 }
 0x563   :  { %v4526_v44 = vpop.eup %4525 }
 0x564   :  { %v1266_v32 = vmul.f32 %v4526_v44, %v4518_v6 }
 0x565   :  { %v4528_v62 = vpop.eup %4527 }
 0x566   :  { %v1267_v41 = vmul.f32 %v4528_v62, %v4520_v40 }
 0x568   :  { %v1271_v42 = vpack.c.bf16 %v1267_v41, %v1266_v32 }
 0x56a   :  { %4092 = vmatmul.mubr.msk.bf16.vlgmr.msra.gmra.mrb[60].mxu1 %vm1179_vm2, %v1271_v42 }
 0x56b   :  { %4102 = vmatpush3.bf16.xpose.msra.mxu1 %v6387_v39  ;;  %4103 = vmatprep.mubr.msk.bf16.mxu1 %vm5051_vm1, %v6375_v2 }
 0x56c   :  { %4113 = vmatprep.subr.bf16.mxu1 %v6375_v2 }
 0x572   :  { %4104 = vmatmul.mubr.bf16.vlgmr.msra.gmra.mrb[64].mxu1 %v6388_v35 }
 0x573   :  { %4114 = vmatpush3.bf16.xpose.msra.mxu1 %v6389_v21  ;;  %4115 = vmatprep.mubr.msk.bf16.mxu1 %vm5051_vm1, %v6375_v2 }
 0x574   :  { %4125 = vmatprep.subr.bf16.mxu1 %v6375_v2 }
 0x57a   :  { %4116 = vmatmul.mubr.bf16.vlgmr.msra.gmra.mrb[68].mxu1 %v6390_v31 }
 0x57b   :  { %4126 = vmatpush3.bf16.msra.mxu1 %v6391_v15  ;;  %4127 = vmatprep.mubr.msk.bf16.mxu1 %vm5051_vm1, %v6375_v2 }
 0x57c   :  { %4137 = vmatprep.subr.bf16.mxu1 %v6375_v2 }
 0x62d   :  { %v5793_v34 = vpop.f32.mrb[56].mxu1 }
 0x62e   :  { %v4081_v20 = vpop.f32.mrb[57].mxu1 }
 0x62f   :  { %v5795_v17 = vpop.f32.mrb[58].mxu1 }
 0x630   :  { %v1449_v36 = vpack.c.bf16 %v5795_v17, %v5793_v34  ;;  %v4082_v6 = vpop.f32.mrb[59].mxu1  ;;  %v4475_v34 = vld [vmem:[#allocation13 + $0xa0] sm:$0xff]   ;;  %v4476_v17 = vld [vmem:[#allocation13 + $0xa8] sm:$0xff]  }
 0x63d   :  { %v5799_v58 = vpop.f32.mrb[60].mxu1 }
 0x63e   :  { %v4093_v1 = vpop.f32.mrb[61].mxu1 }
 0x63f   :  { %v5801_v40 = vpop.f32.mrb[62].mxu1 }
 0x640   :  { %v1451_v45 = vpack.c.bf16 %v5801_v40, %v5799_v58  ;;  %v4094_v60 = vpop.f32.mrb[63].mxu1  ;;  %v6451_v58 = vld [vmem:[#allocation60_spill] sm:$0xff]  ;;  %v6452_v40 = vld [vmem:[#allocation58_spill] sm:$0xff] }
 0x645   :  { %v1543_v55 = vpop.f32.mrb[64].mxu1 }
 0x646   :  { %v4105_v48 = vpop.f32.mrb[65].mxu1  ;;  %v1638_v50 = vsel %vm1179_vm2, %v1543_v55, -inf }
 0x647   :  { %1639 = vmax.xlane.f32.xlu0 %v1638_v50  ;;  %v1546_v49 = vpop.f32.mrb[66].mxu1 }
 0x648   :  { %v4106_v59 = vpop.f32.mrb[67].mxu1  ;;  %v1641_v47 = vsel %vm1179_vm2, %v1546_v49, -inf }
 0x649   :  { %1642 = vmax.xlane.f32.xlu1 %v1641_v47 }
 0x64d   :  { %v1625_v27 = vpop.f32.mrb[68].mxu1 }
 0x64e   :  { %v4117_v3 = vpop.f32.mrb[69].mxu1  ;;  %v1650_v54 = vsel %vm1179_vm2, %v1625_v27, -inf }
 0x64f   :  { %1651 = vmax.xlane.f32.xlu0 %v1650_v54  ;;  %v1628_v9 = vpop.f32.mrb[70].mxu1  ;;  %v1180_v3 = vsel %vm1179_vm2, %v5745_v16, -inf  ;;  %v1183_v54 = vsel %vm1179_vm2, %v5747_v12, -inf }
 0x650   :  { %v4118_v19 = vpop.f32.mrb[71].mxu1  ;;  %v1653_v44 = vsel %vm1179_vm2, %v1628_v9, -inf }
 0x651   :  { %1654 = vmax.xlane.f32.xlu1 %v1653_v44  ;;  %v1195_v19 = vsel %vm1179_vm2, %v5753_v10, -inf }
 0x6d4   :  { %v1640_v62 = vpop.xlane.xlu0 %1639 }
 0x6d5   :  { %v1658_v32 = vsub.f32 %v1543_v55, %v1640_v62 }
 0x6d6   :  { %v1643_v41 = vpop.xlane.xlu1 %1642 }
 0x6d7   :  { %v1668_v42 = vmul.f32 1.442695, %v1658_v32  ;;  %v1659_v39 = vsub.f32 %v1546_v49, %v1643_v41 }
 0x6d9   :  { %4529 = vpow2.f32 %v1668_v42  ;;  %v1670_v35 = vmul.f32 1.442695, %v1659_v39 }
 0x6db   :  { %4531 = vpow2.f32 %v1670_v35 }
 0x6dc   :  { %v1652_v21 = vpop.xlane.xlu0 %1651 }
 0x6dd   :  { %v1662_v31 = vsub.f32 %v1625_v27, %v1652_v21 }
 0x6de   :  { %v1655_v15 = vpop.xlane.xlu1 %1654 }
 0x6df   :  { %v1676_v20 = vmul.f32 1.442695, %v1662_v31  ;;  %v1663_v6 = vsub.f32 %v1628_v9, %v1655_v15  ;;  %v1192_v9 = vsel %vm1179_vm2, %v5751_v29, -inf }
 0x6e1   :  { %4533 = vpow2.f32 %v1676_v20  ;;  %v1678_v1 = vmul.f32 1.442695, %v1663_v6 }
 0x6e3   :  { %v4530_v60 = vpop.eup %4529  ;;  %4535 = vpow2.f32 %v1678_v1 }
 0x6e4   :  { %v1686_v48 = vsel %vm1179_vm2, %v4530_v60, 0.0 }
 0x6e5   :  { %v4532_v50 = vpop.eup %4531  ;;  %1687 = vadd.xlane.f32.xlu0 %v1686_v48 }
 0x6e6   :  { %v1689_v55 = vsel %vm1179_vm2, %v4532_v50, 0.0 }
 0x6e7   :  { %1690 = vadd.xlane.f32.xlu1 %v1689_v55 }
 0x6eb   :  { %v4534_v49 = vpop.eup %4533 }
 0x6ec   :  { %v1698_v59 = vsel %vm1179_vm2, %v4534_v49, 0.0 }
 0x6ed   :  { %v4536_v47 = vpop.eup %4535  ;;  %1699 = vadd.xlane.f32.xlu0 %v1698_v59 }
 0x6ee   :  { %v1701_v27 = vsel %vm1179_vm2, %v4536_v47, 0.0 }
 0x6ef   :  { %1702 = vadd.xlane.f32.xlu1 %v1701_v27 }
 0x6f1   :  { %1181 = vmax.xlane.f32.xlu0 %v1180_v3 }
 0x6f3   :  { %1184 = vmax.xlane.f32.xlu1 %v1183_v54 }
 0x6f5   :  { %1193 = vmax.xlane.f32.xlu0 %v1192_v9 }
 0x6f7   :  { %1196 = vmax.xlane.f32.xlu1 %v1195_v19 }
 0x772   :  { %v1688_v44 = vpop.xlane.xlu0 %1687 }
 0x773   :  { %4537 = vrcp.f32 %v1688_v44 }
 0x774   :  { %v1691_v62 = vpop.xlane.xlu1 %1690 }
 0x775   :  { %4539 = vrcp.f32 %v1691_v62 }
 0x77a   :  { %v1700_v32 = vpop.xlane.xlu0 %1699 }
 0x77b   :  { %4541 = vrcp.f32 %v1700_v32 }
 0x77c   :  { %v1703_v41 = vpop.xlane.xlu1 %1702 }
 0x77d   :  { %v4538_v42 = vpop.eup %4537  ;;  %4543 = vrcp.f32 %v1703_v41 }
 0x77e   :  { %v1182_v39 = vpop.xlane.xlu0 %1181  ;;  %v1714_v31 = vmul.f32 %v4538_v42, %v4530_v60 }
 0x77f   :  { %v4540_v35 = vpop.eup %4539  ;;  %v1204_v21 = vsub.f32 %v5745_v16, %v1182_v39  ;;  %v6392_v16 = vpack.c.bf16 %v5737_v52, %v5725_v24  ;;  %v6393_v24 = vpack.c.bf16 %v5569_v8, %v5563_v4  ;;  %v6394_v4 = vpack.c.bf16 %v5477_v23, %v5469_v0 }
 0x780   :  { %v1715_v15 = vmul.f32 %v4540_v35, %v4532_v50  ;;  %v1185_v20 = vpop.xlane.xlu1 %1184  ;;  %v6395_v8 = vpack.c.bf16 %v5588_v38, %v5582_v14  ;;  %v6396_v39 = vpack.c.bf16 %v5501_v37, %v5493_v33  ;;  %v6397_v35 = vpack.c.bf16 %v5612_v53, %v5606_v7 }
 0x781   :  { %v1212_v6 = vmul.f32 1.442695, %v1204_v21  ;;  %v1205_v1 = vsub.f32 %v5747_v12, %v1185_v20  ;;  %v6398_v0 = vpack.c.bf16 %v5525_v51, %v5517_v46  ;;  %v6399_v23 = vpack.c.bf16 %v5636_v25, %v5630_v13 }
 0x782   :  { %v1194_v48 = vpop.xlane.xlu0 %1193  ;;  %v1721_v55 = vpack.c.bf16 %v1715_v15, %v1714_v31  ;;  %v6400_v33 = vpack.c.bf16 %v5549_v61, %v5541_v57  ;;  %v6401_v37 = vpack.c.bf16 %v5660_v43, %v5654_v63  ;;  %v6402_v63 = vpack.c.bf16 %v5705_v56, %v5697_v28 }
 0x783   :  { %4545 = vpow2.f32 %v1212_v6  ;;  %v1214_v59 = vmul.f32 1.442695, %v1205_v1  ;;  %v1208_v27 = vsub.f32 %v5751_v29, %v1194_v48  ;;  %v6403_v20 = vpack.c.bf16 %v5573_v11, %v5565_v5  ;;  %v6406_v6 = vld [vmem:[#allocation41_spill] sm:$0xff]  ;;  %v6407_v1 = vld [vmem:[#allocation39_spill] sm:$0xff] }
 0x784   :  { %4128 = vmatmul.mubr.msk.bf16.vlgmr.msra.gmra.mrb[72].mxu1 %vm1179_vm2, %v1721_v55  ;;  %v1197_v3 = vpop.xlane.xlu1 %1196  ;;  %v6404_v28 = vpack.c.bf16 %v5483_v26, %v5471_v18  ;;  %v6405_v56 = vpack.c.bf16 %v5616_v22, %v5608_v30  ;;  %v6408_v48 = vpack.c.bf16 %v6406_v6, %v6407_v1  ;;  %v6409_v5 = vld [vmem:[#allocation55_spill] sm:$0xff]  ;;  %v6410_v11 = vld [vmem:[#allocation53_spill] sm:$0xff] }
 0x785   :  { %v4542_v54 = vpop.eup %4541  ;;  %4547 = vpow2.f32 %v1214_v59  ;;  %v1220_v9 = vmul.f32 1.442695, %v1208_v27  ;;  %4138 = vmatpush3.bf16.msra.mxu1 %v6392_v16  ;;  %v1209_v60 = vsub.f32 %v5753_v10, %v1197_v3  ;;  %4139 = vmatprep.mubr.msk.bf16.mxu1 %vm5051_vm1, %v6375_v2  ;;  %v6411_v55 = vpack.c.bf16 %v6409_v5, %v6410_v11 }
 0x786   :  { %4191 = vmatprep.subr.bf16.mxu1 %v6375_v2  ;;  %v1718_v50 = vmul.f32 %v4542_v54, %v4534_v49 }
 0x787   :  { %v4544_v12 = vpop.eup %4543  ;;  %4549 = vpow2.f32 %v1220_v9  ;;  %v1222_v29 = vmul.f32 1.442695, %v1209_v60 }
 0x788   :  { %v1719_v19 = vmul.f32 %v4544_v12, %v4536_v47 }
 0x789   :  { %4551 = vpow2.f32 %v1222_v29 }
 0x78a   :  { %v1723_v44 = vpack.c.bf16 %v1719_v19, %v1718_v50 }
 0x78c   :  { %4140 = vmatmul.mubr.msk.bf16.vlgmr.msra.gmra.mrb[76].mxu1 %vm1179_vm2, %v1723_v44 }
 0x78d   :  { %v4546_v62 = vpop.eup %4545  ;;  %4193 = vmatprep.mubr.msk.bf16.mxu1 %vm5051_vm1, %v6375_v2 }
 0x78e   :  { %4192 = vmatpush3.bf16.xpose.msra.mxu1 %v6393_v24  ;;  %v1228_v10 = vsel %vm1179_vm2, %v4546_v62, 0.0 }
 0x78f   :  { %v4548_v52 = vpop.eup %4547  ;;  %1229 = vadd.xlane.f32.xlu0 %v1228_v10  ;;  %4197 = vmatprep.subr.bf16.mxu1 %v6375_v2 }
 0x790   :  { %v1231_v49 = vsel %vm1179_vm2, %v4548_v52, 0.0 }
 0x791   :  { %v4550_v47 = vpop.eup %4549  ;;  %1232 = vadd.xlane.f32.xlu1 %v1231_v49 }
 0x792   :  { %v1240_v32 = vsel %vm1179_vm2, %v4550_v47, 0.0 }
 0x793   :  { %v4552_v41 = vpop.eup %4551  ;;  %1241 = vadd.xlane.f32.xlu0 %v1240_v32 }
 0x794   :  { %v1243_v42 = vsel %vm1179_vm2, %v4552_v41, 0.0 }
 0x795   :  { %4194 = vmatmul.mubr.bf16.vlgmr.msra.gmra.mrb[80].mxu1 %v6394_v4  ;;  %1244 = vadd.xlane.f32.xlu1 %v1243_v42 }
 0x796   :  { %4198 = vmatpush3.bf16.xpose.msra.mxu1 %v6395_v8  ;;  %4199 = vmatprep.mubr.msk.bf16.mxu1 %vm5051_vm1, %v6375_v2 }
 0x797   :  { %4203 = vmatprep.subr.bf16.mxu1 %v6375_v2 }
 0x79d   :  { %4200 = vmatmul.mubr.bf16.vlgmr.msra.gmra.mrb[84].mxu1 %v6396_v39 }
 0x79e   :  { %4204 = vmatpush3.bf16.xpose.msra.mxu1 %v6397_v35  ;;  %4205 = vmatprep.mubr.msk.bf16.mxu1 %vm5051_vm1, %v6375_v2 }
 0x79f   :  { %4209 = vmatprep.subr.bf16.mxu1 %v6375_v2 }
 0x7a5   :  { %4206 = vmatmul.mubr.bf16.vlgmr.msra.gmra.mrb[88].mxu1 %v6398_v0 }
 0x7a6   :  { %4210 = vmatpush3.bf16.xpose.msra.mxu1 %v6399_v23  ;;  %4211 = vmatprep.mubr.msk.bf16.mxu1 %vm5051_vm1, %v6375_v2 }
 0x7a7   :  { %4215 = vmatprep.subr.bf16.mxu1 %v6375_v2 }
 0x7ad   :  { %4212 = vmatmul.mubr.bf16.vlgmr.msra.gmra.mrb[92].mxu1 %v6400_v33 }
 0x7ae   :  { %4216 = vmatpush3.bf16.msra.mxu1 %v6401_v37  ;;  %4217 = vmatprep.mubr.msk.bf16.mxu1 %vm5051_vm1, %v6375_v2 }
 0x7af   :  { %4221 = vmatprep.subr.bf16.mxu1 %v6375_v2 }
 0x81c   :  { %v1230_v25 = vpop.xlane.xlu0 %1229 }
 0x81d   :  { %4553 = vrcp.f32 %v1230_v25 }
 0x81e   :  { %v1233_v46 = vpop.xlane.xlu1 %1232 }
 0x81f   :  { %4555 = vrcp.f32 %v1233_v46 }
 0x820   :  { %v1242_v51 = vpop.xlane.xlu0 %1241 }
 0x822   :  { %v1245_v53 = vpop.xlane.xlu1 %1244 }
 0x823   :  { %4557 = vrcp.f32 %v1245_v53 }
 0x824   :  { %4559 = vrcp.f32 %v1242_v51 }
 0x827   :  { %v4554_v38 = vpop.eup %4553 }
 0x828   :  { %v1260_v61 = vmul.f32 %v4554_v38, %v4546_v62 }
 0x829   :  { %v4556_v57 = vpop.eup %4555 }
 0x82a   :  { %v1261_v14 = vmul.f32 %v4556_v57, %v4548_v52 }
 0x82c   :  { %v1268_v7 = vpack.c.bf16 %v1261_v14, %v1260_v61 }
 0x82d   :  { %v4558_v43 = vpop.eup %4557 }
 0x82e   :  { %4074 = vmatmul.mubr.msk.bf16.vlgmr.msra.gmra.mrb[56].mxu0 %vm1179_vm2, %v1268_v7  ;;  %v4560_v13 = vpop.eup %4559  ;;  %v1265_v21 = vmul.f32 %v4558_v43, %v4552_v41 }
 0x82f   :  { %4084 = vmatpush3.bf16.msra.mxu0 %v6402_v63  ;;  %4085 = vmatprep.mubr.msk.bf16.mxu0 %vm5051_vm1, %v6375_v2  ;;  %v1264_v31 = vmul.f32 %v4560_v13, %v4550_v47 }
 0x830   :  { %4095 = vmatprep.subr.bf16.mxu0 %v6375_v2 }
 0x831   :  { %v1270_v15 = vpack.c.bf16 %v1265_v21, %v1264_v31 }
 0x836   :  { %4086 = vmatmul.mubr.msk.bf16.vlgmr.msra.gmra.mrb[60].mxu0 %vm1179_vm2, %v1270_v15 }
 0x837   :  { %4097 = vmatprep.mubr.msk.bf16.mxu0 %vm5051_vm1, %v6375_v2 }
 0x838   :  { %4096 = vmatpush3.bf16.xpose.msra.mxu0 %v6403_v20 }
 0x839   :  { %4107 = vmatprep.subr.bf16.mxu0 %v6375_v2 }
 0x83f   :  { %4098 = vmatmul.mubr.bf16.vlgmr.msra.gmra.mrb[64].mxu0 %v6404_v28 }
 0x840   :  { %4108 = vmatpush3.bf16.xpose.msra.mxu0 %v6405_v56  ;;  %4109 = vmatprep.mubr.msk.bf16.mxu0 %vm5051_vm1, %v6375_v2 }
 0x841   :  { %4119 = vmatprep.subr.bf16.mxu0 %v6375_v2 }
 0x847   :  { %4110 = vmatmul.mubr.bf16.vlgmr.msra.gmra.mrb[68].mxu0 %v6408_v48 }
 0x848   :  { %4120 = vmatpush3.bf16.msra.mxu0 %v6411_v55  ;;  %4121 = vmatprep.mubr.msk.bf16.mxu0 %vm5051_vm1, %v6375_v2 }
 0x849   :  { %4131 = vmatprep.subr.bf16.mxu0 %v6375_v2 }
 0x857   :  { %v5911_v18 = vpop.f32.mrb[72].mxu1 }
 0x858   :  { %v4129_v26 = vpop.f32.mrb[73].mxu1 }
 0x859   :  { %v5913_v30 = vpop.f32.mrb[74].mxu1 }
 0x85a   :  { %v1901_v22 = vpack.c.bf16 %v5913_v30, %v5911_v18  ;;  %v4130_v59 = vpop.f32.mrb[75].mxu1 }
 0x85f   :  { %v5917_v27 = vpop.f32.mrb[76].mxu1 }
 0x860   :  { %v4141_v3 = vpop.f32.mrb[77].mxu1 }
 0x861   :  { %v5919_v54 = vpop.f32.mrb[78].mxu1 }
 0x862   :  { %v1903_v9 = vpack.c.bf16 %v5919_v54, %v5917_v27  ;;  %v4142_v16 = vpop.f32.mrb[79].mxu1  ;;  %v4467_v27 = vld [vmem:[#allocation13 + $0x20] sm:$0xff]  }
 0x868   :  { %v2181_v60 = vpop.f32.mrb[80].mxu1 }
 0x869   :  { %v4195_v12 = vpop.f32.mrb[81].mxu1  ;;  %v2311_v29 = vsel %vm1179_vm2, %v2181_v60, -inf }
 0x86a   :  { %2312 = vmax.xlane.f32.xlu0 %v2311_v29  ;;  %v2184_v50 = vpop.f32.mrb[82].mxu1 }
 0x86b   :  { %v4196_v19 = vpop.f32.mrb[83].mxu1  ;;  %v2314_v44 = vsel %vm1179_vm2, %v2184_v50, -inf }
 0x86c   :  { %2315 = vmax.xlane.f32.xlu1 %v2314_v44 }
 0x870   :  { %v2222_v62 = vpop.f32.mrb[84].mxu1 }
 0x871   :  { %v4201_v24 = vpop.f32.mrb[85].mxu1  ;;  %v2317_v10 = vsel %vm1179_vm2, %v2222_v62, -inf }
 0x872   :  { %2318 = vmax.xlane.f32.xlu0 %v2317_v10  ;;  %v2225_v52 = vpop.f32.mrb[86].mxu1 }
 0x873   :  { %v4202_v49 = vpop.f32.mrb[87].mxu1  ;;  %v2320_v47 = vsel %vm1179_vm2, %v2225_v52, -inf }
 0x874   :  { %2321 = vmax.xlane.f32.xlu1 %v2320_v47 }
 0x878   :  { %v2263_v32 = vpop.f32.mrb[88].mxu1 }
 0x879   :  { %v4207_v41 = vpop.f32.mrb[89].mxu1  ;;  %v2323_v42 = vsel %vm1179_vm2, %v2263_v32, -inf }
 0x87a   :  { %2324 = vmax.xlane.f32.xlu0 %v2323_v42  ;;  %v2266_v4 = vpop.f32.mrb[90].mxu1 }
 0x87b   :  { %v4208_v8 = vpop.f32.mrb[91].mxu1  ;;  %v2326_v39 = vsel %vm1179_vm2, %v2266_v4, -inf }
 0x87c   :  { %2327 = vmax.xlane.f32.xlu1 %v2326_v39 }
 0x880   :  { %v2304_v35 = vpop.f32.mrb[92].mxu1 }
 0x881   :  { %v4213_v0 = vpop.f32.mrb[93].mxu1  ;;  %v2329_v23 = vsel %vm1179_vm2, %v2304_v35, -inf }
 0x882   :  { %2330 = vmax.xlane.f32.xlu0 %v2329_v23  ;;  %v2307_v33 = vpop.f32.mrb[94].mxu1 }
 0x883   :  { %v4214_v37 = vpop.f32.mrb[95].mxu1  ;;  %v2332_v25 = vsel %vm1179_vm2, %v2307_v33, -inf }
 0x884   :  { %2333 = vmax.xlane.f32.xlu1 %v2332_v25 }
 0x8f7   :  { %v2313_v46 = vpop.xlane.xlu0 %2312 }
 0x8f8   :  { %v2335_v51 = vsub.f32 %v2181_v60, %v2313_v46 }
 0x8f9   :  { %v2316_v53 = vpop.xlane.xlu1 %2315 }
 0x8fa   :  { %v2343_v38 = vmul.f32 1.442695, %v2335_v51  ;;  %v2336_v57 = vsub.f32 %v2184_v50, %v2316_v53 }
 0x8fc   :  { %4561 = vpow2.f32 %v2343_v38  ;;  %v2345_v61 = vmul.f32 1.442695, %v2336_v57 }
 0x8fe   :  { %4563 = vpow2.f32 %v2345_v61 }
 0x8ff   :  { %v2319_v14 = vpop.xlane.xlu0 %2318 }
 0x900   :  { %v2337_v7 = vsub.f32 %v2222_v62, %v2319_v14 }
 0x901   :  { %v2322_v43 = vpop.xlane.xlu1 %2321  ;;  %v5931_v13 = vpop.f32.mrb[56].mxu0 }
 0x902   :  { %v2347_v63 = vmul.f32 1.442695, %v2337_v7  ;;  %v2338_v21 = vsub.f32 %v2225_v52, %v2322_v43  ;;  %v4075_v31 = vpop.f32.mrb[57].mxu0 }
 0x903   :  { %v5933_v15 = vpop.f32.mrb[58].mxu0 }
 0x904   :  { %4565 = vpow2.f32 %v2347_v63  ;;  %v2349_v20 = vmul.f32 1.442695, %v2338_v21  ;;  %v1448_v28 = vpack.c.bf16 %v5933_v15, %v5931_v13  ;;  %v4076_v56 = vpop.f32.mrb[59].mxu0 }
 0x906   :  { %v5937_v6 = vpop.eup %4561  ;;  %4567 = vpow2.f32 %v2349_v20 }
 0x907   :  { %v2325_v1 = vpop.xlane.xlu0 %2324  ;;  %v2359_v48 = vsel %vm1179_vm2, %v5937_v6, 0.0 }
 0x908   :  { %v5941_v5 = vpop.eup %4563  ;;  %v2339_v11 = vsub.f32 %v2263_v32, %v2325_v1  ;;  %2360 = vadd.xlane.f32.xlu0 %v2359_v48 }
 0x909   :  { %v2328_v55 = vpop.xlane.xlu1 %2327  ;;  %v5943_v26 = vpop.f32.mrb[60].mxu0  ;;  %v2362_v59 = vsel %vm1179_vm2, %v5941_v5, 0.0 }
 0x90a   :  { %v2351_v3 = vmul.f32 1.442695, %v2339_v11  ;;  %v2340_v16 = vsub.f32 %v2266_v4, %v2328_v55  ;;  %2363 = vadd.xlane.f32.xlu1 %v2362_v59  ;;  %v4087_v60 = vpop.f32.mrb[61].mxu0 }
 0x90b   :  { %v5947_v12 = vpop.f32.mrb[62].mxu0 }
 0x90c   :  { %4569 = vpow2.f32 %v2351_v3  ;;  %v2353_v29 = vmul.f32 1.442695, %v2340_v16  ;;  %v1450_v50 = vpack.c.bf16 %v5947_v12, %v5943_v26  ;;  %v4088_v19 = vpop.f32.mrb[63].mxu0  ;;  %v4478_v26 = vld [vmem:[#allocation13 + $0xb8] sm:$0xff]  }
 0x90d   :  { %v6412_v19 = vld [vmem:[#allocation59_spill] sm:$0xff] }
 0x90e   :  { %v5951_v44 = vpop.eup %4565  ;;  %4571 = vpow2.f32 %v2353_v29 }
 0x90f   :  { %v2331_v62 = vpop.xlane.xlu0 %2330  ;;  %v2365_v24 = vsel %vm1179_vm2, %v5951_v44, 0.0 }
 0x910   :  { %v5955_v10 = vpop.eup %4567  ;;  %v2341_v52 = vsub.f32 %v2304_v35, %v2331_v62  ;;  %2366 = vadd.xlane.f32.xlu0 %v2365_v24  ;;  %v6413_v62 = vld [vmem:[#allocation57_spill] sm:$0xff] }
 0x911   :  { %v2334_v49 = vpop.xlane.xlu1 %2333  ;;  %v2368_v47 = vsel %vm1179_vm2, %v5955_v10, 0.0  ;;  %v6414_v24 = vpack.c.bf16 %v6412_v19, %v6413_v62 }
 0x912   :  { %v2355_v32 = vmul.f32 1.442695, %v2341_v52  ;;  %v2342_v41 = vsub.f32 %v2307_v33, %v2334_v49  ;;  %v5959_v42 = vpop.f32.mrb[64].mxu0  ;;  %2369 = vadd.xlane.f32.xlu1 %v2368_v47 }
 0x913   :  { %v4099_v4 = vpop.f32.mrb[65].mxu0  ;;  %v1632_v7 = vsel %vm1179_vm2, %v5959_v42, -inf }
 0x914   :  { %4573 = vpow2.f32 %v2355_v32  ;;  %v2357_v8 = vmul.f32 1.442695, %v2342_v41  ;;  %v5961_v39 = vpop.f32.mrb[66].mxu0  ;;  %v6415_v4 = vld [vmem:[#allocation64_spill] sm:$0xff] }
 0x915   :  { %v4100_v0 = vpop.f32.mrb[67].mxu0  ;;  %v1635_v43 = vsel %vm1179_vm2, %v5961_v39, -inf }
 0x916   :  { %v5963_v23 = vpop.eup %4569  ;;  %4575 = vpow2.f32 %v2357_v8  ;;  %v6416_v8 = vld [vmem:[#allocation61_spill] sm:$0xff] }
 0x917   :  { %v2371_v35 = vsel %vm1179_vm2, %v5963_v23, 0.0  ;;  %v6417_v0 = vpack.c.bf16 %v6415_v4, %v6416_v8  ;;  %v6431_v4 = vld [vmem:[#allocation37_spill] sm:$0xff] }
 0x918   :  { %v4572_v37 = vpop.eup %4571  ;;  %2372 = vadd.xlane.f32.xlu0 %v2371_v35 }
 0x919   :  { %v2374_v25 = vsel %vm1179_vm2, %v4572_v37, 0.0 }
 0x91a   :  { %v5968_v33 = vpop.f32.mrb[68].mxu0  ;;  %2375 = vadd.xlane.f32.xlu1 %v2374_v25 }
 0x91b   :  { %v4111_v46 = vpop.f32.mrb[69].mxu0  ;;  %v1644_v63 = vsel %vm1179_vm2, %v5968_v33, -inf }
 0x91c   :  { %v5970_v51 = vpop.f32.mrb[70].mxu0 }
 0x91d   :  { %v4112_v53 = vpop.f32.mrb[71].mxu0  ;;  %v1647_v21 = vsel %vm1179_vm2, %v5970_v51, -inf }
 0x91e   :  { %v5972_v38 = vpop.eup %4573 }
 0x91f   :  { %v2377_v57 = vsel %vm1179_vm2, %v5972_v38, 0.0 }
 0x920   :  { %v5976_v61 = vpop.eup %4575  ;;  %2378 = vadd.xlane.f32.xlu0 %v2377_v57 }
 0x921   :  { %v2380_v14 = vsel %vm1179_vm2, %v5976_v61, 0.0 }
 0x922   :  { %2381 = vadd.xlane.f32.xlu1 %v2380_v14 }
 0x924   :  { %1633 = vmax.xlane.f32.xlu0 %v1632_v7 }
 0x926   :  { %1636 = vmax.xlane.f32.xlu1 %v1635_v43 }
 0x928   :  { %1645 = vmax.xlane.f32.xlu0 %v1644_v63 }
 0x92a   :  { %1648 = vmax.xlane.f32.xlu1 %v1647_v21 }
 0x995   :  { %v2361_v31 = vpop.xlane.xlu0 %2360 }
 0x996   :  { %4577 = vrcp.f32 %v2361_v31 }
 0x997   :  { %v2364_v20 = vpop.xlane.xlu1 %2363 }
 0x998   :  { %4579 = vrcp.f32 %v2364_v20 }
 0x99d   :  { %v2367_v56 = vpop.xlane.xlu0 %2366 }
 0x99e   :  { %4581 = vrcp.f32 %v2367_v56 }
 0x99f   :  { %v2370_v1 = vpop.xlane.xlu1 %2369 }
 0x9a0   :  { %v4578_v48 = vpop.eup %4577  ;;  %4583 = vrcp.f32 %v2370_v1  ;;  %v6419_v1 = vld [vmem:[#allocation67_spill] sm:$0xff] }
 0x9a1   :  { %v2391_v55 = vmul.f32 %v4578_v48, %v5937_v6 }
 0x9a2   :  { %v4580_v11 = vpop.eup %4579 }
 0x9a3   :  { %v2392_v59 = vmul.f32 %v4580_v11, %v5941_v5 }
 0x9a5   :  { %v2373_v3 = vpop.xlane.xlu0 %2372  ;;  %v2399_v16 = vpack.c.bf16 %v2392_v59, %v2391_v55 }
 0x9a6   :  { %4585 = vrcp.f32 %v2373_v3  ;;  %v6422_v3 = vld [vmem:[#allocation45_spill] sm:$0xff] }
 0x9a7   :  { %4218 = vmatmul.mubr.msk.bf16.vlgmr.msra.gmra.mrb[96].mxu1 %vm1179_vm2, %v2399_v16  ;;  %v2376_v60 = vpop.xlane.xlu1 %2375 }
 0x9a8   :  { %v4582_v29 = vpop.eup %4581  ;;  %4222 = vmatpush3.bf16.msra.mxu1 %v6414_v24  ;;  %4587 = vrcp.f32 %v2376_v60  ;;  %4223 = vmatprep.mubr.msk.bf16.mxu1 %vm5051_vm1, %v6375_v2 }
 0x9a9   :  { %4227 = vmatprep.subr.bf16.mxu1 %v6375_v2  ;;  %v2393_v5 = vmul.f32 %v4582_v29, %v5951_v44 }
 0x9aa   :  { %v4584_v6 = vpop.eup %4583 }
 0x9ab   :  { %v2394_v52 = vmul.f32 %v4584_v6, %v5955_v10  ;;  %v6424_v6 = vld [vmem:[#allocation36_spill] sm:$0xff] }
 0x9ad   :  { %v2379_v49 = vpop.xlane.xlu0 %2378  ;;  %v2400_v47 = vpack.c.bf16 %v2394_v52, %v2393_v5  ;;  %v6425_v5 = vld [vmem:[#allocation35_spill] sm:$0xff] }
 0x9ae   :  { %4589 = vrcp.f32 %v2379_v49  ;;  %v6426_v52 = vpack.c.bf16 %v6424_v6, %v6425_v5  ;;  %v6427_v49 = vld [vmem:[#allocation48_spill] sm:$0xff] }
 0x9af   :  { %4224 = vmatmul.mubr.msk.bf16.vlgmr.msra.gmra.mrb[100].mxu1 %vm1179_vm2, %v2400_v47  ;;  %v2382_v32 = vpop.xlane.xlu1 %2381  ;;  %v6428_v47 = vld [vmem:[#allocation47_spill] sm:$0xff]  ;;  %v4456_v5 = vld [vmem:[#allocation13 + $0x48] sm:$0xff]  }
 0x9b0   :  { %v4586_v41 = vpop.eup %4585  ;;  %4228 = vmatpush3.bf16.msra.mxu1 %v6417_v0  ;;  %4591 = vrcp.f32 %v2382_v32  ;;  %4229 = vmatprep.mubr.msk.bf16.mxu1 %vm5051_vm1, %v6375_v2  ;;  %v6429_v32 = vpack.c.bf16 %v6427_v49, %v6428_v47  ;;  %v6433_v0 = vld [vmem:[#allocation50_spill] sm:$0xff] }
 0x9b1   :  { %v1634_v35 = vpop.xlane.xlu0 %1633  ;;  %4233 = vmatprep.subr.bf16.mxu1 %v6375_v2  ;;  %v2395_v25 = vmul.f32 %v4586_v41, %v5963_v23  ;;  %v6430_v41 = vld [vmem:[#allocation38_spill] sm:$0xff] }
 0x9b2   :  { %v4588_v44 = vpop.eup %4587  ;;  %v1656_v10 = vsub.f32 %v5959_v42, %v1634_v35  ;;  %v6418_v42 = vld [vmem:[#allocation69_spill] sm:$0xff]  ;;  %v6432_v8 = vpack.c.bf16 %v6430_v41, %v6431_v4 }
 0x9b3   :  { %v2396_v46 = vmul.f32 %v4588_v44, %v4572_v37  ;;  %v1637_v53 = vpop.xlane.xlu1 %1636  ;;  %v6420_v23 = vpack.c.bf16 %v6418_v42, %v6419_v1  ;;  %v6434_v35 = vld [vmem:[#allocation49_spill] sm:$0xff] }
 0x9b4   :  { %v1664_v57 = vmul.f32 1.442695, %v1656_v10  ;;  %v1657_v14 = vsub.f32 %v5961_v39, %v1637_v53  ;;  %v6435_v44 = vpack.c.bf16 %v6433_v0, %v6434_v35  ;;  %v6436_v10 = vld [vmem:[#allocation42_spill] sm:$0xff]  ;;  %v6439_v53 = vld [vmem:[#allocation52_spill] sm:$0xff] }
 0x9b5   :  { %v1646_v7 = vpop.xlane.xlu0 %1645  ;;  %v2401_v43 = vpack.c.bf16 %v2396_v46, %v2395_v25  ;;  %v6437_v25 = vld [vmem:[#allocation40_spill] sm:$0xff] }
 0x9b6   :  { %4593 = vpow2.f32 %v1664_v57  ;;  %v1666_v63 = vmul.f32 1.442695, %v1657_v14  ;;  %v1660_v21 = vsub.f32 %v5968_v33, %v1646_v7  ;;  %v6438_v46 = vpack.c.bf16 %v6436_v10, %v6437_v25  ;;  %v6440_v57 = vld [vmem:[#allocation51_spill] sm:$0xff]  ;;  %v6442_v7 = vld [vmem:[#allocation44_spill] sm:$0xff] }
 0x9b7   :  { %4230 = vmatmul.mubr.msk.bf16.vlgmr.msra.gmra.mrb[104].mxu1 %vm1179_vm2, %v2401_v43  ;;  %v1649_v31 = vpop.xlane.xlu1 %1648  ;;  %v6441_v14 = vpack.c.bf16 %v6439_v53, %v6440_v57  ;;  %v6443_v43 = vld [vmem:[#allocation43_spill] sm:$0xff] }
 0x9b8   :  { %v4590_v20 = vpop.eup %4589  ;;  %4595 = vpow2.f32 %v1666_v63  ;;  %v1672_v56 = vmul.f32 1.442695, %v1660_v21  ;;  %4234 = vmatpush3.bf16.msra.mxu1 %v6420_v23  ;;  %v1661_v37 = vsub.f32 %v5970_v51, %v1649_v31  ;;  %4235 = vmatprep.mubr.msk.bf16.mxu1 %vm5051_vm1, %v6375_v2  ;;  %v6421_v51 = vld [vmem:[#allocation46_spill] sm:$0xff]  ;;  %v6444_v63 = vpack.c.bf16 %v6442_v7, %v6443_v43  ;;  %v6445_v21 = vld [vmem:[#allocation56_spill] sm:$0xff] }
 0x9b9   :  { %4263 = vmatprep.subr.bf16.mxu1 %v6375_v2  ;;  %v2397_v48 = vmul.f32 %v4590_v20, %v5972_v38  ;;  %v6423_v16 = vpack.c.bf16 %v6421_v51, %v6422_v3  ;;  %v6446_v31 = vld [vmem:[#allocation54_spill] sm:$0xff] }
 0x9ba   :  { %v4592_v39 = vpop.eup %4591  ;;  %4597 = vpow2.f32 %v1672_v56  ;;  %v1674_v33 = vmul.f32 1.442695, %v1661_v37  ;;  %v6447_v20 = vpack.c.bf16 %v6445_v21, %v6446_v31 }
 0x9bb   :  { %v2398_v11 = vmul.f32 %v4592_v39, %v5976_v61 }
 0x9bc   :  { %4599 = vpow2.f32 %v1674_v33 }
 0x9bd   :  { %v2402_v55 = vpack.c.bf16 %v2398_v11, %v2397_v48 }
 0x9bf   :  { %4236 = vmatmul.mubr.msk.bf16.vlgmr.msra.gmra.mrb[108].mxu1 %vm1179_vm2, %v2402_v55  ;;  %v4455_v55 = vld [vmem:[#allocation13 + $0x40] sm:$0xff]  }
 0x9c0   :  { %v4594_v59 = vpop.eup %4593  ;;  %4265 = vmatprep.mubr.msk.bf16.mxu1 %vm5051_vm1, %v6375_v2 }
 0x9c1   :  { %4264 = vmatpush3.bf16.xpose.msra.mxu1 %v6423_v16  ;;  %v1680_v60 = vsel %vm1179_vm2, %v4594_v59, 0.0  ;;  %v6448_v16 = vld [vmem:[#allocation65_spill] sm:$0xff] }
 0x9c2   :  { %v4596_v29 = vpop.eup %4595  ;;  %1681 = vadd.xlane.f32.xlu0 %v1680_v60  ;;  %4269 = vmatprep.subr.bf16.mxu1 %v6375_v2  ;;  %v6449_v60 = vld [vmem:[#allocation62_spill] sm:$0xff] }
 0x9c3   :  { %v1683_v38 = vsel %vm1179_vm2, %v4596_v29, 0.0 }
 0x9c4   :  { %v4598_v61 = vpop.eup %4597  ;;  %1684 = vadd.xlane.f32.xlu1 %v1683_v38  ;;  %v6450_v38 = vpack.c.bf16 %v6448_v16, %v6449_v60  ;;  %v4460_v16 = vld [vmem:[#allocation13 + $0x68] sm:$0xff]  }
 0x9c5   :  { %v1692_v19 = vsel %vm1179_vm2, %v4598_v61, 0.0 }
 0x9c6   :  { %v4600_v62 = vpop.eup %4599  ;;  %1693 = vadd.xlane.f32.xlu0 %v1692_v19 }
 0x9c7   :  { %v1695_v24 = vsel %vm1179_vm2, %v4600_v62, 0.0 }
 0x9c8   :  { %4266 = vmatmul.mubr.bf16.vlgmr.msra.gmra.mrb[112].mxu1 %v6426_v52  ;;  %1696 = vadd.xlane.f32.xlu1 %v1695_v24  ;;  %v4459_v52 = vld [vmem:[#allocation13 + $0x60] sm:$0xff]  }
 0x9c9   :  { %4270 = vmatpush3.bf16.xpose.msra.mxu1 %v6429_v32  ;;  %4271 = vmatprep.mubr.msk.bf16.mxu1 %vm5051_vm1, %v6375_v2 }
 0x9ca   :  { %4275 = vmatprep.subr.bf16.mxu1 %v6375_v2 }
 0x9d0   :  { %4272 = vmatmul.mubr.bf16.vlgmr.msra.gmra.mrb[116].mxu1 %v6432_v8 }
 0x9d1   :  { %4276 = vmatpush3.bf16.xpose.msra.mxu1 %v6435_v44  ;;  %4277 = vmatprep.mubr.msk.bf16.mxu1 %vm5051_vm1, %v6375_v2 }
 0x9d2   :  { %4281 = vmatprep.subr.bf16.mxu1 %v6375_v2 }
 0x9d8   :  { %4278 = vmatmul.mubr.bf16.vlgmr.msra.gmra.mrb[120].mxu1 %v6438_v46 }
 0x9d9   :  { %4282 = vmatpush3.bf16.xpose.msra.mxu1 %v6441_v14  ;;  %4283 = vmatprep.mubr.msk.bf16.mxu1 %vm5051_vm1, %v6375_v2 }
 0x9da   :  { %4287 = vmatprep.subr.bf16.mxu1 %v6375_v2 }
 0x9e0   :  { %4284 = vmatmul.mubr.bf16.vlgmr.msra.gmra.mrb[124].mxu1 %v6444_v63 }
 0x9e1   :  { %4288 = vmatpush3.bf16.msra.mxu1 %v6447_v20  ;;  %4289 = vmatprep.mubr.msk.bf16.mxu1 %vm5051_vm1, %v6375_v2 }
 0x9e2   :  { %4299 = vmatprep.subr.bf16.mxu1 %v6375_v2 }
 0xa4f   :  { %v1682_v56 = vpop.xlane.xlu0 %1681 }
 0xa50   :  { %4601 = vrcp.f32 %v1682_v56 }
 0xa51   :  { %v1685_v42 = vpop.xlane.xlu1 %1684 }
 0xa52   :  { %4603 = vrcp.f32 %v1685_v42 }
 0xa53   :  { %v1694_v1 = vpop.xlane.xlu0 %1693 }
 0xa55   :  { %v1697_v23 = vpop.xlane.xlu1 %1696 }
 0xa56   :  { %4605 = vrcp.f32 %v1697_v23 }
 0xa57   :  { %4607 = vrcp.f32 %v1694_v1 }
 0xa5a   :  { %v4602_v37 = vpop.eup %4601 }
 0xa5b   :  { %v1712_v33 = vmul.f32 %v4602_v37, %v4594_v59  ;;  %v4457_v59 = vld [vmem:[#allocation13 + $0x50] sm:$0xff]  }
 0xa5c   :  { %v4604_v39 = vpop.eup %4603 }
 0xa5d   :  { %v1713_v48 = vmul.f32 %v4604_v39, %v4596_v29  ;;  %v4458_v29 = vld [vmem:[#allocation13 + $0x58] sm:$0xff]  }
 0xa5f   :  { %v1720_v11 = vpack.c.bf16 %v1713_v48, %v1712_v33 }
 0xa60   :  { %v4606_v51 = vpop.eup %4605 }
 0xa61   :  { %4122 = vmatmul.mubr.msk.bf16.vlgmr.msra.gmra.mrb[72].mxu0 %vm1179_vm2, %v1720_v11  ;;  %v4608_v3 = vpop.eup %4607  ;;  %v1717_v19 = vmul.f32 %v4606_v51, %v4600_v62 }
 0xa62   :  { %4132 = vmatpush3.bf16.msra.mxu0 %v6450_v38  ;;  %4133 = vmatprep.mubr.msk.bf16.mxu0 %vm5051_vm1, %v6375_v2  ;;  %v1716_v24 = vmul.f32 %v4608_v3, %v4598_v61 }
 0xa63   :  { %4143 = vmatprep.subr.bf16.mxu0 %v4455_v55 }
 0xa64   :  { %v1722_v6 = vpack.c.bf16 %v1717_v19, %v1716_v24  ;;  %v4461_v24 = vld [vmem:[#allocation13 + $0x70] sm:$0xff]  }
 0xa69   :  { %4134 = vmatmul.mubr.msk.bf16.vlgmr.msra.gmra.mrb[76].mxu0 %vm1179_vm2, %v1722_v6 }
 0xa6a   :  { %4144 = vmatpush3.bf16.msra.mxu0 %v4455_v55 }
 0xa6b   :  { %4145 = vmatprep.subr.bf16.mxu0 %v4456_v5 }
 0xa6e   :  { %4146 = vmatpush3.bf16.msra.mxu0 %v4456_v5 }
 0xa6f   :  { %4147 = vmatprep.subr.bf16.mxu0 %v4457_v59 }
 0xa72   :  { %4148 = vmatpush3.bf16.msra.mxu0 %v4457_v59 }
 0xa73   :  { %4149 = vmatprep.subr.bf16.mxu0 %v4458_v29 }
 0xa76   :  { %4150 = vmatpush3.bf16.msra.mxu0 %v4458_v29  ;;  %v4462_v29 = vld [vmem:[#allocation13 + $0x78] sm:$0xff]  }
 0xa77   :  { %4151 = vmatprep.subr.bf16.mxu0 %v4459_v52 }
 0xa7a   :  { %v6074_v49 = vpop.f32.mrb[96].mxu1  ;;  %4152 = vmatpush3.bf16.msra.mxu0 %v4459_v52 }
 0xa7b   :  { %v4219_v62 = vpop.f32.mrb[97].mxu1  ;;  %4153 = vmatprep.subr.bf16.mxu0 %v4460_v16 }
 0xa7c   :  { %v6076_v61 = vpop.f32.mrb[98].mxu1 }
 0xa7d   :  { %v2579_v47 = vpack.c.bf16 %v6076_v61, %v6074_v49  ;;  %v4220_v32 = vpop.f32.mrb[99].mxu1 }
 0xa7e   :  { %4154 = vmatpush3.bf16.msra.mxu0 %v4460_v16 }
 0xa7f   :  { %4155 = vmatprep.subr.bf16.mxu0 %v4461_v24 }
 0xa82   :  { %v6080_v41 = vpop.f32.mrb[100].mxu1  ;;  %4156 = vmatpush3.bf16.msra.mxu0 %v4461_v24 }
 0xa83   :  { %v4225_v4 = vpop.f32.mrb[101].mxu1  ;;  %4157 = vmatprep.subr.bf16.mxu0 %v4462_v29 }
 0xa84   :  { %v6082_v8 = vpop.f32.mrb[102].mxu1  ;;  %v4463_v4 = vld [vmem:[#allocation13] sm:$0xff]  }
 0xa85   :  { %v2580_v0 = vpack.c.bf16 %v6082_v8, %v6080_v41  ;;  %v4226_v35 = vpop.f32.mrb[103].mxu1 }
 0xa86   :  { %4158 = vmatpush3.bf16.msra.mxu0 %v4462_v29 }
 0xa87   :  { %4167 = vmatprep.subr.bf16.mxu0 %v4463_v4 }
 0xa8a   :  { %v6086_v44 = vpop.f32.mrb[104].mxu1 }
 0xa8b   :  { %v4231_v10 = vpop.f32.mrb[105].mxu1 }
 0xa8c   :  { %v6088_v25 = vpop.f32.mrb[106].mxu1 }
 0xa8d   :  { %v2581_v46 = vpack.c.bf16 %v6088_v25, %v6086_v44  ;;  %v4232_v53 = vpop.f32.mrb[107].mxu1 }
 0xa92   :  { %v6092_v57 = vpop.f32.mrb[108].mxu1 }
 0xa93   :  { %v4237_v14 = vpop.f32.mrb[109].mxu1 }
 0xa94   :  { %v6094_v7 = vpop.f32.mrb[110].mxu1 }
 0xa95   :  { %v2582_v43 = vpack.c.bf16 %v6094_v7, %v6092_v57  ;;  %v4238_v63 = vpop.f32.mrb[111].mxu1  ;;  %v6454_v7 = vld [vmem:[#allocation66_spill] sm:$0xff] }
 0xa9b   :  { %v2755_v21 = vpop.f32.mrb[112].mxu1 }
 0xa9c   :  { %v4267_v31 = vpop.f32.mrb[113].mxu1  ;;  %v2885_v20 = vsel %vm1179_vm2, %v2755_v21, -inf }
 0xa9d   :  { %2886 = vmax.xlane.f32.xlu0 %v2885_v20  ;;  %v2758_v56 = vpop.f32.mrb[114].mxu1 }
 0xa9e   :  { %v4268_v42 = vpop.f32.mrb[115].mxu1  ;;  %v2888_v1 = vsel %vm1179_vm2, %v2758_v56, -inf }
 0xa9f   :  { %2889 = vmax.xlane.f32.xlu1 %v2888_v1 }
 0xaa3   :  { %v2796_v23 = vpop.f32.mrb[116].mxu1 }
 0xaa4   :  { %v4273_v37 = vpop.f32.mrb[117].mxu1  ;;  %v2891_v39 = vsel %vm1179_vm2, %v2796_v23, -inf }
 0xaa5   :  { %2892 = vmax.xlane.f32.xlu0 %v2891_v39  ;;  %v2799_v33 = vpop.f32.mrb[118].mxu1 }
 0xaa6   :  { %v4274_v48 = vpop.f32.mrb[119].mxu1  ;;  %v2894_v11 = vsel %vm1179_vm2, %v2799_v33, -inf }
 0xaa7   :  { %2895 = vmax.xlane.f32.xlu1 %v2894_v11 }
 0xaab   :  { %v6102_v55 = vpop.f32.mrb[120].mxu1 }
 0xaac   :  { %v4279_v51 = vpop.f32.mrb[121].mxu1  ;;  %v2897_v3 = vsel %vm1179_vm2, %v6102_v55, -inf }
 0xaad   :  { %2898 = vmax.xlane.f32.xlu0 %v2897_v3  ;;  %v6106_v60 = vpop.f32.mrb[122].mxu1 }
 0xaae   :  { %v4280_v38 = vpop.f32.mrb[123].mxu1  ;;  %v2900_v19 = vsel %vm1179_vm2, %v6106_v60, -inf }
 0xaaf   :  { %2901 = vmax.xlane.f32.xlu1 %v2900_v19  ;;  %v4464_v19 = vld [vmem:[#allocation13 + $0x8] sm:$0xff]  }
 0xab3   :  { %v6110_v6 = vpop.f32.mrb[124].mxu1 }
 0xab4   :  { %v4285_v5 = vpop.f32.mrb[125].mxu1  ;;  %v2903_v59 = vsel %vm1179_vm2, %v6110_v6, -inf }
 0xab5   :  { %2904 = vmax.xlane.f32.xlu0 %v2903_v59  ;;  %v6114_v52 = vpop.f32.mrb[126].mxu1 }
 0xab6   :  { %v4286_v62 = vpop.f32.mrb[127].mxu1  ;;  %v2906_v32 = vsel %vm1179_vm2, %v6114_v52, -inf }
 0xab7   :  { %2907 = vmax.xlane.f32.xlu1 %v2906_v32  ;;  %v4465_v62 = vld [vmem:[#allocation13 + $0x10] sm:$0xff]  }
 0xb2a   :  { %v2887_v35 = vpop.xlane.xlu0 %2886 }
 0xb2b   :  { %v2909_v10 = vsub.f32 %v2755_v21, %v2887_v35 }
 0xb2c   :  { %v2890_v53 = vpop.xlane.xlu1 %2889 }
 0xb2d   :  { %v2917_v14 = vmul.f32 1.442695, %v2909_v10  ;;  %v2910_v63 = vsub.f32 %v2758_v56, %v2890_v53 }
 0xb2f   :  { %4609 = vpow2.f32 %v2917_v14  ;;  %v2919_v31 = vmul.f32 1.442695, %v2910_v63 }
 0xb31   :  { %4611 = vpow2.f32 %v2919_v31 }
 0xb32   :  { %v2893_v20 = vpop.xlane.xlu0 %2892 }
 0xb33   :  { %v2911_v42 = vsub.f32 %v2796_v23, %v2893_v20 }
 0xb34   :  { %v2896_v1 = vpop.xlane.xlu1 %2895  ;;  %v1761_v37 = vpop.f32.mrb[72].mxu0 }
 0xb35   :  { %v2921_v39 = vmul.f32 1.442695, %v2911_v42  ;;  %v2912_v48 = vsub.f32 %v2799_v33, %v2896_v1  ;;  %v4123_v11 = vpop.f32.mrb[73].mxu0 }
 0xb36   :  { %v1764_v51 = vpop.f32.mrb[74].mxu0 }
 0xb37   :  { %4613 = vpow2.f32 %v2921_v39  ;;  %v2923_v3 = vmul.f32 1.442695, %v2912_v48  ;;  %v1900_v16 = vpack.c.bf16 %v1764_v51, %v1761_v37  ;;  %v4124_v38 = vpop.f32.mrb[75].mxu0  ;;  %v4470_v39 = vld [vmem:[#allocation13 + $0x38] sm:$0xff]  }
 0xb38   :  { %v4472_v38 = vld [vmem:[#allocation13 + $0x88] sm:$0xff]  }
 0xb39   :  { %v6118_v21 = vpop.eup %4609  ;;  %4615 = vpow2.f32 %v2923_v3  ;;  %4159 = vmatprep.mubr.bf16.mxu0 %v1900_v16  ;;  %v4471_v16 = vld [vmem:[#allocation13 + $0x80] sm:$0xff]  }
 0xb3a   :  { %v2899_v56 = vpop.xlane.xlu0 %2898  ;;  %4160 = vmatmul.mubr.bf16.vlgmr.msra.gmra.mrb[80].mxu0 %v1901_v22  ;;  %v2933_v23 = vsel %vm1179_vm2, %v6118_v21, 0.0 }
 0xb3b   :  { %v6125_v33 = vpop.eup %4611  ;;  %v2913_v24 = vsub.f32 %v6102_v55, %v2899_v56  ;;  %4168 = vmatpush3.bf16.msra.mxu0 %v4463_v4  ;;  %2934 = vadd.xlane.f32.xlu0 %v2933_v23  ;;  %v4466_v4 = vld [vmem:[#allocation13 + $0x18] sm:$0xff]  }
 0xb3c   :  { %v2902_v5 = vpop.xlane.xlu1 %2901  ;;  %v1849_v59 = vpop.f32.mrb[76].mxu0  ;;  %v2936_v29 = vsel %vm1179_vm2, %v6125_v33, 0.0  ;;  %4169 = vmatprep.subr.bf16.mxu0 %v4464_v19  ;;  %v4474_v56 = vld [vmem:[#allocation13 + $0x98] sm:$0xff]  }
 0xb3d   :  { %v2925_v32 = vmul.f32 1.442695, %v2913_v24  ;;  %v2914_v18 = vsub.f32 %v6106_v60, %v2902_v5  ;;  %2937 = vadd.xlane.f32.xlu1 %v2936_v29  ;;  %v4135_v30 = vpop.f32.mrb[77].mxu0  ;;  %v4479_v29 = vld [vmem:[#allocation13 + $0xc0] sm:$0xff]  }
 0xb3e   :  { %v1852_v22 = vpop.f32.mrb[78].mxu0  ;;  %v6458_v30 = vld [vmem:[#allocation68_spill] sm:$0xff] }
 0xb3f   :  { %4617 = vpow2.f32 %v2925_v32  ;;  %v2927_v35 = vmul.f32 1.442695, %v2914_v18  ;;  %v1902_v10 = vpack.c.bf16 %v1852_v22, %v1849_v59  ;;  %4170 = vmatpush3.bf16.msra.mxu0 %v4464_v19  ;;  %v4136_v55 = vpop.f32.mrb[79].mxu0  ;;  %v4473_v19 = vld [vmem:[#allocation13 + $0x90] sm:$0xff]  }
 0xb40   :  { %4171 = vmatprep.subr.bf16.mxu0 %v4465_v62  ;;  %v6457_v18 = vld [vmem:[#allocation70_spill] sm:$0xff] }
 0xb41   :  { %v6131_v53 = vpop.eup %4613  ;;  %4619 = vpow2.f32 %v2927_v35  ;;  %4163 = vmatprep.mubr.bf16.mxu0 %v1902_v10  ;;  %v6459_v22 = vpack.c.bf16 %v6457_v18, %v6458_v30 }
 0xb42   :  { %v2905_v14 = vpop.xlane.xlu0 %2904  ;;  %4164 = vmatmul.mubr.bf16.gmra.mrb[84].mxu0 %v1903_v9  ;;  %v2939_v60 = vsel %vm1179_vm2, %v6131_v53, 0.0 }
 0xb43   :  { %v6138_v63 = vpop.eup %4615  ;;  %v2915_v31 = vsub.f32 %v6110_v6, %v2905_v14  ;;  %4172 = vmatpush3.bf16.msra.mxu0 %v4465_v62  ;;  %2940 = vadd.xlane.f32.xlu0 %v2939_v60  ;;  %v4468_v6 = vld [vmem:[#allocation13 + $0x28] sm:$0xff]  }
 0xb44   :  { %4183 = vmatprep.mubr.bf16.mxu0 %v1448_v28  ;;  %v2908_v20 = vpop.xlane.xlu1 %2907  ;;  %v2942_v42 = vsel %vm1179_vm2, %v6138_v63, 0.0  ;;  %4173 = vmatprep.subr.bf16.mxu0 %v4466_v4 }
 0xb45   :  { %v2929_v54 = vmul.f32 1.442695, %v2915_v31  ;;  %v2916_v9 = vsub.f32 %v6114_v52, %v2908_v20  ;;  %2943 = vadd.xlane.f32.xlu1 %v2942_v42  ;;  %v4469_v52 = vld [vmem:[#allocation13 + $0x30] sm:$0xff]   ;;  %v4480_v20 = vld [vmem:[#allocation13 + $0xc8] sm:$0xff]   ;;  %v4482_v42 = vld [vmem:[#allocation13 + $0xd8] sm:$0xff]  }
 0xb47   :  { %4621 = vpow2.f32 %v2929_v54  ;;  %v2931_v1 = vmul.f32 1.442695, %v2916_v9  ;;  %4174 = vmatpush3.bf16.msra.mxu0 %v4466_v4  ;;  %v4484_v54 = vld [vmem:[#allocation13 + $0xe8] sm:$0xff]   ;;  %v4485_v9 = vld [vmem:[#allocation13 + $0xf0] sm:$0xff]  }
 0xb48   :  { %4175 = vmatprep.subr.bf16.mxu0 %v4467_v27 }
 0xb49   :  { %v6147_v37 = vpop.eup %4617  ;;  %4623 = vpow2.f32 %v2931_v1  ;;  %v4486_v1 = vld [vmem:[#allocation13 + $0xf8] sm:$0xff]  }
 0xb4a   :  { %v2945_v13 = vsel %vm1179_vm2, %v6147_v37, 0.0 }
 0xb4b   :  { %v6151_v15 = vpop.eup %4619  ;;  %4176 = vmatpush3.bf16.msra.mxu0 %v4467_v27  ;;  %2946 = vadd.xlane.f32.xlu0 %v2945_v13  ;;  %v4483_v27 = vld [vmem:[#allocation13 + $0xe0] sm:$0xff]  }
 0xb4c   :  { %v2948_v28 = vsel %vm1179_vm2, %v6151_v15, 0.0  ;;  %4177 = vmatprep.subr.bf16.mxu0 %v4468_v6 }
 0xb4d   :  { %2949 = vadd.xlane.f32.xlu1 %v2948_v28 }
 0xb4f   :  { %4178 = vmatpush3.bf16.msra.mxu0 %v4468_v6 }
 0xb50   :  { %4179 = vmatprep.subr.bf16.mxu0 %v4469_v52 }
 0xb51   :  { %v6155_v48 = vpop.eup %4621 }
 0xb52   :  { %v2951_v11 = vsel %vm1179_vm2, %v6155_v48, 0.0 }
 0xb53   :  { %v6159_v51 = vpop.eup %4623  ;;  %4180 = vmatpush3.bf16.msra.mxu0 %v4469_v52  ;;  %2952 = vadd.xlane.f32.xlu0 %v2951_v11 }
 0xb54   :  { %v2954_v3 = vsel %vm1179_vm2, %v6159_v51, 0.0  ;;  %4181 = vmatprep.subr.bf16.mxu0 %v4470_v39 }
 0xb55   :  { %2955 = vadd.xlane.f32.xlu1 %v2954_v3 }
 0xb57   :  { %4182 = vmatpush3.bf16.msra.mxu0 %v4470_v39 }
 0xb58   :  { %4239 = vmatprep.subr.bf16.mxu0 %v4471_v16 }
 0xb5a   :  { %4184 = vmatmul.mubr.bf16.vlgmr.msra.gmra.mrb[80].mxu0 %v1449_v36  ;;  %v4477_v36 = vld [vmem:[#allocation13 + $0xb0] sm:$0xff]  }
 0xb5b   :  { %4187 = vmatprep.mubr.bf16.mxu0 %v1450_v50  ;;  %4240 = vmatpush3.bf16.msra.mxu0 %v4471_v16 }
 0xb5c   :  { %4241 = vmatprep.subr.bf16.mxu0 %v4472_v38 }
 0xb5f   :  { %4242 = vmatpush3.bf16.msra.mxu0 %v4472_v38 }
 0xb60   :  { %4243 = vmatprep.subr.bf16.mxu0 %v4473_v19 }
 0xb62   :  { %4188 = vmatmul.mubr.bf16.gmra.mrb[84].mxu0 %v1451_v45  ;;  %v6453_v45 = vpack.c.bf16 %v6451_v58, %v6452_v40  ;;  %v3898_v40 = vld [vmem:[#allocation14] ss:$0 sm:$0xff] }
 0xb63   :  { %4244 = vmatpush3.bf16.msra.mxu0 %v4473_v19  ;;  %4255 = vmatprep.mubr.bf16.mxu0 %v2579_v47 }
 0xb64   :  { %4245 = vmatprep.subr.bf16.mxu0 %v4474_v56 }
 0xb67   :  { %4246 = vmatpush3.bf16.msra.mxu0 %v4474_v56 }
 0xb68   :  { %4247 = vmatprep.subr.bf16.mxu0 %v4475_v34 }
 0xb6b   :  { %4248 = vmatpush3.bf16.msra.mxu0 %v4475_v34 }
 0xb6c   :  { %4249 = vmatprep.subr.bf16.mxu0 %v4476_v17 }
 0xb6f   :  { %4250 = vmatpush3.bf16.msra.mxu0 %v4476_v17 }
 0xb70   :  { %4251 = vmatprep.subr.bf16.mxu0 %v4477_v36 }
 0xb73   :  { %4252 = vmatpush3.bf16.msra.mxu0 %v4477_v36 }
 0xb74   :  { %4253 = vmatprep.subr.bf16.mxu0 %v4478_v26 }
 0xb77   :  { %4254 = vmatpush3.bf16.msra.mxu0 %v4478_v26 }
 0xb78   :  { %4293 = vmatprep.subr.bf16.mxu0 %v6375_v2 }
 0xb7a   :  { %4256 = vmatmul.mubr.bf16.vlgmr.msra.gmra.mrb[80].mxu0 %v2580_v0 }
 0xb7b   :  { %4259 = vmatprep.mubr.bf16.mxu0 %v2581_v46  ;;  %4294 = vmatpush3.bf16.msra.mxu0 %v6453_v45 }
 0xb7c   :  { %4305 = vmatprep.subr.bf16.mxu0 %v6375_v2 }
 0xb82   :  { %4260 = vmatmul.mubr.bf16.gmra.mrb[84].mxu0 %v2582_v43  ;;  %v6455_v43 = vld [vmem:[#allocation63_spill] sm:$0xff] }
 0xb83   :  { %4295 = vmatprep.mubr.msk.bf16.mxu0 %vm5051_vm1, %v6375_v2  ;;  %v6456_v23 = vpack.c.bf16 %v6454_v7, %v6455_v43  ;;  %v4675_v7 = vld [vmem:[#allocation2 + $0x10] sm:$0xff] }
 0xbc8   :  { %v2935_v12 = vpop.xlane.xlu0 %2934 }
 0xbc9   :  { %4625 = vrcp.f32 %v2935_v12 }
 0xbca   :  { %v2938_v50 = vpop.xlane.xlu1 %2937 }
 0xbcb   :  { %4627 = vrcp.f32 %v2938_v50 }
 0xbd0   :  { %v2941_v49 = vpop.xlane.xlu0 %2940 }
 0xbd1   :  { %4629 = vrcp.f32 %v2941_v49 }
 0xbd2   :  { %v2944_v61 = vpop.xlane.xlu1 %2943 }
 0xbd3   :  { %v4626_v47 = vpop.eup %4625  ;;  %4631 = vrcp.f32 %v2944_v61 }
 0xbd4   :  { %v2965_v8 = vmul.f32 %v4626_v47, %v6118_v21 }
 0xbd5   :  { %v4628_v41 = vpop.eup %4627 }
 0xbd6   :  { %v2966_v0 = vmul.f32 %v4628_v41, %v6125_v33 }
 0xbd8   :  { %v2947_v44 = vpop.xlane.xlu0 %2946  ;;  %v2973_v25 = vpack.c.bf16 %v2966_v0, %v2965_v8  ;;  %v4673_v0 = vld [vmem:[#allocation2] sm:$0xff] }
 0xbd9   :  { %4633 = vrcp.f32 %v2947_v44 }
 0xbda   :  { %4290 = vmatmul.mubr.msk.bf16.vlgmr.msra.gmra.mrb[128].mxu1 %vm1179_vm2, %v2973_v25  ;;  %v2950_v46 = vpop.xlane.xlu1 %2949 }
 0xbdb   :  { %v4630_v57 = vpop.eup %4629  ;;  %4300 = vmatpush3.bf16.msra.mxu1 %v6456_v23  ;;  %4635 = vrcp.f32 %v2950_v46  ;;  %4301 = vmatprep.mubr.msk.bf16.mxu1 %vm5051_vm1, %v6375_v2  ;;  %v4674_v46 = vld [vmem:[#allocation2 + $0x8] sm:$0xff] }
 0xbdc   :  { %v2967_v21 = vmul.f32 %v4630_v57, %v6131_v53 }
 0xbdd   :  { %v4632_v24 = vpop.eup %4631 }
 0xbde   :  { %v2968_v33 = vmul.f32 %v4632_v24, %v6138_v63  ;;  %v4676_v24 = vld [vmem:[#allocation2 + $0x18] sm:$0xff] }
 0xbe0   :  { %v2974_v5 = vpack.c.bf16 %v2968_v33, %v2967_v21  ;;  %v2953_v59 = vpop.xlane.xlu0 %2952 }
 0xbe1   :  { %4637 = vrcp.f32 %v2953_v59 }
 0xbe2   :  { %4296 = vmatmul.mubr.msk.bf16.vlgmr.msra.gmra.mrb[88].mxu0 %vm1179_vm2, %v2974_v5  ;;  %v2956_v62 = vpop.xlane.xlu1 %2955 }
 0xbe3   :  { %v4634_v32 = vpop.eup %4633  ;;  %4306 = vmatpush3.bf16.msra.mxu0 %v6459_v22  ;;  %4639 = vrcp.f32 %v2956_v62  ;;  %4307 = vmatprep.mubr.msk.bf16.mxu0 %vm5051_vm1, %v6375_v2  ;;  %v4481_v2 = vld [vmem:[#allocation13 + $0xd0] sm:$0xff]  }
 0xbe4   :  { %4311 = vmatprep.subr.bf16.mxu0 %v4479_v29  ;;  %v2969_v10 = vmul.f32 %v4634_v32, %v6147_v37 }
 0xbe5   :  { %v4636_v35 = vpop.eup %4635 }
 0xbe6   :  { %v2970_v55 = vmul.f32 %v4636_v35, %v6151_v15 }
 0xbe8   :  { %v2975_v4 = vpack.c.bf16 %v2970_v55, %v2969_v10  ;;  %v4677_v10 = vld [vmem:[#allocation2 + $0x20] sm:$0xff] }
 0xbea   :  { %4302 = vmatmul.mubr.msk.bf16.vlgmr.msra.gmra.mrb[132].mxu1 %vm1179_vm2, %v2975_v4 }
 0xbeb   :  { %v4638_v53 = vpop.eup %4637 }
 0xbec   :  { %v2971_v60 = vmul.f32 %v4638_v53, %v6155_v48  ;;  %v4678_v53 = vld [vmem:[#allocation2 + $0x28] sm:$0xff] }
 0xbed   :  { %v4640_v14 = vpop.eup %4639 }
 0xbee   :  { %v2972_v63 = vmul.f32 %v4640_v14, %v6159_v51 }
 0xbf0   :  { %v2976_v31 = vpack.c.bf16 %v2972_v63, %v2971_v60  ;;  %v4679_v60 = vld [vmem:[#allocation2 + $0x30] sm:$0xff] }
 0xbf2   :  { %4308 = vmatmul.mubr.msk.bf16.vlgmr.msra.gmra.mrb[92].mxu0 %vm1179_vm2, %v2976_v31 }
 0xbf3   :  { %4312 = vmatpush3.bf16.msra.mxu0 %v4479_v29 }
 0xbf4   :  { %4313 = vmatprep.subr.bf16.mxu0 %v4480_v20 }
 0xbf7   :  { %4314 = vmatpush3.bf16.msra.mxu0 %v4480_v20  ;;  %v4680_v20 = vld [vmem:[#allocation2 + $0x38] sm:$0xff] }
 0xbf8   :  { %4315 = vmatprep.subr.bf16.mxu0 %v4481_v2 }
 0xbfb   :  { %4316 = vmatpush3.bf16.msra.mxu0 %v4481_v2 }
 0xbfc   :  { %4317 = vmatprep.subr.bf16.mxu0 %v4482_v42 }
 0xbff   :  { %4318 = vmatpush3.bf16.msra.mxu0 %v4482_v42 }
 0xc00   :  { %4319 = vmatprep.subr.bf16.mxu0 %v4483_v27 }
 0xc03   :  { %4320 = vmatpush3.bf16.msra.mxu0 %v4483_v27 }
 0xc04   :  { %4321 = vmatprep.subr.bf16.mxu0 %v4484_v54 }
 0xc07   :  { %4322 = vmatpush3.bf16.msra.mxu0 %v4484_v54 }
 0xc08   :  { %4323 = vmatprep.subr.bf16.mxu0 %v4485_v9 }
 0xc0b   :  { %4324 = vmatpush3.bf16.msra.mxu0 %v4485_v9 }
 0xc0c   :  { %4325 = vmatprep.subr.bf16.mxu0 %v4486_v1 }
 0xc0f   :  { %4326 = vmatpush3.bf16.msra.mxu0 %v4486_v1 }
 0xcad   :  { %v3014_v6 = vpop.f32.mrb[128].mxu1 }
 0xcae   :  { %v4291_v37 = vpop.f32.mrb[129].mxu1 }
 0xcaf   :  { %v3017_v13 = vpop.f32.mrb[130].mxu1 }
 0xcb0   :  { %v3153_v15 = vpack.c.bf16 %v3017_v13, %v3014_v6  ;;  %v4292_v28 = vpop.f32.mrb[131].mxu1 }
 0xcb2   :  { %4327 = vmatprep.mubr.bf16.mxu0 %v3153_v15 }
 0xcb5   :  { %v3058_v52 = vpop.f32.mrb[88].mxu0 }
 0xcb6   :  { %v4297_v39 = vpop.f32.mrb[89].mxu0 }
 0xcb7   :  { %v3061_v48 = vpop.f32.mrb[90].mxu0 }
 0xcb8   :  { %v3154_v11 = vpack.c.bf16 %v3061_v48, %v3058_v52  ;;  %v4298_v51 = vpop.f32.mrb[91].mxu0 }
 0xcba   :  { %4328 = vmatmul.mubr.bf16.vlgmr.msra.gmra.mrb[80].mxu0 %v3154_v11 }
 0xcbd   :  { %v3102_v3 = vpop.f32.mrb[132].mxu1 }
 0xcbe   :  { %v4303_v16 = vpop.f32.mrb[133].mxu1 }
 0xcbf   :  { %v3105_v38 = vpop.f32.mrb[134].mxu1 }
 0xcc0   :  { %v3155_v19 = vpack.c.bf16 %v3105_v38, %v3102_v3  ;;  %v4304_v56 = vpop.f32.mrb[135].mxu1 }
 0xcc2   :  { %4331 = vmatprep.mubr.bf16.mxu0 %v3155_v19 }
 0xcc5   :  { %v3146_v34 = vpop.f32.mrb[92].mxu0 }
 0xcc6   :  { %v4309_v17 = vpop.f32.mrb[93].mxu0 }
 0xcc7   :  { %v3149_v36 = vpop.f32.mrb[94].mxu0 }
 0xcc8   :  { %v3156_v26 = vpack.c.bf16 %v3149_v36, %v3146_v34  ;;  %v4310_v58 = vpop.f32.mrb[95].mxu0 }
 0xcca   :  { %4332 = vmatmul.mubr.bf16.gmra.mrb[84].mxu0 %v3156_v26 }
 0xd8d   :  { %v4329_v45 = vpop.f32.mrb[80].mxu0 }
 0xd8e   :  { %v3256_v12 = vpop.f32.mrb[81].mxu0  ;;  %v3304_v50 = vadd.f32 %v4329_v45, %v3898_v40 }
 0xd8f   :  { %v3302_v49 = vadd.f32 %v3898_v40, %v3256_v12  ;;  %v4330_v61 = vpop.f32.mrb[82].mxu0 }
 0xd90   :  { %v3259_v47 = vpop.f32.mrb[83].mxu0  ;;  %v3305_v41 = vadd.f32 %v4330_v61, %v3898_v40  ;;  %v3312_v43 = vadd.f32 %v4675_v7, %v3304_v50 }
 0xd91   :  { %v3303_v8 = vadd.f32 %v3898_v40, %v3259_v47  ;;  %v3310_v44 = vadd.f32 %v4673_v0, %v3302_v49 }
 0xd92   :  { %v3313_v21 = vadd.f32 %v4676_v24, %v3305_v41  ;;  %v3326_v33 = vsel %vm235_vm0, %v3312_v43, 0.0  ;;  %v4487_v24 = vld [vmem:[#allocation19] sm:$0xff]  }
 0xd93   :  { %v3320_v25 = vsel %vm235_vm0, %v3310_v44, 0.0  ;;  %v3311_v57 = vadd.f32 %v4674_v46, %v3303_v8  ;;  %4335 = vmatprep.subr.bf16.mxu1 %v4487_v24 }
 0xd94   :  { %3321 = vadd.xlane.f32.xlu0 %v3320_v25  ;;  %v3329_v5 = vsel %vm235_vm0, %v3313_v21, 0.0  ;;  %4336 = vmatpush3.bf16.msra.mxu1 %v4487_v24 }
 0xd95   :  { %v3323_v23 = vsel %vm235_vm0, %v3311_v57, 0.0 }
 0xd96   :  { %3324 = vadd.xlane.f32.xlu1 %v3323_v23 }
 0xd98   :  { %3327 = vadd.xlane.f32.xlu0 %v3326_v33 }
 0xd9a   :  { %3330 = vadd.xlane.f32.xlu1 %v3329_v5 }
 0xd9d   :  { %v4333_v59 = vpop.f32.mrb[84].mxu0 }
 0xd9e   :  { %v3272_v29 = vpop.f32.mrb[85].mxu0  ;;  %v3308_v62 = vadd.f32 %v4333_v59, %v3898_v40 }
 0xd9f   :  { %v3306_v32 = vadd.f32 %v3898_v40, %v3272_v29  ;;  %v4334_v18 = vpop.f32.mrb[86].mxu0 }
 0xda0   :  { %v3275_v30 = vpop.f32.mrb[87].mxu0  ;;  %v3309_v22 = vadd.f32 %v4334_v18, %v3898_v40  ;;  %v3316_v63 = vadd.f32 %v4679_v60, %v3308_v62 }
 0xda1   :  { %v3307_v35 = vadd.f32 %v3898_v40, %v3275_v30  ;;  %v3314_v55 = vadd.f32 %v4677_v10, %v3306_v32 }
 0xda2   :  { %v3317_v2 = vadd.f32 %v4680_v20, %v3309_v22  ;;  %v3338_v42 = vsel %vm235_vm0, %v3316_v63, 0.0 }
 0xda3   :  { %v3332_v4 = vsel %vm235_vm0, %v3314_v55, 0.0  ;;  %v3315_v14 = vadd.f32 %v4678_v53, %v3307_v35  ;;  %v3899_v53 = vld [vmem:[#allocation16] ss:$0 sm:$0xff] }
 0xda4   :  { %3333 = vadd.xlane.f32.xlu0 %v3332_v4  ;;  %v3341_v27 = vsel %vm235_vm0, %v3317_v2, 0.0 }
 0xda5   :  { %v3335_v31 = vsel %vm235_vm0, %v3315_v14, 0.0 }
 0xda6   :  { %3336 = vadd.xlane.f32.xlu1 %v3335_v31 }
 0xda8   :  { %3339 = vadd.xlane.f32.xlu0 %v3338_v42 }
 0xdaa   :  { %3342 = vadd.xlane.f32.xlu1 %v3341_v27 }
 0xe21   :  { %v3322_v54 = vpop.xlane.xlu0 %3321 }
 0xe22   :  { %v3344_v9 = vmul.f32 0.03125, %v3322_v54 }
 0xe23   :  { %v3325_v1 = vpop.xlane.xlu1 %3324 }
 0xe24   :  { %v6221_v6 = vsub.f32 %v3310_v44, %v3344_v9  ;;  %v3345_v37 = vmul.f32 0.03125, %v3325_v1  ;;  %v3900_v1 = vld [vmem:[#allocation17] ss:$0 sm:$0xff] }
 0xe25   :  { %v3328_v13 = vpop.xlane.xlu0 %3327 }
 0xe26   :  { %v6223_v15 = vsub.f32 %v3311_v57, %v3345_v37  ;;  %v3346_v28 = vmul.f32 0.03125, %v3328_v13  ;;  %v3360_v52 = vmul.f32 %v6221_v6, %v6221_v6 }
 0xe27   :  { %v3331_v39 = vpop.xlane.xlu1 %3330 }
 0xe28   :  { %v6227_v48 = vsub.f32 %v3312_v43, %v3346_v28  ;;  %v3347_v11 = vmul.f32 0.03125, %v3331_v39  ;;  %v3368_v51 = vsel %vm235_vm0, %v3360_v52, 0.0  ;;  %v3361_v3 = vmul.f32 %v6223_v15, %v6223_v15 }
 0xe29   :  { %3369 = vadd.xlane.f32.xlu0 %v3368_v51 }
 0xe2a   :  { %v6232_v16 = vsub.f32 %v3313_v21, %v3347_v11  ;;  %v3371_v38 = vsel %vm235_vm0, %v3361_v3, 0.0  ;;  %v3362_v19 = vmul.f32 %v6227_v48, %v6227_v48  ;;  %v4488_v21 = vld [vmem:[#allocation19 + $0x8] sm:$0xff]  }
 0xe2b   :  { %3372 = vadd.xlane.f32.xlu1 %v3371_v38  ;;  %4337 = vmatprep.subr.bf16.mxu1 %v4488_v21 }
 0xe2c   :  { %v3374_v56 = vsel %vm235_vm0, %v3362_v19, 0.0  ;;  %v3363_v34 = vmul.f32 %v6232_v16, %v6232_v16  ;;  %4338 = vmatpush3.bf16.msra.mxu1 %v4488_v21 }
 0xe2d   :  { %3375 = vadd.xlane.f32.xlu0 %v3374_v56 }
 0xe2e   :  { %v3377_v17 = vsel %vm235_vm0, %v3363_v34, 0.0 }
 0xe2f   :  { %3378 = vadd.xlane.f32.xlu1 %v3377_v17 }
 0xe31   :  { %v3334_v36 = vpop.xlane.xlu0 %3333 }
 0xe32   :  { %v3348_v26 = vmul.f32 0.03125, %v3334_v36 }
 0xe33   :  { %v3337_v58 = vpop.xlane.xlu1 %3336 }
 0xe34   :  { %v6241_v40 = vsub.f32 %v3314_v55, %v3348_v26  ;;  %v3349_v45 = vmul.f32 0.03125, %v3337_v58 }
 0xe35   :  { %v3340_v12 = vpop.xlane.xlu0 %3339 }
 0xe36   :  { %v6243_v50 = vsub.f32 %v3315_v14, %v3349_v45  ;;  %v3350_v49 = vmul.f32 0.03125, %v3340_v12  ;;  %v3364_v61 = vmul.f32 %v6241_v40, %v6241_v40 }
 0xe37   :  { %v3343_v47 = vpop.xlane.xlu1 %3342 }
 0xe38   :  { %v6247_v41 = vsub.f32 %v3316_v63, %v3350_v49  ;;  %v3351_v8 = vmul.f32 0.03125, %v3343_v47  ;;  %v3380_v0 = vsel %vm235_vm0, %v3364_v61, 0.0  ;;  %v3365_v44 = vmul.f32 %v6243_v50, %v6243_v50 }
 0xe39   :  { %3381 = vadd.xlane.f32.xlu0 %v3380_v0 }
 0xe3a   :  { %v6252_v25 = vsub.f32 %v3317_v2, %v3351_v8  ;;  %v3383_v46 = vsel %vm235_vm0, %v3365_v44, 0.0  ;;  %v3366_v57 = vmul.f32 %v6247_v41, %v6247_v41 }
 0xe3b   :  { %3384 = vadd.xlane.f32.xlu1 %v3383_v46 }
 0xe3c   :  { %v3386_v7 = vsel %vm235_vm0, %v3366_v57, 0.0  ;;  %v3367_v43 = vmul.f32 %v6252_v25, %v6252_v25 }
 0xe3d   :  { %3387 = vadd.xlane.f32.xlu0 %v3386_v7 }
 0xe3e   :  { %v3389_v23 = vsel %vm235_vm0, %v3367_v43, 0.0 }
 0xe3f   :  { %3390 = vadd.xlane.f32.xlu1 %v3389_v23 }
 0xeb6   :  { %v3370_v33 = vpop.xlane.xlu0 %3369 }
 0xeb7   :  { %v3392_v5 = vmul.f32 0.03125, %v3370_v33 }
 0xeb8   :  { %v3373_v59 = vpop.xlane.xlu1 %3372 }
 0xeb9   :  { %v3400_v29 = vadd.f32 1e-05, %v3392_v5  ;;  %v3393_v62 = vmul.f32 0.03125, %v3373_v59  ;;  %v4491_v5 = vld [vmem:[#allocation22 + $0x10] sm:$0xff]   ;;  %v4493_v59 = vld [vmem:[#allocation22 + $0x20] sm:$0xff]  }
 0xeba   :  { %v3376_v32 = vpop.xlane.xlu0 %3375 }
 0xebb   :  { %4641 = vrsqrt.f32 %v3400_v29  ;;  %v3401_v18 = vadd.f32 1e-05, %v3393_v62  ;;  %v3394_v30 = vmul.f32 0.03125, %v3376_v32  ;;  %v4494_v29 = vld [vmem:[#allocation22 + $0x28] sm:$0xff]   ;;  %v4495_v62 = vld [vmem:[#allocation22 + $0x30] sm:$0xff]   ;;  %v4496_v32 = vld [vmem:[#allocation22 + $0x38] sm:$0xff]  }
 0xebc   :  { %v3379_v22 = vpop.xlane.xlu1 %3378 }
 0xebd   :  { %4643 = vrsqrt.f32 %v3401_v18  ;;  %v3402_v35 = vadd.f32 1e-05, %v3394_v30  ;;  %v3395_v10 = vmul.f32 0.03125, %v3379_v22  ;;  %v3901_v18 = vld [vmem:[#allocation20] ss:$0 sm:$0xff] }
 0xebf   :  { %4645 = vrsqrt.f32 %v3402_v35  ;;  %v3403_v55 = vadd.f32 1e-05, %v3395_v10 }
 0xec1   :  { %4647 = vrsqrt.f32 %v3403_v55 }
 0xec5   :  { %v4642_v4 = vpop.eup %4641 }
 0xec6   :  { %v3416_v14 = vmul.f32 %v4642_v4, %v6221_v6  ;;  %v3382_v60 = vpop.xlane.xlu0 %3381 }
 0xec7   :  { %v4644_v63 = vpop.eup %4643  ;;  %v3396_v31 = vmul.f32 0.03125, %v3382_v60 }
 0xec8   :  { %v3417_v20 = vmul.f32 %v4644_v63, %v6223_v15  ;;  %v3385_v2 = vpop.xlane.xlu1 %3384  ;;  %v3430_v42 = vmul.f32 %v3899_v53, %v3416_v14 }
 0xec9   :  { %v4646_v27 = vpop.eup %4645  ;;  %v3404_v54 = vadd.f32 1e-05, %v3396_v31  ;;  %v3397_v9 = vmul.f32 0.03125, %v3385_v2 }
 0xeca   :  { %v3418_v37 = vmul.f32 %v4646_v27, %v6227_v48  ;;  %v3388_v13 = vpop.xlane.xlu0 %3387  ;;  %v3431_v28 = vmul.f32 %v3899_v53, %v3417_v20  ;;  %v3444_v38 = vadd.f32 %v3900_v1, %v3430_v42 }
 0xecb   :  { %v4648_v52 = vpop.eup %4647  ;;  %4649 = vrsqrt.f32 %v3404_v54  ;;  %v3405_v39 = vadd.f32 1e-05, %v3397_v9  ;;  %v3398_v11 = vmul.f32 0.03125, %v3388_v13 }
 0xecc   :  { %v3432_v6 = vmul.f32 %v3899_v53, %v3418_v37  ;;  %v3419_v51 = vmul.f32 %v4648_v52, %v6232_v16  ;;  %v3391_v3 = vpop.xlane.xlu1 %3390  ;;  %v3445_v15 = vadd.f32 %v3900_v1, %v3431_v28 }
 0xecd   :  { %4651 = vrsqrt.f32 %v3405_v39  ;;  %v3406_v19 = vadd.f32 1e-05, %v3398_v11  ;;  %v3399_v56 = vmul.f32 0.03125, %v3391_v3 }
 0xece   :  { %v3433_v34 = vmul.f32 %v3899_v53, %v3419_v51  ;;  %v3452_v17 = vpack.c.bf16 %v3445_v15, %v3444_v38  ;;  %v3446_v48 = vadd.f32 %v3900_v1, %v3432_v6 }
 0xecf   :  { %4653 = vrsqrt.f32 %v3406_v19  ;;  %v3407_v36 = vadd.f32 1e-05, %v3399_v56 }
 0xed0   :  { %4339 = vmatprep.mubr.msk.bf16.mxu1 %vm235_vm0, %v3452_v17  ;;  %v3447_v26 = vadd.f32 %v3900_v1, %v3433_v34 }
 0xed1   :  { %4655 = vrsqrt.f32 %v3407_v36 }
 0xed2   :  { %v3453_v58 = vpack.c.bf16 %v3447_v26, %v3446_v48 }
 0xed4   :  { %4340 = vmatmul.mubr.msk.bf16.vlgmr.msra.gmra.mrb[136].mxu1 %vm235_vm0, %v3453_v58 }
 0xed5   :  { %v4650_v45 = vpop.eup %4649 }
 0xed6   :  { %v3420_v16 = vmul.f32 %v4650_v45, %v6241_v40 }
 0xed7   :  { %v4652_v12 = vpop.eup %4651 }
 0xed8   :  { %v3421_v49 = vmul.f32 %v4652_v12, %v6243_v50  ;;  %v3434_v61 = vmul.f32 %v3899_v53, %v3420_v16  ;;  %v4489_v50 = vld [vmem:[#allocation22] sm:$0xff]  }
 0xed9   :  { %v4654_v47 = vpop.eup %4653  ;;  %4347 = vmatprep.subr.bf16.mxu1 %v4489_v50 }
 0xeda   :  { %v3422_v8 = vmul.f32 %v4654_v47, %v6247_v41  ;;  %v3435_v0 = vmul.f32 %v3899_v53, %v3421_v49  ;;  %v3448_v57 = vadd.f32 %v3900_v1, %v3434_v61  ;;  %4348 = vmatpush3.bf16.msra.mxu1 %v4489_v50  ;;  %v4490_v41 = vld [vmem:[#allocation22 + $0x8] sm:$0xff]  }
 0xedb   :  { %v4656_v44 = vpop.eup %4655  ;;  %4349 = vmatprep.subr.bf16.mxu1 %v4490_v41 }
 0xedc   :  { %v3423_v46 = vmul.f32 %v4656_v44, %v6252_v25  ;;  %v3449_v7 = vadd.f32 %v3900_v1, %v3435_v0  ;;  %v3436_v43 = vmul.f32 %v3899_v53, %v3422_v8  ;;  %v4492_v25 = vld [vmem:[#allocation22 + $0x18] sm:$0xff]  }
 0xede   :  { %v3454_v23 = vpack.c.bf16 %v3449_v7, %v3448_v57  ;;  %v3437_v24 = vmul.f32 %v3899_v53, %v3423_v46  ;;  %v3450_v21 = vadd.f32 %v3900_v1, %v3436_v43  ;;  %4350 = vmatpush3.bf16.msra.mxu1 %v4490_v41 }
 0xedf   :  { %4351 = vmatprep.subr.bf16.mxu1 %v4491_v5 }
 0xee0   :  { %4343 = vmatprep.mubr.msk.bf16.mxu1 %vm235_vm0, %v3454_v23  ;;  %v3451_v40 = vadd.f32 %v3900_v1, %v3437_v24 }
 0xee2   :  { %v3455_v33 = vpack.c.bf16 %v3451_v40, %v3450_v21  ;;  %4352 = vmatpush3.bf16.msra.mxu1 %v4491_v5 }
 0xee3   :  { %4353 = vmatprep.subr.bf16.mxu1 %v4492_v25 }
 0xee4   :  { %4344 = vmatmul.mubr.msk.bf16.gmra.mrb[140].mxu1 %vm235_vm0, %v3455_v33 }
 0xee6   :  { %4354 = vmatpush3.bf16.msra.mxu1 %v4492_v25 }
 0xee7   :  { %4355 = vmatprep.subr.bf16.mxu1 %v4493_v59 }
 0xeea   :  { %4356 = vmatpush3.bf16.msra.mxu1 %v4493_v59 }
 0xeeb   :  { %4357 = vmatprep.subr.bf16.mxu1 %v4494_v29 }
 0xeee   :  { %4358 = vmatpush3.bf16.msra.mxu1 %v4494_v29 }
 0xeef   :  { %4359 = vmatprep.subr.bf16.mxu1 %v4495_v62 }
 0xef2   :  { %4360 = vmatpush3.bf16.msra.mxu1 %v4495_v62 }
 0xef3   :  { %4361 = vmatprep.subr.bf16.mxu1 %v4496_v32 }
 0xef6   :  { %4362 = vmatpush3.bf16.msra.mxu1 %v4496_v32 }
 0xfa7   :  { %v4341_v30 = vpop.f32.mrb[136].mxu1 }
 0xfa8   :  { %v3534_v22 = vadd.f32 %v4341_v30, %v3901_v18  ;;  %v3525_v35 = vpop.f32.mrb[137].mxu1 }
 0xfa9   :  { %v3526_v10 = vadd.f32 %v3901_v18, %v3525_v35  ;;  %v4342_v55 = vpop.f32.mrb[138].mxu1 }
 0xfaa   :  { %v3566_v4 = vmul.f32 0.044715, %v3534_v22  ;;  %v3537_v53 = vadd.f32 %v4342_v55, %v3901_v18  ;;  %v3528_v14 = vpop.f32.mrb[139].mxu1  ;;  %v3558_v46 = vmul.f32 0.5, %v3534_v22 }
 0xfab   :  { %v3564_v60 = vmul.f32 0.044715, %v3526_v10  ;;  %v3529_v63 = vadd.f32 %v3901_v18, %v3528_v14  ;;  %v3556_v21 = vmul.f32 0.5, %v3526_v10 }
 0xfac   :  { %v3574_v31 = vmul.f32 %v3566_v4, %v3534_v22  ;;  %v3567_v20 = vmul.f32 0.044715, %v3537_v53  ;;  %v3559_v41 = vmul.f32 0.5, %v3537_v53 }
 0xfad   :  { %v3572_v2 = vmul.f32 %v3564_v60, %v3526_v10  ;;  %v3565_v42 = vmul.f32 0.044715, %v3529_v63  ;;  %v3557_v29 = vmul.f32 0.5, %v3529_v63 }
 0xfae   :  { %v3582_v27 = vmul.f32 %v3574_v31, %v3534_v22  ;;  %v3575_v54 = vmul.f32 %v3567_v20, %v3537_v53 }
 0xfaf   :  { %v3580_v9 = vmul.f32 %v3572_v2, %v3526_v10  ;;  %v3573_v1 = vmul.f32 %v3565_v42, %v3529_v63 }
 0xfb0   :  { %v3590_v37 = vadd.f32 %v3582_v27, %v3534_v22  ;;  %v3583_v13 = vmul.f32 %v3575_v54, %v3537_v53 }
 0xfb1   :  { %v3581_v28 = vmul.f32 %v3573_v1, %v3529_v63  ;;  %v3588_v52 = vadd.f32 %v3580_v9, %v3526_v10 }
 0xfb2   :  { %v3598_v39 = vmul.f32 0.7978846, %v3590_v37  ;;  %v3591_v11 = vadd.f32 %v3583_v13, %v3537_v53 }
 0xfb3   :  { %v3589_v6 = vadd.f32 %v3581_v28, %v3529_v63  ;;  %v3596_v51 = vmul.f32 0.7978846, %v3588_v52 }
 0xfb4   :  { %4657 = vtanh.f32 %v3598_v39  ;;  %v3599_v3 = vmul.f32 0.7978846, %v3591_v11 }
 0xfb5   :  { %v3597_v38 = vmul.f32 0.7978846, %v3589_v6  ;;  %4659 = vtanh.f32 %v3596_v51 }
 0xfb6   :  { %4661 = vtanh.f32 %v3599_v3 }
 0xfb7   :  { %v4345_v15 = vpop.f32.mrb[140].mxu1  ;;  %4663 = vtanh.f32 %v3597_v38 }
 0xfb8   :  { %v3550_v19 = vadd.f32 %v4345_v15, %v3901_v18  ;;  %v3541_v56 = vpop.f32.mrb[141].mxu1  ;;  %v3908_v15 = vld [vmem:[#allocation23] ss:$0 sm:$0xff] }
 0xfb9   :  { %v3542_v34 = vadd.f32 %v3901_v18, %v3541_v56  ;;  %v4346_v17 = vpop.f32.mrb[142].mxu1 }
 0xfba   :  { %v3570_v36 = vmul.f32 0.044715, %v3550_v19  ;;  %v3553_v48 = vadd.f32 %v4346_v17, %v3901_v18  ;;  %v3544_v26 = vpop.f32.mrb[143].mxu1  ;;  %v3562_v9 = vmul.f32 0.5, %v3550_v19 }
 0xfbb   :  { %v3568_v58 = vmul.f32 0.044715, %v3542_v34  ;;  %v3545_v45 = vadd.f32 %v3901_v18, %v3544_v26  ;;  %v3560_v13 = vmul.f32 0.5, %v3542_v34 }
 0xfbc   :  { %v3578_v16 = vmul.f32 %v3570_v36, %v3550_v19  ;;  %v3571_v12 = vmul.f32 0.044715, %v3553_v48  ;;  %v3563_v1 = vmul.f32 0.5, %v3553_v48 }
 0xfbd   :  { %v3576_v49 = vmul.f32 %v3568_v58, %v3542_v34  ;;  %v3569_v61 = vmul.f32 0.044715, %v3545_v45  ;;  %v3561_v28 = vmul.f32 0.5, %v3545_v45 }
 0xfbe   :  { %v4658_v47 = vpop.eup %4657  ;;  %v3586_v8 = vmul.f32 %v3578_v16, %v3550_v19  ;;  %v3579_v0 = vmul.f32 %v3571_v12, %v3553_v48 }
 0xfbf   :  { %v4660_v44 = vpop.eup %4659  ;;  %v3584_v57 = vmul.f32 %v3576_v49, %v3542_v34  ;;  %v3577_v7 = vmul.f32 %v3569_v61, %v3545_v45  ;;  %v3614_v43 = vadd.f32 1.0, %v4658_v47 }
 0xfc0   :  { %v4662_v23 = vpop.eup %4661  ;;  %v3587_v24 = vmul.f32 %v3579_v0, %v3553_v48  ;;  %v3612_v40 = vadd.f32 1.0, %v4660_v44  ;;  %v3594_v33 = vadd.f32 %v3586_v8, %v3550_v19 }
 0xfc1   :  { %v4664_v50 = vpop.eup %4663  ;;  %v3585_v5 = vmul.f32 %v3577_v7, %v3545_v45  ;;  %v3615_v25 = vadd.f32 1.0, %v4662_v23  ;;  %v3592_v59 = vadd.f32 %v3584_v57, %v3542_v34  ;;  %v3622_v30 = vmul.f32 %v3614_v43, %v3558_v46 }
 0xfc2   :  { %v3613_v62 = vadd.f32 1.0, %v4664_v50  ;;  %v3595_v32 = vadd.f32 %v3587_v24, %v3553_v48  ;;  %v3602_v18 = vmul.f32 0.7978846, %v3594_v33  ;;  %v3620_v4 = vmul.f32 %v3612_v40, %v3556_v21 }
 0xfc3   :  { %v3623_v35 = vmul.f32 %v3615_v25, %v3559_v41  ;;  %v3593_v22 = vadd.f32 %v3585_v5, %v3545_v45  ;;  %v3600_v55 = vmul.f32 0.7978846, %v3592_v59 }
 0xfc4   :  { %v3621_v14 = vmul.f32 %v3613_v62, %v3557_v29  ;;  %v3603_v60 = vmul.f32 0.7978846, %v3595_v32  ;;  %4665 = vtanh.f32 %v3602_v18 }
 0xfc5   :  { %v3629_v10 = vpack.c.bf16 %v3623_v35, %v3622_v30  ;;  %v3601_v31 = vmul.f32 0.7978846, %v3593_v22  ;;  %4667 = vtanh.f32 %v3600_v55 }
 0xfc6   :  { %v3628_v20 = vpack.c.bf16 %v3621_v14, %v3620_v4  ;;  %4669 = vtanh.f32 %v3603_v60 }
 0xfc7   :  { %4671 = vtanh.f32 %v3601_v31 }
 0xfc8   :  { %4363 = vmatprep.mubr.bf16.mxu1 %v3628_v20 }
 0xfc9   :  { %4364 = vmatmul.mubr.bf16.vlgmr.msra.gmra.mrb[144].mxu1 %v3629_v10 }
 0xfce   :  { %v4666_v53 = vpop.eup %4665 }
 0xfcf   :  { %v4668_v63 = vpop.eup %4667  ;;  %v3618_v2 = vadd.f32 1.0, %v4666_v53 }
 0xfd0   :  { %v4670_v42 = vpop.eup %4669  ;;  %v3616_v27 = vadd.f32 1.0, %v4668_v63 }
 0xfd1   :  { %v4672_v54 = vpop.eup %4671  ;;  %v3619_v37 = vadd.f32 1.0, %v4670_v42  ;;  %v3626_v39 = vmul.f32 %v3618_v2, %v3562_v9 }
 0xfd2   :  { %v3617_v52 = vadd.f32 1.0, %v4672_v54  ;;  %v3624_v6 = vmul.f32 %v3616_v27, %v3560_v13 }
 0xfd3   :  { %v3627_v11 = vmul.f32 %v3619_v37, %v3563_v1 }
 0xfd4   :  { %v3625_v51 = vmul.f32 %v3617_v52, %v3561_v28 }
 0xfd5   :  { %v3631_v3 = vpack.c.bf16 %v3627_v11, %v3626_v39 }
 0xfd6   :  { %v3630_v38 = vpack.c.bf16 %v3625_v51, %v3624_v6 }
 0xfd8   :  { %4367 = vmatprep.mubr.bf16.mxu1 %v3630_v38 }
 0xfd9   :  { %4368 = vmatmul.mubr.bf16.gmra.mrb[148].mxu1 %v3631_v3 }
0x109c   :  { %v4365_v56 = vpop.f32.mrb[144].mxu1 }
0x109d   :  { %v3746_v17 = vadd.f32 %v4365_v56, %v3908_v15  ;;  %v3737_v36 = vpop.f32.mrb[145].mxu1 }
0x109e   :  { %v3738_v26 = vadd.f32 %v3908_v15, %v3737_v36  ;;  %v4366_v58 = vpop.f32.mrb[146].mxu1 }
0x109f   :  { %3770 = vst.msk [vmem:[#allocation25 + $0x10] sm:$0xff] %vm235_vm0, %v3746_v17  ;;  %v3749_v19 = vadd.f32 %v4366_v58, %v3908_v15  ;;  %v3740_v34 = vpop.f32.mrb[147].mxu1 }
0x10a0   :  { %3768 = vst.msk [vmem:[#allocation25] sm:$0xff] %vm235_vm0, %v3738_v26  ;;  %v3741_v48 = vadd.f32 %v3908_v15, %v3740_v34 }
0x10a1   :  { %3771 = vst.msk [vmem:[#allocation25 + $0x18] sm:$0xff] %vm235_vm0, %v3749_v19 }
0x10a2   :  { %3769 = vst.msk [vmem:[#allocation25 + $0x8] sm:$0xff] %vm235_vm0, %v3741_v48 }
0x10ac   :  { %v4369_v45 = vpop.f32.mrb[148].mxu1 }
0x10ad   :  { %v3762_v16 = vadd.f32 %v4369_v45, %v3908_v15  ;;  %v3753_v12 = vpop.f32.mrb[149].mxu1 }
0x10ae   :  { %v3754_v49 = vadd.f32 %v3908_v15, %v3753_v12  ;;  %v4370_v61 = vpop.f32.mrb[150].mxu1 }
0x10af   :  { %3774 = vst.msk [vmem:[#allocation25 + $0x30] sm:$0xff] %vm235_vm0, %v3762_v16  ;;  %v3765_v47 = vadd.f32 %v4370_v61, %v3908_v15  ;;  %v3756_v8 = vpop.f32.mrb[151].mxu1 }
0x10b0   :  { %3772 = vst.msk [vmem:[#allocation25 + $0x20] sm:$0xff] %vm235_vm0, %v3754_v49  ;;  %v3757_v0 = vadd.f32 %v3908_v15, %v3756_v8 }
0x10b1   :  { %3775 = vst.msk [vmem:[#allocation25 + $0x38] sm:$0xff] %vm235_vm0, %v3765_v47 }
0x10b2   :  { %3773 = vst.msk [vmem:[#allocation25 + $0x28] sm:$0xff] %vm235_vm0, %v3757_v0 }
0x10b3   :  { %5000 = shalt.err (!%p4997_p4)
}
0x10b4   :  { %s5001_s9 = scalar_lea.hbm %s6310_s14, 1024 }
0x10b5   :  { %p5002_p5 = scmp.ne.s32.totalorder %s6310_s14, %s5001_s9  ;;  %p5005_p6 = scmp.lt.u32.totalorder %s5001_s9, %s6310_s14 }
0x10b7   :  { %p5007_p7 = pnand %p5005_p6, %p5002_p5 }
0x10b9   :  { %5010 = shalt.err (!%p5007_p7)
}
0x10ba   :  { %3787 = dma.vmem_to_hbm [thread:$0]  %s3782_s1, 1024, %s6310_s14, [#allocation4], %s5038_s11, %s5038_s11, %s5039_s16  }
0x10bb   :  { %5027 = dma.done.wait [#allocation4], 1024  }
0x10bc   :  { %5028 = vsyncadd [#allocation4], 4294966272 }
0x10bd   :  { %3791 = vsyncpa [#allocation3], 1 }
0x10be   :  { %3792 = vsyncpa [#allocation6], 1 }
0x10bf   :  { %3793 = vsyncpa [#allocation9], 1 }
0x10c0   :  { %3794 = vsyncpa [#allocation12], 1 }
0x10c1   :  { %3795 = vsyncpa [#allocation15], 1 }
0x10c2   :  { %3796 = vsyncpa [#allocation18], 1 }
0x10c3   :  { %3797 = vsyncpa [#allocation21], 1 }
0x10c4   :  { %3798 = vsyncpa [#allocation24], 1 }
0x10c5   :  { %3799 = vsyncpa [#allocation4], 1 }

</bundles_post_ra>
